<compile_context>
chip_gen: v6e
topology: v6e:2x2x1
jax: 0.10.0
libtpu: 0.0.40
codegen_flags: <defaults>
</compile_context>

<pallas_src>
import functools

import jax
import jax.numpy as jnp
from jax.experimental import pallas as pl
from jax.experimental.pallas import tpu as pltpu

_BN_EPS = 1e-5


# ----------------------------------------------------------------------------
# Pallas kernels
# ----------------------------------------------------------------------------
def _conv1x1_fused_kernel(x_ref, si_ref, bi_ref, w_ref, so_ref, bo_ref, o_ref):
    # o = relu(bn_out(relu(bn_in(x)) @ w)) ; bn folded into scale/shift rows.
    x = jnp.maximum(x_ref[...] * si_ref[...] + bi_ref[...], 0.0)
    y = jnp.dot(x.astype(jnp.bfloat16), w_ref[...],
                preferred_element_type=jnp.float32)
    y = jnp.maximum(y * so_ref[...] + bo_ref[...], 0.0)
    o_ref[...] = y.astype(o_ref.dtype)


def _conv1x1_pre_kernel(x_ref, si_ref, bi_ref, w_ref, o_ref):
    # o = relu(bn_in(x)) @ w     (shortcut branch; pre1 never materialized)
    x = jnp.maximum(x_ref[...] * si_ref[...] + bi_ref[...], 0.0)
    o_ref[...] = jnp.dot(x.astype(jnp.bfloat16), w_ref[...],
                         preferred_element_type=jnp.float32).astype(o_ref.dtype)


def _conv1x1_add_kernel(x_ref, w_ref, res_ref, o_ref):
    # o = x @ w + residual        (final 1x1 conv fused with residual add)
    y = jnp.dot(x_ref[...], w_ref[...], preferred_element_type=jnp.float32)
    o_ref[...] = (y + res_ref[...]).astype(o_ref.dtype)


def _conv3x3_fused_kernel(xp_ref, w_ref, so_ref, bo_ref, o_ref, *, stride, ho, wo):
    # xp_ref: [1, Hp, Wp, C]  zero-padded pre2 (already post-ReLU) for one image (bf16)
    # w_ref : [9, C, Cout]    3x3 conv weight, tap-major (kh*3+kw)           (bf16)
    # o_ref : [Ho*Wo, Cout]   relu(bn3(conv2(pre2))) for this image          (bf16)
    c = xp_ref.shape[3]
    cout = w_ref.shape[2]
    xp = xp_ref[0]                                            # [Hp, Wp, C]
    acc = jnp.zeros((ho * wo, cout), jnp.float32)
    for kh in range(3):
        for kw in range(3):
            if stride == 1:
                tap = xp[kh:kh + ho, kw:kw + wo, :]
            else:
                tap = jax.lax.slice(
                    xp, (kh, kw, 0),
                    (kh + (ho - 1) * stride + 1, kw + (wo - 1) * stride + 1, c),
                    (stride, stride, 1))
            tap2d = tap.reshape(ho * wo, c)
            acc = acc + jnp.dot(tap2d, w_ref[kh * 3 + kw],
                                preferred_element_type=jnp.float32)
    y = jnp.maximum(acc * so_ref[...] + bo_ref[...], 0.0)
    o_ref[...] = y.astype(o_ref.dtype)


# ----------------------------------------------------------------------------
# pallas_call wrappers
# ----------------------------------------------------------------------------
def _pick_row_tile(m, row_bytes, budget_bytes=8 << 20):
    """Largest row tile dividing m whose double-buffered blocks fit the budget."""
    for t in (1024, 512, 256, 128, 64, 32, 16, 8):
        if m % t == 0 and 2 * t * row_bytes <= budget_bytes:
            return t
    return m  # full-M block fallback (legal, grid of 1)


def _vec2(v, c):
    return v.reshape(1, c).astype(jnp.float32)


def conv1x1_bn_relu(x2d, s_in, b_in, w_bf16, s_out, b_out):
    """relu(bn_out( relu(bn_in(x)) @ w )) -> bf16 [M, N]."""
    m, k = x2d.shape
    n = w_bf16.shape[1]
    tm = _pick_row_tile(m, 4 * k + 2 * n)
    return pl.pallas_call(
        _conv1x1_fused_kernel,
        out_shape=jax.ShapeDtypeStruct((m, n), jnp.bfloat16),
        grid_spec=pltpu.PrefetchScalarGridSpec(
            num_scalar_prefetch=0,
            grid=(m // tm,),
            in_specs=[
                pl.BlockSpec((tm, k), lambda i: (i, 0)),
                pl.BlockSpec((1, k), lambda i: (0, 0)),
                pl.BlockSpec((1, k), lambda i: (0, 0)),
                pl.BlockSpec((k, n), lambda i: (0, 0)),
                pl.BlockSpec((1, n), lambda i: (0, 0)),
                pl.BlockSpec((1, n), lambda i: (0, 0)),
            ],
            out_specs=pl.BlockSpec((tm, n), lambda i: (i, 0)),
        ),
        compiler_params=pltpu.CompilerParams(dimension_semantics=("parallel",)),
    )(x2d, _vec2(s_in, k), _vec2(b_in, k), w_bf16, _vec2(s_out, n), _vec2(b_out, n))


def conv1x1_bn_pre(x2d, s_in, b_in, w_bf16):
    """relu(bn_in(x)) @ w -> f32 [M, N]   (shortcut branch)."""
    m, k = x2d.shape
    n = w_bf16.shape[1]
    tm = _pick_row_tile(m, 4 * k + 4 * n)
    return pl.pallas_call(
        _conv1x1_pre_kernel,
        out_shape=jax.ShapeDtypeStruct((m, n), jnp.float32),
        grid_spec=pltpu.PrefetchScalarGridSpec(
            num_scalar_prefetch=0,
            grid=(m // tm,),
            in_specs=[
                pl.BlockSpec((tm, k), lambda i: (i, 0)),
                pl.BlockSpec((1, k), lambda i: (0, 0)),
                pl.BlockSpec((1, k), lambda i: (0, 0)),
                pl.BlockSpec((k, n), lambda i: (0, 0)),
            ],
            out_specs=pl.BlockSpec((tm, n), lambda i: (i, 0)),
        ),
        compiler_params=pltpu.CompilerParams(dimension_semantics=("parallel",)),
    )(x2d, _vec2(s_in, k), _vec2(b_in, k), w_bf16)


def conv1x1_add(x2d_bf16, w_bf16, res_f32):
    """x @ w + residual -> f32 [M, N]."""
    m, k = x2d_bf16.shape
    n = w_bf16.shape[1]
    tm = _pick_row_tile(m, 2 * k + 8 * n)
    return pl.pallas_call(
        _conv1x1_add_kernel,
        out_shape=jax.ShapeDtypeStruct((m, n), jnp.float32),
        grid_spec=pltpu.PrefetchScalarGridSpec(
            num_scalar_prefetch=0,
            grid=(m // tm,),
            in_specs=[
                pl.BlockSpec((tm, k), lambda i: (i, 0)),
                pl.BlockSpec((k, n), lambda i: (0, 0)),
                pl.BlockSpec((tm, n), lambda i: (i, 0)),
            ],
            out_specs=pl.BlockSpec((tm, n), lambda i: (i, 0)),
        ),
        compiler_params=pltpu.CompilerParams(dimension_semantics=("parallel",)),
    )(x2d_bf16, w_bf16, res_f32)


def conv3x3_bn_relu(pre2_padded, w_taps_bf16, s_out, b_out, stride, ho, wo):
    """3x3 conv via in-kernel 9-tap accumulation, then relu(bn3) -> bf16 [N*Ho*Wo, Cout]."""
    n, hp, wp, c = pre2_padded.shape
    cout = w_taps_bf16.shape[2]
    kernel = functools.partial(_conv3x3_fused_kernel, stride=stride, ho=ho, wo=wo)
    return pl.pallas_call(
        kernel,
        out_shape=jax.ShapeDtypeStruct((n * ho * wo, cout), jnp.bfloat16),
        grid_spec=pltpu.PrefetchScalarGridSpec(
            num_scalar_prefetch=0,
            grid=(n,),
            in_specs=[
                pl.BlockSpec((1, hp, wp, c), lambda i: (i, 0, 0, 0)),
                pl.BlockSpec((9, c, cout), lambda i: (0, 0, 0)),
                pl.BlockSpec((1, cout), lambda i: (0, 0)),
                pl.BlockSpec((1, cout), lambda i: (0, 0)),
            ],
            out_specs=pl.BlockSpec((ho * wo, cout), lambda i: (i, 0)),
        ),
        compiler_params=pltpu.CompilerParams(dimension_semantics=("parallel",)),
    )(pre2_padded, w_taps_bf16, _vec2(s_out, cout), _vec2(b_out, cout))


# ----------------------------------------------------------------------------
# Glue: BN folding, weight reshapes, forward pass
# ----------------------------------------------------------------------------
def _fold_bn(gamma, beta, mean, var):
    scale = gamma / jnp.sqrt(var + _BN_EPS)
    shift = beta - mean * scale
    return scale, shift


def _w_1x1_to_mat(w_oi11):
    o, i = w_oi11.shape[0], w_oi11.shape[1]
    return jnp.transpose(w_oi11.reshape(o, i), (1, 0))          # [in, out]


def _w_3x3_to_taps(w_oikk):
    # [out, in, 3, 3] -> [9, in, out], tap index = kh*3 + kw
    return jnp.transpose(w_oikk, (2, 3, 1, 0)).reshape(9, w_oikk.shape[1],
                                                       w_oikk.shape[0])


def preact_bottleneck_forward(x_nchw, params, stride, has_shortcut):
    """Forward pass of PreActBottleneck_Ron. Input/output NCHW float32."""
    n, cin, h, w = x_nchw.shape
    x_nhwc = jnp.transpose(x_nchw, (0, 2, 3, 1))                # NCHW -> NHWC
    x2d = x_nhwc.reshape(n * h * w, cin)

    s1, b1 = _fold_bn(*params["bn1"])
    s2, b2 = _fold_bn(*params["bn2"])
    s3, b3 = _fold_bn(*params["bn3"])

    w1 = _w_1x1_to_mat(params["w1"]).astype(jnp.bfloat16)
    w2 = _w_3x3_to_taps(params["w2"]).astype(jnp.bfloat16)
    w3 = _w_1x1_to_mat(params["w3"]).astype(jnp.bfloat16)
    planes = w1.shape[1]
    cout = w3.shape[1]

    # kernel 1: pre2 = relu(bn2(conv1(relu(bn1(x)))))  (bf16, no pre1/h1 in HBM)
    pre2 = conv1x1_bn_relu(x2d, s1, b1, w1, s2, b2)             # [N*H*W, planes]

    ho = (h + 2 - 3) // stride + 1
    wo = (w + 2 - 3) // stride + 1
    pre2_p = jnp.pad(pre2.reshape(n, h, w, planes),
                     ((0, 0), (1, 1), (1, 1), (0, 0)))          # zero pad is exact
                                                                # (pre2 is post-ReLU)

    # kernel 2: pre3 = relu(bn3(conv2(pre2)))  (9-tap in-kernel accumulation)
    pre3 = conv3x3_bn_relu(pre2_p, w2, s3, b3, stride, ho, wo)  # [N*Ho*Wo, planes]

    # shortcut
    if has_shortcut:
        w_sc = _w_1x1_to_mat(params["w_sc"]).astype(jnp.bfloat16)
        x_s = x_nhwc[:, ::stride, ::stride, :].reshape(n * ho * wo, cin)
        shortcut = conv1x1_bn_pre(x_s, s1, b1, w_sc)            # recomputes bn1+relu
    else:
        shortcut = x2d          # PyTorch semantics: only valid for stride==1, cin==cout

    # kernel 4: out = conv3(pre3) + shortcut
    out2d = conv1x1_add(pre3, w3, shortcut)                     # [N*Ho*Wo, 4*planes]
    out_nhwc = out2d.reshape(n, ho, wo, cout)
    return jnp.transpose(out_nhwc, (0, 3, 1, 2))                # NHWC -> NCHW


# ----------------------------------------------------------------------------
# Pure-JAX f32 reference (correctness check only)
# ----------------------------------------------------------------------------
def _ref_forward(x, p, stride, has_shortcut):
    def bn(x, g, b, m, v):
        g, b, m, v = (t[None, :, None, None] for t in (g, b, m, v))
        return (x - m) / jnp.sqrt(v + _BN_EPS) * g + b

    def conv(x, w, s=1, pad=0):
        return jax.lax.conv_general_dilated(
            x, w, (s, s), [(pad, pad), (pad, pad)],
            dimension_numbers=("NCHW", "OIHW", "NCHW"))

    out = jax.nn.relu(bn(x, *p["bn1"]))
    sc = conv(out, p["w_sc"], stride) if has_shortcut else x
    out = conv(out, p["w1"])
    out = conv(jax.nn.relu(bn(out, *p["bn2"])), p["w2"], stride, 1)
    out = conv(jax.nn.relu(bn(out, *p["bn3"])), p["w3"])
    return out + sc


# ----------------------------------------------------------------------------
# Deterministic parameter init + demo
# ----------------------------------------------------------------------------
def make_params(key, in_planes, planes):
    expansion = 4
    ks = jax.random.split(key, 16)

    def bn_params(k, c):
        k1, k2, k3, k4 = jax.random.split(k, 4)
        gamma = 1.0 + 0.1 * jax.random.normal(k1, (c,), jnp.float32)
        beta = 0.1 * jax.random.normal(k2, (c,), jnp.float32)
        mean = 0.1 * jax.random.normal(k3, (c,), jnp.float32)
        var = jnp.abs(jax.random.normal(k4, (c,), jnp.float32)) + 0.5
        return (gamma, beta, mean, var)

    return {
        "bn1": bn_params(ks[0], in_planes),
        "w1": 0.1 * jax.random.normal(ks[1], (planes, in_planes, 1, 1), jnp.float32),
        "bn2": bn_params(ks[2], planes),
        "w2": 0.1 * jax.random.normal(ks[3], (planes, planes, 3, 3), jnp.float32),
        "bn3": bn_params(ks[4], planes),
        "w3": 0.1 * jax.random.normal(ks[5], (expansion * planes, planes, 1, 1), jnp.float32),
        "w_sc": 0.1 * jax.random.normal(ks[6], (expansion * planes, in_planes, 1, 1), jnp.float32),
    }


if __name__ == "__main__":
    key = jax.random.PRNGKey(0)
    k_x, k_p = jax.random.split(key)

    # Small shapes: batch=2, in_planes=16, planes=8 (-> 32 out channels), 16x16 spatial.
    N, in_planes, planes, H, W = 2, 16, 8, 16, 16
    stride = 1
    has_shortcut = (stride != 1) or (in_planes != 4 * planes)   # True here

    x = jax.random.normal(k_x, (N, in_planes, H, W), jnp.float32)
    params = make_params(k_p, in_planes, planes)

    fwd = jax.jit(functools.partial(preact_bottleneck_forward,
                                    stride=stride, has_shortcut=has_shortcut))
    out = fwd(x, params)
    out = jax.block_until_ready(out)

    ref = _ref_forward(x, params, stride, has_shortcut)
    assert out.shape == ref.shape == (N, 4 * planes, H // stride, W // stride)
    # bf16 MXU operands -> looser tolerance than the pure-f32 reference.
    assert jnp.allclose(out, ref, atol=5e-2, rtol=5e-2), "mismatch vs JAX reference"

    print("KERNEL_OK")
</pallas_src>

<mosaic_0001>
module attributes {stable_mosaic.version = 11 : i64} {
  func.func @_conv1x1_fused_kernel(%arg0: i32, %arg1: memref<512x16xf32, #tpu.memory_space<vmem>>, %arg2: memref<1x16xf32, #tpu.memory_space<vmem>>, %arg3: memref<1x16xf32, #tpu.memory_space<vmem>>, %arg4: memref<16x8xbf16, #tpu.memory_space<vmem>>, %arg5: memref<1x8xf32, #tpu.memory_space<vmem>>, %arg6: memref<1x8xf32, #tpu.memory_space<vmem>>, %arg7: memref<512x8xbf16, #tpu.memory_space<vmem>>) attributes {dimension_semantics = [#tpu.dimension_semantics<parallel>], iteration_bounds = array<i64: 1>, scalar_prefetch = 0 : i64, scratch_operands = 0 : i64, tpu.core_type = #tpu.core_type<tc>, window_params = [{transform_indices = @transform_0, window_bounds = array<i64: 512, 16>}, {pipeline_mode = #tpu.pipeline_mode<synchronous>, transform_indices = @transform_1, window_bounds = array<i64: 1, 16>}, {pipeline_mode = #tpu.pipeline_mode<synchronous>, transform_indices = @transform_2, window_bounds = array<i64: 1, 16>}, {pipeline_mode = #tpu.pipeline_mode<synchronous>, transform_indices = @transform_3, window_bounds = array<i64: 16, 8>}, {pipeline_mode = #tpu.pipeline_mode<synchronous>, transform_indices = @transform_4, window_bounds = array<i64: 1, 8>}, {pipeline_mode = #tpu.pipeline_mode<synchronous>, transform_indices = @transform_5, window_bounds = array<i64: 1, 8>}, {transform_indices = @transform_6, window_bounds = array<i64: 512, 8>}]} {
    %c0 = arith.constant 0 : index
    %c0_0 = arith.constant 0 : index
    %0 = vector.load %arg1[%c0, %c0_0] : memref<512x16xf32, #tpu.memory_space<vmem>>, vector<512x16xf32>
    %c0_1 = arith.constant 0 : index
    %c0_2 = arith.constant 0 : index
    %1 = vector.load %arg2[%c0_1, %c0_2] : memref<1x16xf32, #tpu.memory_space<vmem>>, vector<1x16xf32>
    %2 = vector.broadcast %1 : vector<1x16xf32> to vector<512x16xf32>
    %3 = arith.mulf %0, %2 : vector<512x16xf32>
    %c0_3 = arith.constant 0 : index
    %c0_4 = arith.constant 0 : index
    %4 = vector.load %arg3[%c0_3, %c0_4] : memref<1x16xf32, #tpu.memory_space<vmem>>, vector<1x16xf32>
    %5 = vector.broadcast %4 : vector<1x16xf32> to vector<512x16xf32>
    %6 = arith.addf %3, %5 : vector<512x16xf32>
    %cst = arith.constant 0.000000e+00 : f32
    %7 = vector.broadcast %cst : f32 to vector<512x16xf32>
    %8 = arith.maximumf %6, %7 : vector<512x16xf32>
    %9 = arith.truncf %8 : vector<512x16xf32> to vector<512x16xbf16>
    %c0_5 = arith.constant 0 : index
    %c0_6 = arith.constant 0 : index
    %10 = vector.load %arg4[%c0_5, %c0_6] : memref<16x8xbf16, #tpu.memory_space<vmem>>, vector<16x8xbf16>
    %cst_7 = arith.constant dense<0.000000e+00> : vector<512x8xf32>
    %11 = tpu.matmul %9, %10, %cst_7 {dimension_numbers = #tpu.dot_dimension_numbers<[1], [0], [0], [1], [0, 0, 1, 1], [], []>} : vector<512x16xbf16>, vector<16x8xbf16>, vector<512x8xf32> -> vector<512x8xf32>
    %c0_8 = arith.constant 0 : index
    %c0_9 = arith.constant 0 : index
    %12 = vector.load %arg5[%c0_8, %c0_9] : memref<1x8xf32, #tpu.memory_space<vmem>>, vector<1x8xf32>
    %13 = vector.broadcast %12 : vector<1x8xf32> to vector<512x8xf32>
    %14 = arith.mulf %11, %13 : vector<512x8xf32>
    %c0_10 = arith.constant 0 : index
    %c0_11 = arith.constant 0 : index
    %15 = vector.load %arg6[%c0_10, %c0_11] : memref<1x8xf32, #tpu.memory_space<vmem>>, vector<1x8xf32>
    %16 = vector.broadcast %15 : vector<1x8xf32> to vector<512x8xf32>
    %17 = arith.addf %14, %16 : vector<512x8xf32>
    %cst_12 = arith.constant 0.000000e+00 : f32
    %18 = vector.broadcast %cst_12 : f32 to vector<512x8xf32>
    %19 = arith.maximumf %17, %18 : vector<512x8xf32>
    %20 = arith.truncf %19 : vector<512x8xf32> to vector<512x8xbf16>
    %c0_13 = arith.constant 0 : index
    %c0_14 = arith.constant 0 : index
    %21 = vector.load %arg7[%c0_13, %c0_14] : memref<512x8xbf16, #tpu.memory_space<vmem>>, vector<512x8xbf16>
    tpu.vector_store %arg7[%c0_13, %c0_14], %20 {strides = array<i32>} : memref<512x8xbf16, #tpu.memory_space<vmem>>, vector<512x8xbf16>,
    return
  }
  func.func @transform_0(%arg0: i32) -> (i32, i32) {
    %c0_i32 = arith.constant 0 : i32
    %c0_i32_0 = arith.constant 0 : i32
    return %arg0, %c0_i32 : i32, i32
  }
  func.func @transform_1(%arg0: i32) -> (i32, i32) {
    %c0_i32 = arith.constant 0 : i32
    %c0_i32_0 = arith.constant 0 : i32
    %c0_i32_1 = arith.constant 0 : i32
    return %c0_i32, %c0_i32_0 : i32, i32
  }
  func.func @transform_2(%arg0: i32) -> (i32, i32) {
    %c0_i32 = arith.constant 0 : i32
    %c0_i32_0 = arith.constant 0 : i32
    %c0_i32_1 = arith.constant 0 : i32
    return %c0_i32, %c0_i32_0 : i32, i32
  }
  func.func @transform_3(%arg0: i32) -> (i32, i32) {
    %c0_i32 = arith.constant 0 : i32
    %c0_i32_0 = arith.constant 0 : i32
    %c0_i32_1 = arith.constant 0 : i32
    return %c0_i32, %c0_i32_0 : i32, i32
  }
  func.func @transform_4(%arg0: i32) -> (i32, i32) {
    %c0_i32 = arith.constant 0 : i32
    %c0_i32_0 = arith.constant 0 : i32
    %c0_i32_1 = arith.constant 0 : i32
    return %c0_i32, %c0_i32_0 : i32, i32
  }
  func.func @transform_5(%arg0: i32) -> (i32, i32) {
    %c0_i32 = arith.constant 0 : i32
    %c0_i32_0 = arith.constant 0 : i32
    %c0_i32_1 = arith.constant 0 : i32
    return %c0_i32, %c0_i32_0 : i32, i32
  }
  func.func @transform_6(%arg0: i32) -> (i32, i32) {
    %c0_i32 = arith.constant 0 : i32
    %c0_i32_0 = arith.constant 0 : i32
    return %arg0, %c0_i32 : i32, i32
  }
}

module attributes {stable_mosaic.version = 11 : i64} {
  func.func @_conv3x3_fused_kernel(%arg0: i32, %arg1: memref<1x18x18x8xbf16, #tpu.memory_space<vmem>>, %arg2: memref<9x8x8xbf16, #tpu.memory_space<vmem>>, %arg3: memref<1x8xf32, #tpu.memory_space<vmem>>, %arg4: memref<1x8xf32, #tpu.memory_space<vmem>>, %arg5: memref<256x8xbf16, #tpu.memory_space<vmem>>) attributes {dimension_semantics = [#tpu.dimension_semantics<parallel>], iteration_bounds = array<i64: 2>, scalar_prefetch = 0 : i64, scratch_operands = 0 : i64, tpu.core_type = #tpu.core_type<tc>, window_params = [{transform_indices = @transform_0, window_bounds = array<i64: 1, 18, 18, 8>}, {pipeline_mode = #tpu.pipeline_mode<synchronous>, transform_indices = @transform_1, window_bounds = array<i64: 9, 8, 8>}, {pipeline_mode = #tpu.pipeline_mode<synchronous>, transform_indices = @transform_2, window_bounds = array<i64: 1, 8>}, {pipeline_mode = #tpu.pipeline_mode<synchronous>, transform_indices = @transform_3, window_bounds = array<i64: 1, 8>}, {transform_indices = @transform_4, window_bounds = array<i64: 256, 8>}]} {
    %c0 = arith.constant 0 : index
    %c0_0 = arith.constant 0 : index
    %c0_1 = arith.constant 0 : index
    %c0_2 = arith.constant 0 : index
    %0 = vector.load %arg1[%c0, %c0_0, %c0_1, %c0_2] : memref<1x18x18x8xbf16, #tpu.memory_space<vmem>>, vector<1x18x18x8xbf16>
    %1 = vector.shape_cast %0 : vector<1x18x18x8xbf16> to vector<18x18x8xbf16>
    %cst = arith.constant 0.000000e+00 : f32
    %2 = vector.broadcast %cst : f32 to vector<256x8xf32>
    %3 = vector.extract_strided_slice %1 {offsets = [0, 0, 0], sizes = [16, 16, 8], strides = [1, 1, 1]} : vector<18x18x8xbf16> to vector<16x16x8xbf16>
    %4 = vector.shape_cast %3 : vector<16x16x8xbf16> to vector<256x8xbf16>
    %c0_3 = arith.constant 0 : index
    %c0_4 = arith.constant 0 : index
    %c0_5 = arith.constant 0 : index
    %5 = vector.load %arg2[%c0_3, %c0_4, %c0_5] : memref<9x8x8xbf16, #tpu.memory_space<vmem>>, vector<1x8x8xbf16>
    %6 = vector.shape_cast %5 : vector<1x8x8xbf16> to vector<8x8xbf16>
    %cst_6 = arith.constant dense<0.000000e+00> : vector<256x8xf32>
    %7 = tpu.matmul %4, %6, %cst_6 {dimension_numbers = #tpu.dot_dimension_numbers<[1], [0], [0], [1], [0, 0, 1, 1], [], []>} : vector<256x8xbf16>, vector<8x8xbf16>, vector<256x8xf32> -> vector<256x8xf32>
    %8 = arith.addf %2, %7 : vector<256x8xf32>
    %9 = vector.extract_strided_slice %1 {offsets = [0, 1, 0], sizes = [16, 16, 8], strides = [1, 1, 1]} : vector<18x18x8xbf16> to vector<16x16x8xbf16>
    %10 = vector.shape_cast %9 : vector<16x16x8xbf16> to vector<256x8xbf16>
    %c1 = arith.constant 1 : index
    %c0_7 = arith.constant 0 : index
    %c0_8 = arith.constant 0 : index
    %11 = vector.load %arg2[%c1, %c0_7, %c0_8] : memref<9x8x8xbf16, #tpu.memory_space<vmem>>, vector<1x8x8xbf16>
    %12 = vector.shape_cast %11 : vector<1x8x8xbf16> to vector<8x8xbf16>
    %cst_9 = arith.constant dense<0.000000e+00> : vector<256x8xf32>
    %13 = tpu.matmul %10, %12, %cst_9 {dimension_numbers = #tpu.dot_dimension_numbers<[1], [0], [0], [1], [0, 0, 1, 1], [], []>} : vector<256x8xbf16>, vector<8x8xbf16>, vector<256x8xf32> -> vector<256x8xf32>
    %14 = arith.addf %8, %13 : vector<256x8xf32>
    %15 = vector.extract_strided_slice %1 {offsets = [0, 2, 0], sizes = [16, 16, 8], strides = [1, 1, 1]} : vector<18x18x8xbf16> to vector<16x16x8xbf16>
    %16 = vector.shape_cast %15 : vector<16x16x8xbf16> to vector<256x8xbf16>
    %c2 = arith.constant 2 : index
    %c0_10 = arith.constant 0 : index
    %c0_11 = arith.constant 0 : index
    %17 = vector.load %arg2[%c2, %c0_10, %c0_11] : memref<9x8x8xbf16, #tpu.memory_space<vmem>>, vector<1x8x8xbf16>
    %18 = vector.shape_cast %17 : vector<1x8x8xbf16> to vector<8x8xbf16>
    %cst_12 = arith.constant dense<0.000000e+00> : vector<256x8xf32>
    %19 = tpu.matmul %16, %18, %cst_12 {dimension_numbers = #tpu.dot_dimension_numbers<[1], [0], [0], [1], [0, 0, 1, 1], [], []>} : vector<256x8xbf16>, vector<8x8xbf16>, vector<256x8xf32> -> vector<256x8xf32>
    %20 = arith.addf %14, %19 : vector<256x8xf32>
    %21 = vector.extract_strided_slice %1 {offsets = [1, 0, 0], sizes = [16, 16, 8], strides = [1, 1, 1]} : vector<18x18x8xbf16> to vector<16x16x8xbf16>
    %22 = vector.shape_cast %21 : vector<16x16x8xbf16> to vector<256x8xbf16>
    %c3 = arith.constant 3 : index
    %c0_13 = arith.constant 0 : index
    %c0_14 = arith.constant 0 : index
    %23 = vector.load %arg2[%c3, %c0_13, %c0_14] : memref<9x8x8xbf16, #tpu.memory_space<vmem>>, vector<1x8x8xbf16>
    %24 = vector.shape_cast %23 : vector<1x8x8xbf16> to vector<8x8xbf16>
    %cst_15 = arith.constant dense<0.000000e+00> : vector<256x8xf32>
    %25 = tpu.matmul %22, %24, %cst_15 {dimension_numbers = #tpu.dot_dimension_numbers<[1], [0], [0], [1], [0, 0, 1, 1], [], []>} : vector<256x8xbf16>, vector<8x8xbf16>, vector<256x8xf32> -> vector<256x8xf32>
    %26 = arith.addf %20, %25 : vector<256x8xf32>
    %27 = vector.extract_strided_slice %1 {offsets = [1, 1, 0], sizes = [16, 16, 8], strides = [1, 1, 1]} : vector<18x18x8xbf16> to vector<16x16x8xbf16>
    %28 = vector.shape_cast %27 : vector<16x16x8xbf16> to vector<256x8xbf16>
    %c4 = arith.constant 4 : index
    %c0_16 = arith.constant 0 : index
    %c0_17 = arith.constant 0 : index
    %29 = vector.load %arg2[%c4, %c0_16, %c0_17] : memref<9x8x8xbf16, #tpu.memory_space<vmem>>, vector<1x8x8xbf16>
    %30 = vector.shape_cast %29 : vector<1x8x8xbf16> to vector<8x8xbf16>
    %cst_18 = arith.constant dense<0.000000e+00> : vector<256x8xf32>
    %31 = tpu.matmul %28, %30, %cst_18 {dimension_numbers = #tpu.dot_dimension_numbers<[1], [0], [0], [1], [0, 0, 1, 1], [], []>} : vector<256x8xbf16>, vector<8x8xbf16>, vector<256x8xf32> -> vector<256x8xf32>
    %32 = arith.addf %26, %31 : vector<256x8xf32>
    %33 = vector.extract_strided_slice %1 {offsets = [1, 2, 0], sizes = [16, 16, 8], strides = [1, 1, 1]} : vector<18x18x8xbf16> to vector<16x16x8xbf16>
    %34 = vector.shape_cast %33 : vector<16x16x8xbf16> to vector<256x8xbf16>
    %c5 = arith.constant 5 : index
    %c0_19 = arith.constant 0 : index
    %c0_20 = arith.constant 0 : index
    %35 = vector.load %arg2[%c5, %c0_19, %c0_20] : memref<9x8x8xbf16, #tpu.memory_space<vmem>>, vector<1x8x8xbf16>
    %36 = vector.shape_cast %35 : vector<1x8x8xbf16> to vector<8x8xbf16>
    %cst_21 = arith.constant dense<0.000000e+00> : vector<256x8xf32>
    %37 = tpu.matmul %34, %36, %cst_21 {dimension_numbers = #tpu.dot_dimension_numbers<[1], [0], [0], [1], [0, 0, 1, 1], [], []>} : vector<256x8xbf16>, vector<8x8xbf16>, vector<256x8xf32> -> vector<256x8xf32>
    %38 = arith.addf %32, %37 : vector<256x8xf32>
    %39 = vector.extract_strided_slice %1 {offsets = [2, 0, 0], sizes = [16, 16, 8], strides = [1, 1, 1]} : vector<18x18x8xbf16> to vector<16x16x8xbf16>
    %40 = vector.shape_cast %39 : vector<16x16x8xbf16> to vector<256x8xbf16>
    %c6 = arith.constant 6 : index
    %c0_22 = arith.constant 0 : index
    %c0_23 = arith.constant 0 : index
    %41 = vector.load %arg2[%c6, %c0_22, %c0_23] : memref<9x8x8xbf16, #tpu.memory_space<vmem>>, vector<1x8x8xbf16>
    %42 = vector.shape_cast %41 : vector<1x8x8xbf16> to vector<8x8xbf16>
    %cst_24 = arith.constant dense<0.000000e+00> : vector<256x8xf32>
    %43 = tpu.matmul %40, %42, %cst_24 {dimension_numbers = #tpu.dot_dimension_numbers<[1], [0], [0], [1], [0, 0, 1, 1], [], []>} : vector<256x8xbf16>, vector<8x8xbf16>, vector<256x8xf32> -> vector<256x8xf32>
    %44 = arith.addf %38, %43 : vector<256x8xf32>
    %45 = vector.extract_strided_slice %1 {offsets = [2, 1, 0], sizes = [16, 16, 8], strides = [1, 1, 1]} : vector<18x18x8xbf16> to vector<16x16x8xbf16>
    %46 = vector.shape_cast %45 : vector<16x16x8xbf16> to vector<256x8xbf16>
    %c7 = arith.constant 7 : index
    %c0_25 = arith.constant 0 : index
    %c0_26 = arith.constant 0 : index
    %47 = vector.load %arg2[%c7, %c0_25, %c0_26] : memref<9x8x8xbf16, #tpu.memory_space<vmem>>, vector<1x8x8xbf16>
    %48 = vector.shape_cast %47 : vector<1x8x8xbf16> to vector<8x8xbf16>
    %cst_27 = arith.constant dense<0.000000e+00> : vector<256x8xf32>
    %49 = tpu.matmul %46, %48, %cst_27 {dimension_numbers = #tpu.dot_dimension_numbers<[1], [0], [0], [1], [0, 0, 1, 1], [], []>} : vector<256x8xbf16>, vector<8x8xbf16>, vector<256x8xf32> -> vector<256x8xf32>
    %50 = arith.addf %44, %49 : vector<256x8xf32>
    %51 = vector.extract_strided_slice %1 {offsets = [2, 2, 0], sizes = [16, 16, 8], strides = [1, 1, 1]} : vector<18x18x8xbf16> to vector<16x16x8xbf16>
    %52 = vector.shape_cast %51 : vector<16x16x8xbf16> to vector<256x8xbf16>
    %c8 = arith.constant 8 : index
    %c0_28 = arith.constant 0 : index
    %c0_29 = arith.constant 0 : index
    %53 = vector.load %arg2[%c8, %c0_28, %c0_29] : memref<9x8x8xbf16, #tpu.memory_space<vmem>>, vector<1x8x8xbf16>
    %54 = vector.shape_cast %53 : vector<1x8x8xbf16> to vector<8x8xbf16>
    %cst_30 = arith.constant dense<0.000000e+00> : vector<256x8xf32>
    %55 = tpu.matmul %52, %54, %cst_30 {dimension_numbers = #tpu.dot_dimension_numbers<[1], [0], [0], [1], [0, 0, 1, 1], [], []>} : vector<256x8xbf16>, vector<8x8xbf16>, vector<256x8xf32> -> vector<256x8xf32>
    %56 = arith.addf %50, %55 : vector<256x8xf32>
    %c0_31 = arith.constant 0 : index
    %c0_32 = arith.constant 0 : index
    %57 = vector.load %arg3[%c0_31, %c0_32] : memref<1x8xf32, #tpu.memory_space<vmem>>, vector<1x8xf32>
    %58 = vector.broadcast %57 : vector<1x8xf32> to vector<256x8xf32>
    %59 = arith.mulf %56, %58 : vector<256x8xf32>
    %c0_33 = arith.constant 0 : index
    %c0_34 = arith.constant 0 : index
    %60 = vector.load %arg4[%c0_33, %c0_34] : memref<1x8xf32, #tpu.memory_space<vmem>>, vector<1x8xf32>
    %61 = vector.broadcast %60 : vector<1x8xf32> to vector<256x8xf32>
    %62 = arith.addf %59, %61 : vector<256x8xf32>
    %cst_35 = arith.constant 0.000000e+00 : f32
    %63 = vector.broadcast %cst_35 : f32 to vector<256x8xf32>
    %64 = arith.maximumf %62, %63 : vector<256x8xf32>
    %65 = arith.truncf %64 : vector<256x8xf32> to vector<256x8xbf16>
    %c0_36 = arith.constant 0 : index
    %c0_37 = arith.constant 0 : index
    %66 = vector.load %arg5[%c0_36, %c0_37] : memref<256x8xbf16, #tpu.memory_space<vmem>>, vector<256x8xbf16>
    tpu.vector_store %arg5[%c0_36, %c0_37], %65 {strides = array<i32>} : memref<256x8xbf16, #tpu.memory_space<vmem>>, vector<256x8xbf16>,
    return
  }
  func.func @transform_0(%arg0: i32) -> (i32, i32, i32, i32) {
    %c0_i32 = arith.constant 0 : i32
    %c0_i32_0 = arith.constant 0 : i32
    %c0_i32_1 = arith.constant 0 : i32
    %c0_i32_2 = arith.constant 0 : i32
    return %arg0, %c0_i32, %c0_i32_0, %c0_i32_1 : i32, i32, i32, i32
  }
  func.func @transform_1(%arg0: i32) -> (i32, i32, i32) {
    %c0_i32 = arith.constant 0 : i32
    %c0_i32_0 = arith.constant 0 : i32
    %c0_i32_1 = arith.constant 0 : i32
    %c0_i32_2 = arith.constant 0 : i32
    return %c0_i32, %c0_i32_0, %c0_i32_1 : i32, i32, i32
  }
  func.func @transform_2(%arg0: i32) -> (i32, i32) {
    %c0_i32 = arith.constant 0 : i32
    %c0_i32_0 = arith.constant 0 : i32
    %c0_i32_1 = arith.constant 0 : i32
    return %c0_i32, %c0_i32_0 : i32, i32
  }
  func.func @transform_3(%arg0: i32) -> (i32, i32) {
    %c0_i32 = arith.constant 0 : i32
    %c0_i32_0 = arith.constant 0 : i32
    %c0_i32_1 = arith.constant 0 : i32
    return %c0_i32, %c0_i32_0 : i32, i32
  }
  func.func @transform_4(%arg0: i32) -> (i32, i32) {
    %c0_i32 = arith.constant 0 : i32
    %c0_i32_0 = arith.constant 0 : i32
    return %arg0, %c0_i32 : i32, i32
  }
}

module attributes {stable_mosaic.version = 11 : i64} {
  func.func @_conv1x1_pre_kernel(%arg0: i32, %arg1: memref<512x16xf32, #tpu.memory_space<vmem>>, %arg2: memref<1x16xf32, #tpu.memory_space<vmem>>, %arg3: memref<1x16xf32, #tpu.memory_space<vmem>>, %arg4: memref<16x32xbf16, #tpu.memory_space<vmem>>, %arg5: memref<512x32xf32, #tpu.memory_space<vmem>>) attributes {dimension_semantics = [#tpu.dimension_semantics<parallel>], iteration_bounds = array<i64: 1>, scalar_prefetch = 0 : i64, scratch_operands = 0 : i64, tpu.core_type = #tpu.core_type<tc>, window_params = [{transform_indices = @transform_0, window_bounds = array<i64: 512, 16>}, {pipeline_mode = #tpu.pipeline_mode<synchronous>, transform_indices = @transform_1, window_bounds = array<i64: 1, 16>}, {pipeline_mode = #tpu.pipeline_mode<synchronous>, transform_indices = @transform_2, window_bounds = array<i64: 1, 16>}, {pipeline_mode = #tpu.pipeline_mode<synchronous>, transform_indices = @transform_3, window_bounds = array<i64: 16, 32>}, {transform_indices = @transform_4, window_bounds = array<i64: 512, 32>}]} {
    %c0 = arith.constant 0 : index
    %c0_0 = arith.constant 0 : index
    %0 = vector.load %arg1[%c0, %c0_0] : memref<512x16xf32, #tpu.memory_space<vmem>>, vector<512x16xf32>
    %c0_1 = arith.constant 0 : index
    %c0_2 = arith.constant 0 : index
    %1 = vector.load %arg2[%c0_1, %c0_2] : memref<1x16xf32, #tpu.memory_space<vmem>>, vector<1x16xf32>
    %2 = vector.broadcast %1 : vector<1x16xf32> to vector<512x16xf32>
    %3 = arith.mulf %0, %2 : vector<512x16xf32>
    %c0_3 = arith.constant 0 : index
    %c0_4 = arith.constant 0 : index
    %4 = vector.load %arg3[%c0_3, %c0_4] : memref<1x16xf32, #tpu.memory_space<vmem>>, vector<1x16xf32>
    %5 = vector.broadcast %4 : vector<1x16xf32> to vector<512x16xf32>
    %6 = arith.addf %3, %5 : vector<512x16xf32>
    %cst = arith.constant 0.000000e+00 : f32
    %7 = vector.broadcast %cst : f32 to vector<512x16xf32>
    %8 = arith.maximumf %6, %7 : vector<512x16xf32>
    %9 = arith.truncf %8 : vector<512x16xf32> to vector<512x16xbf16>
    %c0_5 = arith.constant 0 : index
    %c0_6 = arith.constant 0 : index
    %10 = vector.load %arg4[%c0_5, %c0_6] : memref<16x32xbf16, #tpu.memory_space<vmem>>, vector<16x32xbf16>
    %cst_7 = arith.constant dense<0.000000e+00> : vector<512x32xf32>
    %11 = tpu.matmul %9, %10, %cst_7 {dimension_numbers = #tpu.dot_dimension_numbers<[1], [0], [0], [1], [0, 0, 1, 1], [], []>} : vector<512x16xbf16>, vector<16x32xbf16>, vector<512x32xf32> -> vector<512x32xf32>
    %c0_8 = arith.constant 0 : index
    %c0_9 = arith.constant 0 : index
    %12 = vector.load %arg5[%c0_8, %c0_9] : memref<512x32xf32, #tpu.memory_space<vmem>>, vector<512x32xf32>
    tpu.vector_store %arg5[%c0_8, %c0_9], %11 {strides = array<i32>} : memref<512x32xf32, #tpu.memory_space<vmem>>, vector<512x32xf32>,
    return
  }
  func.func @transform_0(%arg0: i32) -> (i32, i32) {
    %c0_i32 = arith.constant 0 : i32
    %c0_i32_0 = arith.constant 0 : i32
    return %arg0, %c0_i32 : i32, i32
  }
  func.func @transform_1(%arg0: i32) -> (i32, i32) {
    %c0_i32 = arith.constant 0 : i32
    %c0_i32_0 = arith.constant 0 : i32
    %c0_i32_1 = arith.constant 0 : i32
    return %c0_i32, %c0_i32_0 : i32, i32
  }
  func.func @transform_2(%arg0: i32) -> (i32, i32) {
    %c0_i32 = arith.constant 0 : i32
    %c0_i32_0 = arith.constant 0 : i32
    %c0_i32_1 = arith.constant 0 : i32
    return %c0_i32, %c0_i32_0 : i32, i32
  }
  func.func @transform_3(%arg0: i32) -> (i32, i32) {
    %c0_i32 = arith.constant 0 : i32
    %c0_i32_0 = arith.constant 0 : i32
    %c0_i32_1 = arith.constant 0 : i32
    return %c0_i32, %c0_i32_0 : i32, i32
  }
  func.func @transform_4(%arg0: i32) -> (i32, i32) {
    %c0_i32 = arith.constant 0 : i32
    %c0_i32_0 = arith.constant 0 : i32
    return %arg0, %c0_i32 : i32, i32
  }
}

module attributes {stable_mosaic.version = 11 : i64} {
  func.func @_conv1x1_add_kernel(%arg0: i32, %arg1: memref<512x8xbf16, #tpu.memory_space<vmem>>, %arg2: memref<8x32xbf16, #tpu.memory_space<vmem>>, %arg3: memref<512x32xf32, #tpu.memory_space<vmem>>, %arg4: memref<512x32xf32, #tpu.memory_space<vmem>>) attributes {dimension_semantics = [#tpu.dimension_semantics<parallel>], iteration_bounds = array<i64: 1>, scalar_prefetch = 0 : i64, scratch_operands = 0 : i64, tpu.core_type = #tpu.core_type<tc>, window_params = [{transform_indices = @transform_0, window_bounds = array<i64: 512, 8>}, {pipeline_mode = #tpu.pipeline_mode<synchronous>, transform_indices = @transform_1, window_bounds = array<i64: 8, 32>}, {transform_indices = @transform_2, window_bounds = array<i64: 512, 32>}, {transform_indices = @transform_3, window_bounds = array<i64: 512, 32>}]} {
    %c0 = arith.constant 0 : index
    %c0_0 = arith.constant 0 : index
    %0 = vector.load %arg1[%c0, %c0_0] : memref<512x8xbf16, #tpu.memory_space<vmem>>, vector<512x8xbf16>
    %c0_1 = arith.constant 0 : index
    %c0_2 = arith.constant 0 : index
    %1 = vector.load %arg2[%c0_1, %c0_2] : memref<8x32xbf16, #tpu.memory_space<vmem>>, vector<8x32xbf16>
    %cst = arith.constant dense<0.000000e+00> : vector<512x32xf32>
    %2 = tpu.matmul %0, %1, %cst {dimension_numbers = #tpu.dot_dimension_numbers<[1], [0], [0], [1], [0, 0, 1, 1], [], []>} : vector<512x8xbf16>, vector<8x32xbf16>, vector<512x32xf32> -> vector<512x32xf32>
    %c0_3 = arith.constant 0 : index
    %c0_4 = arith.constant 0 : index
    %3 = vector.load %arg3[%c0_3, %c0_4] : memref<512x32xf32, #tpu.memory_space<vmem>>, vector<512x32xf32>
    %4 = arith.addf %2, %3 : vector<512x32xf32>
    %c0_5 = arith.constant 0 : index
    %c0_6 = arith.constant 0 : index
    %5 = vector.load %arg4[%c0_5, %c0_6] : memref<512x32xf32, #tpu.memory_space<vmem>>, vector<512x32xf32>
    tpu.vector_store %arg4[%c0_5, %c0_6], %4 {strides = array<i32>} : memref<512x32xf32, #tpu.memory_space<vmem>>, vector<512x32xf32>,
    return
  }
  func.func @transform_0(%arg0: i32) -> (i32, i32) {
    %c0_i32 = arith.constant 0 : i32
    %c0_i32_0 = arith.constant 0 : i32
    return %arg0, %c0_i32 : i32, i32
  }
  func.func @transform_1(%arg0: i32) -> (i32, i32) {
    %c0_i32 = arith.constant 0 : i32
    %c0_i32_0 = arith.constant 0 : i32
    %c0_i32_1 = arith.constant 0 : i32
    return %c0_i32, %c0_i32_0 : i32, i32
  }
  func.func @transform_2(%arg0: i32) -> (i32, i32) {
    %c0_i32 = arith.constant 0 : i32
    %c0_i32_0 = arith.constant 0 : i32
    return %arg0, %c0_i32 : i32, i32
  }
  func.func @transform_3(%arg0: i32) -> (i32, i32) {
    %c0_i32 = arith.constant 0 : i32
    %c0_i32_0 = arith.constant 0 : i32
    return %arg0, %c0_i32 : i32, i32
  }
}

</mosaic_0001>

<bundles_post_ra>
// kernel: preact_bottleneck_forward.6
= control target key start
LH: loop header
LB: loop body
LE: loop exit
PB: predicated region body
PF: predicated region fallthrough
CT: control target
= control target key end

     0   :  { %vm328_vm0 = vcmask 130048   ;;  %vm714_vm1 = vcmask 261120   ;;  %s1566_s3 = inlined_call_operand.vmem [shape: bf16[16,32], index: 3, kind: input, shape index: {}]   ;;  %s1567_s0 = inlined_call_operand.vmem [shape: f32[512,16], index: 0, kind: input, shape index: {}]   ;;  %s1568_s1 = inlined_call_operand.vmem [shape: f32[1,16], index: 1, kind: input, shape index: {}]   ;;  %s1569_s2 = inlined_call_operand.vmem [shape: f32[1,16], index: 2, kind: input, shape index: {}]   ;;  %s1570_s4 = inlined_call_operand.vmem [shape: f32[512,32], index: 4, kind: output, shape index: {}]  }
   0x1   :  { %v919_v0 = vld [vmem:[%s1566_s3] sm:$0xff]   ;;  %v19_v2 = vld [vmem:[%s1567_s0 + $0x8] sm:$0xff]  ;;  %v20_v11 = vld [vmem:[%s1567_s0 + $0x10] sm:$0xff] }
   0x2   :  { %v18_v1 = vld [vmem:[%s1567_s0] sm:$0xff]  ;;  %851 = vmatprep.subr.bf16.mxu0 %v919_v0  ;;  %917 = vmatprep.subr.bf16.mxu1 %v919_v0  ;;  %v51_v8 = vld [vmem:[%s1567_s0 + $0x108] sm:$0xff]  ;;  %v21_v12 = vld [vmem:[%s1567_s0 + $0x18] sm:$0xff] }
   0x3   :  { %v957_v3 = vld [vmem:[%s1568_s1] ss:$0 sm:$0xff]  ;;  %852 = vmatpush3.bf16.msra.mxu0 %v919_v0  ;;  %918 = vmatpush3.bf16.msra.mxu1 %v919_v0  ;;  %v52_v13 = vld [vmem:[%s1567_s0 + $0x110] sm:$0xff]  ;;  %v53_v18 = vld [vmem:[%s1567_s0 + $0x118] sm:$0xff] }
   0x4   :  { %v89_v4 = vmul.f32 %v957_v3, %v18_v1  ;;  %v90_v5 = vmul.f32 %v957_v3, %v19_v2  ;;  %v964_v6 = vld [vmem:[%s1569_s2] ss:$0 sm:$0xff]  ;;  %v122_v10 = vmul.f32 %v957_v3, %v51_v8  ;;  %v91_v16 = vmul.f32 %v957_v3, %v20_v11  ;;  %v23_v28 = vld [vmem:[%s1567_s0 + $0x28] sm:$0xff]  ;;  %v24_v39 = vld [vmem:[%s1567_s0 + $0x30] sm:$0xff] }
   0x5   :  { %v50_v7 = vld [vmem:[%s1567_s0 + $0x100] sm:$0xff]  ;;  %v92_v17 = vmul.f32 %v957_v3, %v21_v12  ;;  %v123_v21 = vmul.f32 %v957_v3, %v52_v13  ;;  %v124_v22 = vmul.f32 %v957_v3, %v53_v18  ;;  %v55_v34 = vld [vmem:[%s1567_s0 + $0x128] sm:$0xff]  ;;  %v25_v40 = vld [vmem:[%s1567_s0 + $0x38] sm:$0xff]  ;;  %v94_v44 = vmul.f32 %v957_v3, %v23_v28 }
   0x6   :  { %v121_v9 = vmul.f32 %v957_v3, %v50_v7  ;;  %v160_v14 = vadd.f32 %v964_v6, %v89_v4  ;;  %v161_v15 = vadd.f32 %v964_v6, %v90_v5  ;;  %v193_v20 = vadd.f32 %v964_v6, %v122_v10  ;;  %v22_v23 = vld [vmem:[%s1567_s0 + $0x20] sm:$0xff]  ;;  %v56_v45 = vld [vmem:[%s1567_s0 + $0x130] sm:$0xff]  ;;  %v57_v50 = vld [vmem:[%s1567_s0 + $0x138] sm:$0xff] }
   0x7   :  { %v162_v26 = vadd.f32 %v964_v6, %v91_v16  ;;  %v163_v27 = vadd.f32 %v964_v6, %v92_v17  ;;  %v194_v31 = vadd.f32 %v964_v6, %v123_v21  ;;  %v195_v32 = vadd.f32 %v964_v6, %v124_v22  ;;  %v54_v33 = vld [vmem:[%s1567_s0 + $0x120] sm:$0xff]  ;;  %v27_v0 = vld [vmem:[%s1567_s0 + $0x48] sm:$0xff]  ;;  %v28_v13 = vld [vmem:[%s1567_s0 + $0x50] sm:$0xff] }
   0x8   :  { %v192_v19 = vadd.f32 %v964_v6, %v121_v9  ;;  %v224_v24 = vmax.f32 %v160_v14, 0.0  ;;  %v225_v25 = vmax.f32 %v161_v15, 0.0  ;;  %v257_v30 = vmax.f32 %v193_v20, 0.0  ;;  %v26_v55 = vld [vmem:[%s1567_s0 + $0x40] sm:$0xff]  ;;  %v59_v8 = vld [vmem:[%s1567_s0 + $0x148] sm:$0xff]  ;;  %v29_v14 = vld [vmem:[%s1567_s0 + $0x58] sm:$0xff] }
   0x9   :  { %v226_v36 = vmax.f32 %v162_v26, 0.0  ;;  %v227_v37 = vmax.f32 %v163_v27, 0.0  ;;  %v93_v38 = vmul.f32 %v957_v3, %v22_v23  ;;  %v258_v42 = vmax.f32 %v194_v31, 0.0  ;;  %v58_v7 = vld [vmem:[%s1567_s0 + $0x140] sm:$0xff] }
   0xa   :  { %v256_v29 = vmax.f32 %v192_v19, 0.0  ;;  %v288_v35 = vpack.c.bf16 %v225_v25, %v224_v24  ;;  %v259_v43 = vmax.f32 %v195_v32, 0.0  ;;  %v125_v48 = vmul.f32 %v957_v3, %v54_v33  ;;  %v60_v19 = vld [vmem:[%s1567_s0 + $0x150] sm:$0xff]  ;;  %v61_v24 = vld [vmem:[%s1567_s0 + $0x158] sm:$0xff] }
   0xb   :  { %v289_v46 = vpack.c.bf16 %v227_v37, %v226_v36  ;;  %v164_v47 = vadd.f32 %v964_v6, %v93_v38  ;;  %v126_v49 = vmul.f32 %v957_v3, %v55_v34  ;;  %v165_v52 = vadd.f32 %v964_v6, %v94_v44  ;;  %v31_v38 = vld [vmem:[%s1567_s0 + $0x68] sm:$0xff] }
   0xc   :  { %v304_v41 = vpack.c.bf16 %v257_v30, %v256_v29  ;;  %853 = vmatprep.mubr.msk.bf16.mxu0 %vm328_vm0, %v288_v35  ;;  %v305_v51 = vpack.c.bf16 %v259_v43, %v258_v42  ;;  %v95_v53 = vmul.f32 %v957_v3, %v24_v39  ;;  %v96_v54 = vmul.f32 %v957_v3, %v25_v40  ;;  %v30_v29 = vld [vmem:[%s1567_s0 + $0x60] sm:$0xff]  ;;  %v63_v44 = vld [vmem:[%s1567_s0 + $0x168] sm:$0xff] }
   0xd   :  { %854 = vmatmul.mubr.msk.bf16.vlgmr.msra.gmra.mxu0 %vm328_vm0, %v289_v46  ;;  %v228_v56 = vmax.f32 %v164_v47, 0.0  ;;  %v196_v57 = vadd.f32 %v964_v6, %v125_v48  ;;  %v197_v58 = vadd.f32 %v964_v6, %v126_v49  ;;  %v127_v59 = vmul.f32 %v957_v3, %v56_v45  ;;  %v62_v43 = vld [vmem:[%s1567_s0 + $0x160] sm:$0xff]  ;;  %v32_v49 = vld [vmem:[%s1567_s0 + $0x70] sm:$0xff] }
   0xe   :  { %885 = vmatprep.mubr.msk.bf16.mxu1 %vm328_vm0, %v304_v41  ;;  %v229_v60 = vmax.f32 %v165_v52, 0.0  ;;  %v166_v61 = vadd.f32 %v964_v6, %v95_v53  ;;  %v167_v62 = vadd.f32 %v964_v6, %v96_v54  ;;  %v128_v63 = vmul.f32 %v957_v3, %v57_v50  ;;  %v33_v50 = vld [vmem:[%s1567_s0 + $0x78] sm:$0xff] }
   0xf   :  { %886 = vmatmul.mubr.msk.bf16.vlgmr.msra.gmra.mxu1 %vm328_vm0, %v305_v51  ;;  %v260_v1 = vmax.f32 %v196_v57, 0.0  ;;  %v261_v2 = vmax.f32 %v197_v58, 0.0  ;;  %v198_v4 = vadd.f32 %v964_v6, %v127_v59  ;;  %v97_v5 = vmul.f32 %v957_v3, %v26_v55  ;;  %v64_v55 = vld [vmem:[%s1567_s0 + $0x170] sm:$0xff] }
  0x10   :  { %v290_v9 = vpack.c.bf16 %v229_v60, %v228_v56  ;;  %v230_v10 = vmax.f32 %v166_v61, 0.0  ;;  %v231_v11 = vmax.f32 %v167_v62, 0.0  ;;  %v199_v12 = vadd.f32 %v964_v6, %v128_v63  ;;  %v65_v60 = vld [vmem:[%s1567_s0 + $0x178] sm:$0xff] }
  0x11   :  { %v306_v15 = vpack.c.bf16 %v261_v2, %v260_v1  ;;  %v262_v16 = vmax.f32 %v198_v4, 0.0  ;;  %v98_v17 = vmul.f32 %v957_v3, %v27_v0  ;;  %v168_v18 = vadd.f32 %v964_v6, %v97_v5  ;;  %v34_v1 = vld [vmem:[%s1567_s0 + $0x80] sm:$0xff] }
  0x12   :  { %857 = vmatprep.mubr.msk.bf16.mxu0 %vm328_vm0, %v290_v9  ;;  %v291_v20 = vpack.c.bf16 %v231_v11, %v230_v10  ;;  %v263_v21 = vmax.f32 %v199_v12, 0.0  ;;  %v129_v22 = vmul.f32 %v957_v3, %v58_v7  ;;  %v130_v23 = vmul.f32 %v957_v3, %v59_v8  ;;  %v35_v12 = vld [vmem:[%s1567_s0 + $0x88] sm:$0xff] }
  0x13   :  { %889 = vmatprep.mubr.msk.bf16.mxu1 %vm328_vm0, %v306_v15  ;;  %v169_v25 = vadd.f32 %v964_v6, %v98_v17  ;;  %v232_v26 = vmax.f32 %v168_v18, 0.0  ;;  %v99_v27 = vmul.f32 %v957_v3, %v28_v13  ;;  %v100_v28 = vmul.f32 %v957_v3, %v29_v14  ;;  %v66_v17 = vld [vmem:[%s1567_s0 + $0x180] sm:$0xff]  ;;  %v67_v18 = vld [vmem:[%s1567_s0 + $0x188] sm:$0xff] }
  0x14   :  { %v307_v30 = vpack.c.bf16 %v263_v21, %v262_v16  ;;  %v200_v31 = vadd.f32 %v964_v6, %v129_v22  ;;  %v201_v32 = vadd.f32 %v964_v6, %v130_v23  ;;  %v131_v33 = vmul.f32 %v957_v3, %v60_v19  ;;  %v36_v23 = vld [vmem:[%s1567_s0 + $0x90] sm:$0xff] }
  0x15   :  { %858 = vmatmul.mubr.msk.bf16.gmra.mxu0 %vm328_vm0, %v291_v20  ;;  %v233_v34 = vmax.f32 %v169_v25, 0.0  ;;  %v170_v35 = vadd.f32 %v964_v6, %v99_v27  ;;  %v171_v36 = vadd.f32 %v964_v6, %v100_v28  ;;  %v132_v37 = vmul.f32 %v957_v3, %v61_v24  ;;  %v37_v24 = vld [vmem:[%s1567_s0 + $0x98] sm:$0xff] }
  0x16   :  { %v264_v39 = vmax.f32 %v200_v31, 0.0  ;;  %v265_v40 = vmax.f32 %v201_v32, 0.0  ;;  %v202_v41 = vadd.f32 %v964_v6, %v131_v33  ;;  %v101_v42 = vmul.f32 %v957_v3, %v30_v29  ;;  %v68_v29 = vld [vmem:[%s1567_s0 + $0x190] sm:$0xff] }
  0x17   :  { %890 = vmatmul.mubr.msk.bf16.gmra.mxu1 %vm328_vm0, %v307_v30  ;;  %v292_v45 = vpack.c.bf16 %v233_v34, %v232_v26  ;;  %v234_v46 = vmax.f32 %v170_v35, 0.0  ;;  %v235_v47 = vmax.f32 %v171_v36, 0.0  ;;  %v203_v48 = vadd.f32 %v964_v6, %v132_v37  ;;  %v69_v34 = vld [vmem:[%s1567_s0 + $0x198] sm:$0xff] }
  0x18   :  { %v308_v51 = vpack.c.bf16 %v265_v40, %v264_v39  ;;  %v266_v52 = vmax.f32 %v202_v41, 0.0  ;;  %v102_v53 = vmul.f32 %v957_v3, %v31_v38  ;;  %v172_v54 = vadd.f32 %v964_v6, %v101_v42  ;;  %v38_v39 = vld [vmem:[%s1567_s0 + $0xa0] sm:$0xff] }
  0x19   :  { %861 = vmatprep.mubr.msk.bf16.mxu0 %vm328_vm0, %v292_v45  ;;  %v293_v56 = vpack.c.bf16 %v235_v47, %v234_v46  ;;  %v267_v57 = vmax.f32 %v203_v48, 0.0  ;;  %v133_v58 = vmul.f32 %v957_v3, %v62_v43  ;;  %v134_v59 = vmul.f32 %v957_v3, %v63_v44  ;;  %v39_v48 = vld [vmem:[%s1567_s0 + $0xa8] sm:$0xff] }
  0x1a   :  { %893 = vmatprep.mubr.msk.bf16.mxu1 %vm328_vm0, %v308_v51  ;;  %v173_v61 = vadd.f32 %v964_v6, %v102_v53  ;;  %v236_v62 = vmax.f32 %v172_v54, 0.0  ;;  %v103_v63 = vmul.f32 %v957_v3, %v32_v49  ;;  %v104_v0 = vmul.f32 %v957_v3, %v33_v50  ;;  %v70_v53 = vld [vmem:[%s1567_s0 + $0x1a0] sm:$0xff]  ;;  %v71_v54 = vld [vmem:[%s1567_s0 + $0x1a8] sm:$0xff] }
  0x1b   :  { %v309_v2 = vpack.c.bf16 %v267_v57, %v266_v52  ;;  %v204_v4 = vadd.f32 %v964_v6, %v133_v58  ;;  %v205_v5 = vadd.f32 %v964_v6, %v134_v59  ;;  %v135_v7 = vmul.f32 %v957_v3, %v64_v55  ;;  %v40_v59 = vld [vmem:[%s1567_s0 + $0xb0] sm:$0xff] }
  0x1c   :  { %v237_v8 = vmax.f32 %v173_v61, 0.0  ;;  %v174_v9 = vadd.f32 %v964_v6, %v103_v63  ;;  %v175_v10 = vadd.f32 %v964_v6, %v104_v0  ;;  %v136_v11 = vmul.f32 %v957_v3, %v65_v60  ;;  %v41_v60 = vld [vmem:[%s1567_s0 + $0xb8] sm:$0xff] }
  0x1d   :  { %862 = vmatmul.mubr.msk.bf16.gmra.mxu0 %vm328_vm0, %v293_v56  ;;  %v268_v13 = vmax.f32 %v204_v4, 0.0  ;;  %v269_v14 = vmax.f32 %v205_v5, 0.0  ;;  %v206_v15 = vadd.f32 %v964_v6, %v135_v7  ;;  %v105_v16 = vmul.f32 %v957_v3, %v34_v1  ;;  %v72_v1 = vld [vmem:[%s1567_s0 + $0x1b0] sm:$0xff] }
  0x1e   :  { %v294_v19 = vpack.c.bf16 %v237_v8, %v236_v62  ;;  %v238_v20 = vmax.f32 %v174_v9, 0.0  ;;  %v239_v21 = vmax.f32 %v175_v10, 0.0  ;;  %v207_v22 = vadd.f32 %v964_v6, %v136_v11  ;;  %v73_v8 = vld [vmem:[%s1567_s0 + $0x1b8] sm:$0xff] }
  0x1f   :  { %894 = vmatmul.mubr.msk.bf16.gmra.mxu1 %vm328_vm0, %v309_v2  ;;  %v310_v25 = vpack.c.bf16 %v269_v14, %v268_v13  ;;  %v270_v26 = vmax.f32 %v206_v15, 0.0  ;;  %v106_v27 = vmul.f32 %v957_v3, %v35_v12  ;;  %v176_v28 = vadd.f32 %v964_v6, %v105_v16  ;;  %v42_v13 = vld [vmem:[%s1567_s0 + $0xc0] sm:$0xff] }
  0x20   :  { %865 = vmatprep.mubr.msk.bf16.mxu0 %vm328_vm0, %v294_v19  ;;  %v295_v30 = vpack.c.bf16 %v239_v21, %v238_v20  ;;  %v271_v31 = vmax.f32 %v207_v22, 0.0  ;;  %v137_v32 = vmul.f32 %v957_v3, %v66_v17  ;;  %v138_v33 = vmul.f32 %v957_v3, %v67_v18  ;;  %v43_v22 = vld [vmem:[%s1567_s0 + $0xc8] sm:$0xff] }
  0x21   :  { %897 = vmatprep.mubr.msk.bf16.mxu1 %vm328_vm0, %v310_v25  ;;  %v177_v35 = vadd.f32 %v964_v6, %v106_v27  ;;  %v240_v36 = vmax.f32 %v176_v28, 0.0  ;;  %v107_v37 = vmul.f32 %v957_v3, %v36_v23  ;;  %v108_v38 = vmul.f32 %v957_v3, %v37_v24  ;;  %v74_v27 = vld [vmem:[%s1567_s0 + $0x1c0] sm:$0xff]  ;;  %v75_v28 = vld [vmem:[%s1567_s0 + $0x1c8] sm:$0xff] }
  0x22   :  { %v311_v40 = vpack.c.bf16 %v271_v31, %v270_v26  ;;  %v208_v41 = vadd.f32 %v964_v6, %v137_v32  ;;  %v209_v42 = vadd.f32 %v964_v6, %v138_v33  ;;  %v139_v43 = vmul.f32 %v957_v3, %v68_v29  ;;  %v44_v33 = vld [vmem:[%s1567_s0 + $0xd0] sm:$0xff] }
  0x23   :  { %v241_v44 = vmax.f32 %v177_v35, 0.0  ;;  %v178_v45 = vadd.f32 %v964_v6, %v107_v37  ;;  %v179_v46 = vadd.f32 %v964_v6, %v108_v38  ;;  %v140_v47 = vmul.f32 %v957_v3, %v69_v34  ;;  %v45_v34 = vld [vmem:[%s1567_s0 + $0xd8] sm:$0xff] }
  0x24   :  { %v272_v49 = vmax.f32 %v208_v41, 0.0  ;;  %v273_v50 = vmax.f32 %v209_v42, 0.0  ;;  %v210_v51 = vadd.f32 %v964_v6, %v139_v43  ;;  %v109_v52 = vmul.f32 %v957_v3, %v38_v39  ;;  %v76_v39 = vld [vmem:[%s1567_s0 + $0x1d0] sm:$0xff] }
  0x25   :  { %866 = vmatmul.mubr.msk.bf16.gmra.mxu0 %vm328_vm0, %v295_v30  ;;  %v296_v55 = vpack.c.bf16 %v241_v44, %v240_v36  ;;  %v242_v56 = vmax.f32 %v178_v45, 0.0  ;;  %v243_v57 = vmax.f32 %v179_v46, 0.0  ;;  %v211_v58 = vadd.f32 %v964_v6, %v140_v47  ;;  %v77_v44 = vld [vmem:[%s1567_s0 + $0x1d8] sm:$0xff] }
  0x26   :  { %v312_v61 = vpack.c.bf16 %v273_v50, %v272_v49  ;;  %v274_v62 = vmax.f32 %v210_v51, 0.0  ;;  %v110_v63 = vmul.f32 %v957_v3, %v39_v48  ;;  %v180_v0 = vadd.f32 %v964_v6, %v109_v52  ;;  %v46_v49 = vld [vmem:[%s1567_s0 + $0xe0] sm:$0xff] }
  0x27   :  { %898 = vmatmul.mubr.msk.bf16.gmra.mxu1 %vm328_vm0, %v311_v40  ;;  %869 = vmatprep.mubr.msk.bf16.mxu0 %vm328_vm0, %v296_v55  ;;  %v297_v2 = vpack.c.bf16 %v243_v57, %v242_v56  ;;  %v275_v4 = vmax.f32 %v211_v58, 0.0  ;;  %v141_v5 = vmul.f32 %v957_v3, %v70_v53  ;;  %v142_v7 = vmul.f32 %v957_v3, %v71_v54  ;;  %v47_v58 = vld [vmem:[%s1567_s0 + $0xe8] sm:$0xff] }
  0x28   :  { %901 = vmatprep.mubr.msk.bf16.mxu1 %vm328_vm0, %v312_v61  ;;  %v181_v9 = vadd.f32 %v964_v6, %v110_v63  ;;  %v244_v10 = vmax.f32 %v180_v0, 0.0  ;;  %v111_v11 = vmul.f32 %v957_v3, %v40_v59  ;;  %v112_v12 = vmul.f32 %v957_v3, %v41_v60  ;;  %v78_v63 = vld [vmem:[%s1567_s0 + $0x1e0] sm:$0xff]  ;;  %v79_v0 = vld [vmem:[%s1567_s0 + $0x1e8] sm:$0xff] }
  0x29   :  { %v313_v14 = vpack.c.bf16 %v275_v4, %v274_v62  ;;  %v212_v15 = vadd.f32 %v964_v6, %v141_v5  ;;  %v213_v16 = vadd.f32 %v964_v6, %v142_v7  ;;  %v143_v17 = vmul.f32 %v957_v3, %v72_v1  ;;  %v48_v5 = vld [vmem:[%s1567_s0 + $0xf0] sm:$0xff]  ;;  %v49_v7 = vld [vmem:[%s1567_s0 + $0xf8] sm:$0xff] }
  0x2a   :  { %v245_v18 = vmax.f32 %v181_v9, 0.0  ;;  %v182_v19 = vadd.f32 %v964_v6, %v111_v11  ;;  %v183_v20 = vadd.f32 %v964_v6, %v112_v12  ;;  %v144_v21 = vmul.f32 %v957_v3, %v73_v8  ;;  %v80_v12 = vld [vmem:[%s1567_s0 + $0x1f0] sm:$0xff] }
  0x2b   :  { %v276_v23 = vmax.f32 %v212_v15, 0.0  ;;  %v277_v24 = vmax.f32 %v213_v16, 0.0  ;;  %v214_v25 = vadd.f32 %v964_v6, %v143_v17  ;;  %v113_v26 = vmul.f32 %v957_v3, %v42_v13  ;;  %v81_v17 = vld [vmem:[%s1567_s0 + $0x1f8] sm:$0xff] }
  0x2c   :  { %v298_v29 = vpack.c.bf16 %v245_v18, %v244_v10  ;;  %v246_v30 = vmax.f32 %v182_v19, 0.0  ;;  %v247_v31 = vmax.f32 %v183_v20, 0.0  ;;  %v215_v32 = vadd.f32 %v964_v6, %v144_v21 }
  0x2d   :  { %870 = vmatmul.mubr.msk.bf16.gmra.mxu0 %vm328_vm0, %v297_v2  ;;  %v314_v35 = vpack.c.bf16 %v277_v24, %v276_v23  ;;  %v278_v36 = vmax.f32 %v214_v25, 0.0  ;;  %v114_v37 = vmul.f32 %v957_v3, %v43_v22  ;;  %v184_v38 = vadd.f32 %v964_v6, %v113_v26 }
  0x2e   :  { %873 = vmatprep.mubr.msk.bf16.mxu0 %vm328_vm0, %v298_v29  ;;  %v299_v40 = vpack.c.bf16 %v247_v31, %v246_v30  ;;  %v279_v41 = vmax.f32 %v215_v32, 0.0  ;;  %v145_v42 = vmul.f32 %v957_v3, %v74_v27  ;;  %v146_v43 = vmul.f32 %v957_v3, %v75_v28 }
  0x2f   :  { %902 = vmatmul.mubr.msk.bf16.gmra.mxu1 %vm328_vm0, %v313_v14  ;;  %v185_v45 = vadd.f32 %v964_v6, %v114_v37  ;;  %v248_v46 = vmax.f32 %v184_v38, 0.0  ;;  %v115_v47 = vmul.f32 %v957_v3, %v44_v33  ;;  %v116_v48 = vmul.f32 %v957_v3, %v45_v34 }
  0x30   :  { %905 = vmatprep.mubr.msk.bf16.mxu1 %vm328_vm0, %v314_v35  ;;  %v315_v50 = vpack.c.bf16 %v279_v41, %v278_v36  ;;  %v216_v51 = vadd.f32 %v964_v6, %v145_v42  ;;  %v217_v52 = vadd.f32 %v964_v6, %v146_v43  ;;  %v147_v53 = vmul.f32 %v957_v3, %v76_v39 }
  0x31   :  { %v249_v54 = vmax.f32 %v185_v45, 0.0  ;;  %v186_v55 = vadd.f32 %v964_v6, %v115_v47  ;;  %v187_v56 = vadd.f32 %v964_v6, %v116_v48  ;;  %v148_v57 = vmul.f32 %v957_v3, %v77_v44 }
  0x32   :  { %v280_v59 = vmax.f32 %v216_v51, 0.0  ;;  %v281_v60 = vmax.f32 %v217_v52, 0.0  ;;  %v218_v61 = vadd.f32 %v964_v6, %v147_v53  ;;  %v117_v62 = vmul.f32 %v957_v3, %v46_v49 }
  0x33   :  { %v300_v1 = vpack.c.bf16 %v249_v54, %v248_v46  ;;  %v250_v2 = vmax.f32 %v186_v55, 0.0  ;;  %v219_v4 = vadd.f32 %v964_v6, %v148_v57  ;;  %v251_v9 = vmax.f32 %v187_v56, 0.0 }
  0x34   :  { %v316_v8 = vpack.c.bf16 %v281_v60, %v280_v59  ;;  %v118_v10 = vmul.f32 %v957_v3, %v47_v58  ;;  %v188_v11 = vadd.f32 %v964_v6, %v117_v62  ;;  %v282_v13 = vmax.f32 %v218_v61, 0.0 }
  0x35   :  { %874 = vmatmul.mubr.msk.bf16.gmra.mxu0 %vm328_vm0, %v299_v40  ;;  %v283_v14 = vmax.f32 %v219_v4, 0.0  ;;  %v149_v15 = vmul.f32 %v957_v3, %v78_v63  ;;  %v150_v16 = vmul.f32 %v957_v3, %v79_v0  ;;  %v119_v20 = vmul.f32 %v957_v3, %v48_v5 }
  0x36   :  { %877 = vmatprep.mubr.msk.bf16.mxu0 %vm328_vm0, %v300_v1  ;;  %v189_v18 = vadd.f32 %v964_v6, %v118_v10  ;;  %v252_v19 = vmax.f32 %v188_v11, 0.0  ;;  %v120_v21 = vmul.f32 %v957_v3, %v49_v7  ;;  %v151_v24 = vmul.f32 %v957_v3, %v80_v12 }
  0x37   :  { %906 = vmatmul.mubr.msk.bf16.gmra.mxu1 %vm328_vm0, %v315_v50  ;;  %v220_v22 = vadd.f32 %v964_v6, %v149_v15  ;;  %v221_v23 = vadd.f32 %v964_v6, %v150_v16  ;;  %v301_v25 = vpack.c.bf16 %v251_v9, %v250_v2  ;;  %v152_v27 = vmul.f32 %v957_v3, %v81_v17 }
  0x38   :  { %909 = vmatprep.mubr.msk.bf16.mxu1 %vm328_vm0, %v316_v8  ;;  %v253_v26 = vmax.f32 %v189_v18, 0.0  ;;  %v190_v30 = vadd.f32 %v964_v6, %v119_v20  ;;  %v191_v31 = vadd.f32 %v964_v6, %v120_v21  ;;  %v317_v32 = vpack.c.bf16 %v283_v14, %v282_v13 }
  0x39   :  { %v284_v28 = vmax.f32 %v220_v22, 0.0  ;;  %v285_v29 = vmax.f32 %v221_v23, 0.0  ;;  %v222_v34 = vadd.f32 %v964_v6, %v151_v24  ;;  %v223_v35 = vadd.f32 %v964_v6, %v152_v27 }
  0x3a   :  { %v302_v33 = vpack.c.bf16 %v253_v26, %v252_v19  ;;  %v254_v37 = vmax.f32 %v190_v30, 0.0  ;;  %v255_v38 = vmax.f32 %v191_v31, 0.0 }
  0x3b   :  { %v318_v36 = vpack.c.bf16 %v285_v29, %v284_v28  ;;  %v286_v3 = vmax.f32 %v222_v34, 0.0  ;;  %v287_v39 = vmax.f32 %v223_v35, 0.0 }
  0x3c   :  { %v303_v40 = vpack.c.bf16 %v255_v38, %v254_v37 }
  0x3d   :  { %878 = vmatmul.mubr.msk.bf16.gmra.mxu0 %vm328_vm0, %v301_v25  ;;  %v319_v41 = vpack.c.bf16 %v287_v39, %v286_v3 }
  0x3e   :  { %881 = vmatprep.mubr.msk.bf16.mxu0 %vm328_vm0, %v302_v33 }
  0x3f   :  { %910 = vmatmul.mubr.msk.bf16.gmra.mxu1 %vm328_vm0, %v317_v32 }
  0x40   :  { %913 = vmatprep.mubr.msk.bf16.mxu1 %vm328_vm0, %v318_v36 }
  0x45   :  { %882 = vmatmul.mubr.msk.bf16.gmra.mxu0 %vm328_vm0, %v303_v40 }
  0x47   :  { %914 = vmatmul.mubr.msk.bf16.gmra.mxu1 %vm328_vm0, %v319_v41 }
  0xcd   :  { %v855_v6 = vpop.f32.mrf.mxu0 }
  0xce   :  { %717 = vst.msk [vmem:[%s1570_s4 + $0x10] sm:$0xff] %vm714_vm1, %v855_v6 }
  0xcf   :  { %v887_v42 = vpop.f32.mrf.mxu1  ;;  %v459_v43 = vpop.f32.mrf.mxu0 }
  0xd0   :  { %749 = vst.msk [vmem:[%s1570_s4 + $0x110] sm:$0xff] %vm714_vm1, %v887_v42  ;;  %715 = vst.msk [vmem:[%s1570_s4] sm:$0xff] %vm714_vm1, %v459_v43 }
  0xd1   :  { %v587_v44 = vpop.f32.mrf.mxu1  ;;  %v856_v45 = vpop.f32.mrf.mxu0 }
  0xd2   :  { %747 = vst.msk [vmem:[%s1570_s4 + $0x100] sm:$0xff] %vm714_vm1, %v587_v44  ;;  %718 = vst.msk [vmem:[%s1570_s4 + $0x18] sm:$0xff] %vm714_vm1, %v856_v45 }
  0xd3   :  { %v888_v46 = vpop.f32.mrf.mxu1  ;;  %v462_v47 = vpop.f32.mrf.mxu0 }
  0xd4   :  { %750 = vst.msk [vmem:[%s1570_s4 + $0x118] sm:$0xff] %vm714_vm1, %v888_v46  ;;  %716 = vst.msk [vmem:[%s1570_s4 + $0x8] sm:$0xff] %vm714_vm1, %v462_v47 }
  0xd5   :  { %v590_v48 = vpop.f32.mrf.mxu1  ;;  %v859_v49 = vpop.f32.mrf.mxu0 }
  0xd6   :  { %748 = vst.msk [vmem:[%s1570_s4 + $0x108] sm:$0xff] %vm714_vm1, %v590_v48  ;;  %721 = vst.msk [vmem:[%s1570_s4 + $0x30] sm:$0xff] %vm714_vm1, %v859_v49 }
  0xd7   :  { %v891_v50 = vpop.f32.mrf.mxu1  ;;  %v475_v51 = vpop.f32.mrf.mxu0 }
  0xd8   :  { %753 = vst.msk [vmem:[%s1570_s4 + $0x130] sm:$0xff] %vm714_vm1, %v891_v50  ;;  %719 = vst.msk [vmem:[%s1570_s4 + $0x20] sm:$0xff] %vm714_vm1, %v475_v51 }
  0xd9   :  { %v603_v52 = vpop.f32.mrf.mxu1  ;;  %v860_v53 = vpop.f32.mrf.mxu0 }
  0xda   :  { %751 = vst.msk [vmem:[%s1570_s4 + $0x120] sm:$0xff] %vm714_vm1, %v603_v52  ;;  %722 = vst.msk [vmem:[%s1570_s4 + $0x38] sm:$0xff] %vm714_vm1, %v860_v53 }
  0xdb   :  { %v892_v54 = vpop.f32.mrf.mxu1  ;;  %v478_v55 = vpop.f32.mrf.mxu0 }
  0xdc   :  { %754 = vst.msk [vmem:[%s1570_s4 + $0x138] sm:$0xff] %vm714_vm1, %v892_v54  ;;  %720 = vst.msk [vmem:[%s1570_s4 + $0x28] sm:$0xff] %vm714_vm1, %v478_v55 }
  0xdd   :  { %v606_v56 = vpop.f32.mrf.mxu1  ;;  %v863_v57 = vpop.f32.mrf.mxu0 }
  0xde   :  { %752 = vst.msk [vmem:[%s1570_s4 + $0x128] sm:$0xff] %vm714_vm1, %v606_v56  ;;  %725 = vst.msk [vmem:[%s1570_s4 + $0x50] sm:$0xff] %vm714_vm1, %v863_v57 }
  0xdf   :  { %v895_v58 = vpop.f32.mrf.mxu1  ;;  %v491_v59 = vpop.f32.mrf.mxu0 }
  0xe0   :  { %757 = vst.msk [vmem:[%s1570_s4 + $0x150] sm:$0xff] %vm714_vm1, %v895_v58  ;;  %723 = vst.msk [vmem:[%s1570_s4 + $0x40] sm:$0xff] %vm714_vm1, %v491_v59 }
  0xe1   :  { %v619_v60 = vpop.f32.mrf.mxu1  ;;  %v864_v61 = vpop.f32.mrf.mxu0 }
  0xe2   :  { %755 = vst.msk [vmem:[%s1570_s4 + $0x140] sm:$0xff] %vm714_vm1, %v619_v60  ;;  %726 = vst.msk [vmem:[%s1570_s4 + $0x58] sm:$0xff] %vm714_vm1, %v864_v61 }
  0xe3   :  { %v896_v62 = vpop.f32.mrf.mxu1  ;;  %v494_v63 = vpop.f32.mrf.mxu0 }
  0xe4   :  { %758 = vst.msk [vmem:[%s1570_s4 + $0x158] sm:$0xff] %vm714_vm1, %v896_v62  ;;  %724 = vst.msk [vmem:[%s1570_s4 + $0x48] sm:$0xff] %vm714_vm1, %v494_v63 }
  0xe5   :  { %v622_v0 = vpop.f32.mrf.mxu1  ;;  %v867_v1 = vpop.f32.mrf.mxu0 }
  0xe6   :  { %756 = vst.msk [vmem:[%s1570_s4 + $0x148] sm:$0xff] %vm714_vm1, %v622_v0  ;;  %729 = vst.msk [vmem:[%s1570_s4 + $0x70] sm:$0xff] %vm714_vm1, %v867_v1 }
  0xe7   :  { %v899_v2 = vpop.f32.mrf.mxu1  ;;  %v507_v4 = vpop.f32.mrf.mxu0 }
  0xe8   :  { %761 = vst.msk [vmem:[%s1570_s4 + $0x170] sm:$0xff] %vm714_vm1, %v899_v2  ;;  %727 = vst.msk [vmem:[%s1570_s4 + $0x60] sm:$0xff] %vm714_vm1, %v507_v4 }
  0xe9   :  { %v635_v5 = vpop.f32.mrf.mxu1  ;;  %v868_v7 = vpop.f32.mrf.mxu0 }
  0xea   :  { %759 = vst.msk [vmem:[%s1570_s4 + $0x160] sm:$0xff] %vm714_vm1, %v635_v5  ;;  %730 = vst.msk [vmem:[%s1570_s4 + $0x78] sm:$0xff] %vm714_vm1, %v868_v7 }
  0xeb   :  { %v900_v8 = vpop.f32.mrf.mxu1  ;;  %v510_v9 = vpop.f32.mrf.mxu0 }
  0xec   :  { %762 = vst.msk [vmem:[%s1570_s4 + $0x178] sm:$0xff] %vm714_vm1, %v900_v8  ;;  %728 = vst.msk [vmem:[%s1570_s4 + $0x68] sm:$0xff] %vm714_vm1, %v510_v9 }
  0xed   :  { %v638_v10 = vpop.f32.mrf.mxu1  ;;  %v871_v11 = vpop.f32.mrf.mxu0 }
  0xee   :  { %760 = vst.msk [vmem:[%s1570_s4 + $0x168] sm:$0xff] %vm714_vm1, %v638_v10  ;;  %733 = vst.msk [vmem:[%s1570_s4 + $0x90] sm:$0xff] %vm714_vm1, %v871_v11 }
  0xef   :  { %v903_v12 = vpop.f32.mrf.mxu1  ;;  %v523_v13 = vpop.f32.mrf.mxu0 }
  0xf0   :  { %765 = vst.msk [vmem:[%s1570_s4 + $0x190] sm:$0xff] %vm714_vm1, %v903_v12  ;;  %731 = vst.msk [vmem:[%s1570_s4 + $0x80] sm:$0xff] %vm714_vm1, %v523_v13 }
  0xf1   :  { %v651_v14 = vpop.f32.mrf.mxu1  ;;  %v872_v15 = vpop.f32.mrf.mxu0 }
  0xf2   :  { %763 = vst.msk [vmem:[%s1570_s4 + $0x180] sm:$0xff] %vm714_vm1, %v651_v14  ;;  %734 = vst.msk [vmem:[%s1570_s4 + $0x98] sm:$0xff] %vm714_vm1, %v872_v15 }
  0xf3   :  { %v904_v16 = vpop.f32.mrf.mxu1  ;;  %v526_v17 = vpop.f32.mrf.mxu0 }
  0xf4   :  { %766 = vst.msk [vmem:[%s1570_s4 + $0x198] sm:$0xff] %vm714_vm1, %v904_v16  ;;  %732 = vst.msk [vmem:[%s1570_s4 + $0x88] sm:$0xff] %vm714_vm1, %v526_v17 }
  0xf5   :  { %v654_v18 = vpop.f32.mrf.mxu1  ;;  %v875_v19 = vpop.f32.mrf.mxu0 }
  0xf6   :  { %764 = vst.msk [vmem:[%s1570_s4 + $0x188] sm:$0xff] %vm714_vm1, %v654_v18  ;;  %737 = vst.msk [vmem:[%s1570_s4 + $0xb0] sm:$0xff] %vm714_vm1, %v875_v19 }
  0xf7   :  { %v907_v20 = vpop.f32.mrf.mxu1  ;;  %v539_v21 = vpop.f32.mrf.mxu0 }
  0xf8   :  { %769 = vst.msk [vmem:[%s1570_s4 + $0x1b0] sm:$0xff] %vm714_vm1, %v907_v20  ;;  %735 = vst.msk [vmem:[%s1570_s4 + $0xa0] sm:$0xff] %vm714_vm1, %v539_v21 }
  0xf9   :  { %v667_v22 = vpop.f32.mrf.mxu1  ;;  %v876_v23 = vpop.f32.mrf.mxu0 }
  0xfa   :  { %767 = vst.msk [vmem:[%s1570_s4 + $0x1a0] sm:$0xff] %vm714_vm1, %v667_v22  ;;  %738 = vst.msk [vmem:[%s1570_s4 + $0xb8] sm:$0xff] %vm714_vm1, %v876_v23 }
  0xfb   :  { %v908_v24 = vpop.f32.mrf.mxu1  ;;  %v542_v25 = vpop.f32.mrf.mxu0 }
  0xfc   :  { %770 = vst.msk [vmem:[%s1570_s4 + $0x1b8] sm:$0xff] %vm714_vm1, %v908_v24  ;;  %736 = vst.msk [vmem:[%s1570_s4 + $0xa8] sm:$0xff] %vm714_vm1, %v542_v25 }
  0xfd   :  { %v670_v26 = vpop.f32.mrf.mxu1  ;;  %v879_v27 = vpop.f32.mrf.mxu0 }
  0xfe   :  { %768 = vst.msk [vmem:[%s1570_s4 + $0x1a8] sm:$0xff] %vm714_vm1, %v670_v26  ;;  %741 = vst.msk [vmem:[%s1570_s4 + $0xd0] sm:$0xff] %vm714_vm1, %v879_v27 }
  0xff   :  { %v911_v28 = vpop.f32.mrf.mxu1  ;;  %v555_v29 = vpop.f32.mrf.mxu0 }
 0x100   :  { %773 = vst.msk [vmem:[%s1570_s4 + $0x1d0] sm:$0xff] %vm714_vm1, %v911_v28  ;;  %739 = vst.msk [vmem:[%s1570_s4 + $0xc0] sm:$0xff] %vm714_vm1, %v555_v29 }
 0x101   :  { %v683_v30 = vpop.f32.mrf.mxu1  ;;  %v880_v31 = vpop.f32.mrf.mxu0 }
 0x102   :  { %771 = vst.msk [vmem:[%s1570_s4 + $0x1c0] sm:$0xff] %vm714_vm1, %v683_v30  ;;  %742 = vst.msk [vmem:[%s1570_s4 + $0xd8] sm:$0xff] %vm714_vm1, %v880_v31 }
 0x103   :  { %v912_v32 = vpop.f32.mrf.mxu1  ;;  %v558_v33 = vpop.f32.mrf.mxu0 }
 0x104   :  { %774 = vst.msk [vmem:[%s1570_s4 + $0x1d8] sm:$0xff] %vm714_vm1, %v912_v32  ;;  %740 = vst.msk [vmem:[%s1570_s4 + $0xc8] sm:$0xff] %vm714_vm1, %v558_v33 }
 0x105   :  { %v686_v34 = vpop.f32.mrf.mxu1  ;;  %v883_v35 = vpop.f32.mrf.mxu0 }
 0x106   :  { %772 = vst.msk [vmem:[%s1570_s4 + $0x1c8] sm:$0xff] %vm714_vm1, %v686_v34  ;;  %745 = vst.msk [vmem:[%s1570_s4 + $0xf0] sm:$0xff] %vm714_vm1, %v883_v35 }
 0x107   :  { %v915_v36 = vpop.f32.mrf.mxu1  ;;  %v571_v37 = vpop.f32.mrf.mxu0 }
 0x108   :  { %777 = vst.msk [vmem:[%s1570_s4 + $0x1f0] sm:$0xff] %vm714_vm1, %v915_v36  ;;  %743 = vst.msk [vmem:[%s1570_s4 + $0xe0] sm:$0xff] %vm714_vm1, %v571_v37 }
 0x109   :  { %v699_v38 = vpop.f32.mrf.mxu1  ;;  %v884_v3 = vpop.f32.mrf.mxu0 }
 0x10a   :  { %775 = vst.msk [vmem:[%s1570_s4 + $0x1e0] sm:$0xff] %vm714_vm1, %v699_v38  ;;  %746 = vst.msk [vmem:[%s1570_s4 + $0xf8] sm:$0xff] %vm714_vm1, %v884_v3 }
 0x10b   :  { %v916_v39 = vpop.f32.mrf.mxu1  ;;  %v574_v40 = vpop.f32.mrf.mxu0 }
 0x10c   :  { %778 = vst.msk [vmem:[%s1570_s4 + $0x1f8] sm:$0xff] %vm714_vm1, %v916_v39  ;;  %744 = vst.msk [vmem:[%s1570_s4 + $0xe8] sm:$0xff] %vm714_vm1, %v574_v40 }
 0x10d   :  { %v702_v41 = vpop.f32.mrf.mxu1 }
 0x10e   :  { %776 = vst.msk [vmem:[%s1570_s4 + $0x1e8] sm:$0xff] %vm714_vm1, %v702_v41 }

// kernel: preact_bottleneck_forward.4
= control target key start
LH: loop header
LB: loop body
LE: loop exit
PB: predicated region body
PF: predicated region fallthrough
CT: control target
= control target key end

     0   :  { %vm334_vm0 = vcmask 130048   ;;  %vm1182_vm1 = vcmask 60416   ;;  %s2312_s3 = inlined_call_operand.vmem [shape: bf16[16,8], index: 3, kind: input, shape index: {}]   ;;  %s2313_s0 = inlined_call_operand.vmem [shape: f32[512,16], index: 0, kind: input, shape index: {}]   ;;  %s2314_s1 = inlined_call_operand.vmem [shape: f32[1,16], index: 1, kind: input, shape index: {}]   ;;  %s2315_s2 = inlined_call_operand.vmem [shape: f32[1,16], index: 2, kind: input, shape index: {}]   ;;  %s2316_s4 = inlined_call_operand.vmem [shape: f32[1,8], index: 4, kind: input, shape index: {}]   ;;  %s2317_s5 = inlined_call_operand.vmem [shape: f32[1,8], index: 5, kind: input, shape index: {}]   ;;  %s2318_s6 = inlined_call_operand.vmem [shape: bf16[512,8], index: 6, kind: output, shape index: {}]  }
   0x1   :  { %v1517_v0 = vld [vmem:[%s2312_s3] sm:$0xff]   ;;  %v25_v2 = vld [vmem:[%s2313_s0 + $0x8] sm:$0xff]  ;;  %v26_v11 = vld [vmem:[%s2313_s0 + $0x10] sm:$0xff] }
   0x2   :  { %v24_v1 = vld [vmem:[%s2313_s0] sm:$0xff]  ;;  %1449 = vmatprep.subr.bf16.mxu0 %v1517_v0  ;;  %1515 = vmatprep.subr.bf16.mxu1 %v1517_v0  ;;  %v57_v8 = vld [vmem:[%s2313_s0 + $0x108] sm:$0xff]  ;;  %v27_v12 = vld [vmem:[%s2313_s0 + $0x18] sm:$0xff] }
   0x3   :  { %v1565_v3 = vld [vmem:[%s2314_s1] ss:$0 sm:$0xff]  ;;  %1450 = vmatpush3.bf16.msra.mxu0 %v1517_v0  ;;  %1516 = vmatpush3.bf16.msra.mxu1 %v1517_v0  ;;  %v58_v13 = vld [vmem:[%s2313_s0 + $0x110] sm:$0xff]  ;;  %v59_v18 = vld [vmem:[%s2313_s0 + $0x118] sm:$0xff] }
   0x4   :  { %v95_v4 = vmul.f32 %v1565_v3, %v24_v1  ;;  %v96_v5 = vmul.f32 %v1565_v3, %v25_v2  ;;  %v1572_v6 = vld [vmem:[%s2315_s2] ss:$0 sm:$0xff]  ;;  %v128_v10 = vmul.f32 %v1565_v3, %v57_v8  ;;  %v97_v16 = vmul.f32 %v1565_v3, %v26_v11  ;;  %v29_v28 = vld [vmem:[%s2313_s0 + $0x28] sm:$0xff]  ;;  %v30_v39 = vld [vmem:[%s2313_s0 + $0x30] sm:$0xff] }
   0x5   :  { %v56_v7 = vld [vmem:[%s2313_s0 + $0x100] sm:$0xff]  ;;  %v98_v17 = vmul.f32 %v1565_v3, %v27_v12  ;;  %v129_v21 = vmul.f32 %v1565_v3, %v58_v13  ;;  %v130_v22 = vmul.f32 %v1565_v3, %v59_v18  ;;  %v61_v34 = vld [vmem:[%s2313_s0 + $0x128] sm:$0xff]  ;;  %v31_v40 = vld [vmem:[%s2313_s0 + $0x38] sm:$0xff]  ;;  %v100_v44 = vmul.f32 %v1565_v3, %v29_v28 }
   0x6   :  { %v127_v9 = vmul.f32 %v1565_v3, %v56_v7  ;;  %v166_v14 = vadd.f32 %v1572_v6, %v95_v4  ;;  %v167_v15 = vadd.f32 %v1572_v6, %v96_v5  ;;  %v199_v20 = vadd.f32 %v1572_v6, %v128_v10  ;;  %v28_v23 = vld [vmem:[%s2313_s0 + $0x20] sm:$0xff]  ;;  %v62_v45 = vld [vmem:[%s2313_s0 + $0x130] sm:$0xff]  ;;  %v63_v50 = vld [vmem:[%s2313_s0 + $0x138] sm:$0xff] }
   0x7   :  { %v168_v26 = vadd.f32 %v1572_v6, %v97_v16  ;;  %v169_v27 = vadd.f32 %v1572_v6, %v98_v17  ;;  %v200_v31 = vadd.f32 %v1572_v6, %v129_v21  ;;  %v201_v32 = vadd.f32 %v1572_v6, %v130_v22  ;;  %v60_v33 = vld [vmem:[%s2313_s0 + $0x120] sm:$0xff]  ;;  %v33_v0 = vld [vmem:[%s2313_s0 + $0x48] sm:$0xff]  ;;  %v34_v13 = vld [vmem:[%s2313_s0 + $0x50] sm:$0xff] }
   0x8   :  { %v198_v19 = vadd.f32 %v1572_v6, %v127_v9  ;;  %v230_v24 = vmax.f32 %v166_v14, 0.0  ;;  %v231_v25 = vmax.f32 %v167_v15, 0.0  ;;  %v263_v30 = vmax.f32 %v199_v20, 0.0  ;;  %v32_v55 = vld [vmem:[%s2313_s0 + $0x40] sm:$0xff]  ;;  %v65_v8 = vld [vmem:[%s2313_s0 + $0x148] sm:$0xff]  ;;  %v35_v14 = vld [vmem:[%s2313_s0 + $0x58] sm:$0xff] }
   0x9   :  { %v232_v36 = vmax.f32 %v168_v26, 0.0  ;;  %v233_v37 = vmax.f32 %v169_v27, 0.0  ;;  %v99_v38 = vmul.f32 %v1565_v3, %v28_v23  ;;  %v264_v42 = vmax.f32 %v200_v31, 0.0  ;;  %v64_v7 = vld [vmem:[%s2313_s0 + $0x140] sm:$0xff] }
   0xa   :  { %v262_v29 = vmax.f32 %v198_v19, 0.0  ;;  %v294_v35 = vpack.c.bf16 %v231_v25, %v230_v24  ;;  %v265_v43 = vmax.f32 %v201_v32, 0.0  ;;  %v131_v48 = vmul.f32 %v1565_v3, %v60_v33  ;;  %v66_v19 = vld [vmem:[%s2313_s0 + $0x150] sm:$0xff]  ;;  %v67_v24 = vld [vmem:[%s2313_s0 + $0x158] sm:$0xff] }
   0xb   :  { %v295_v46 = vpack.c.bf16 %v233_v37, %v232_v36  ;;  %v170_v47 = vadd.f32 %v1572_v6, %v99_v38  ;;  %v132_v49 = vmul.f32 %v1565_v3, %v61_v34  ;;  %v171_v52 = vadd.f32 %v1572_v6, %v100_v44  ;;  %v37_v38 = vld [vmem:[%s2313_s0 + $0x68] sm:$0xff] }
   0xc   :  { %v310_v41 = vpack.c.bf16 %v263_v30, %v262_v29  ;;  %1451 = vmatprep.mubr.msk.bf16.mxu0 %vm334_vm0, %v294_v35  ;;  %v311_v51 = vpack.c.bf16 %v265_v43, %v264_v42  ;;  %v101_v53 = vmul.f32 %v1565_v3, %v30_v39  ;;  %v102_v54 = vmul.f32 %v1565_v3, %v31_v40  ;;  %v36_v29 = vld [vmem:[%s2313_s0 + $0x60] sm:$0xff]  ;;  %v69_v44 = vld [vmem:[%s2313_s0 + $0x168] sm:$0xff] }
   0xd   :  { %1452 = vmatmul.mubr.msk.bf16.vlgmr.msra.gmra.mxu0 %vm334_vm0, %v295_v46  ;;  %v234_v56 = vmax.f32 %v170_v47, 0.0  ;;  %v202_v57 = vadd.f32 %v1572_v6, %v131_v48  ;;  %v203_v58 = vadd.f32 %v1572_v6, %v132_v49  ;;  %v133_v59 = vmul.f32 %v1565_v3, %v62_v45  ;;  %v68_v43 = vld [vmem:[%s2313_s0 + $0x160] sm:$0xff]  ;;  %v38_v49 = vld [vmem:[%s2313_s0 + $0x70] sm:$0xff] }
   0xe   :  { %1483 = vmatprep.mubr.msk.bf16.mxu1 %vm334_vm0, %v310_v41  ;;  %v235_v60 = vmax.f32 %v171_v52, 0.0  ;;  %v172_v61 = vadd.f32 %v1572_v6, %v101_v53  ;;  %v173_v62 = vadd.f32 %v1572_v6, %v102_v54  ;;  %v134_v63 = vmul.f32 %v1565_v3, %v63_v50  ;;  %v39_v50 = vld [vmem:[%s2313_s0 + $0x78] sm:$0xff] }
   0xf   :  { %1484 = vmatmul.mubr.msk.bf16.vlgmr.msra.gmra.mxu1 %vm334_vm0, %v311_v51  ;;  %v266_v1 = vmax.f32 %v202_v57, 0.0  ;;  %v267_v2 = vmax.f32 %v203_v58, 0.0  ;;  %v204_v4 = vadd.f32 %v1572_v6, %v133_v59  ;;  %v103_v5 = vmul.f32 %v1565_v3, %v32_v55  ;;  %v70_v55 = vld [vmem:[%s2313_s0 + $0x170] sm:$0xff] }
  0x10   :  { %v296_v9 = vpack.c.bf16 %v235_v60, %v234_v56  ;;  %v236_v10 = vmax.f32 %v172_v61, 0.0  ;;  %v237_v11 = vmax.f32 %v173_v62, 0.0  ;;  %v205_v12 = vadd.f32 %v1572_v6, %v134_v63  ;;  %v71_v60 = vld [vmem:[%s2313_s0 + $0x178] sm:$0xff] }
  0x11   :  { %v312_v15 = vpack.c.bf16 %v267_v2, %v266_v1  ;;  %v268_v16 = vmax.f32 %v204_v4, 0.0  ;;  %v104_v17 = vmul.f32 %v1565_v3, %v33_v0  ;;  %v174_v18 = vadd.f32 %v1572_v6, %v103_v5  ;;  %v40_v1 = vld [vmem:[%s2313_s0 + $0x80] sm:$0xff] }
  0x12   :  { %1455 = vmatprep.mubr.msk.bf16.mxu0 %vm334_vm0, %v296_v9  ;;  %v297_v20 = vpack.c.bf16 %v237_v11, %v236_v10  ;;  %v269_v21 = vmax.f32 %v205_v12, 0.0  ;;  %v135_v22 = vmul.f32 %v1565_v3, %v64_v7  ;;  %v136_v23 = vmul.f32 %v1565_v3, %v65_v8  ;;  %v41_v12 = vld [vmem:[%s2313_s0 + $0x88] sm:$0xff] }
  0x13   :  { %1487 = vmatprep.mubr.msk.bf16.mxu1 %vm334_vm0, %v312_v15  ;;  %v175_v25 = vadd.f32 %v1572_v6, %v104_v17  ;;  %v238_v26 = vmax.f32 %v174_v18, 0.0  ;;  %v105_v27 = vmul.f32 %v1565_v3, %v34_v13  ;;  %v106_v28 = vmul.f32 %v1565_v3, %v35_v14  ;;  %v72_v17 = vld [vmem:[%s2313_s0 + $0x180] sm:$0xff]  ;;  %v73_v18 = vld [vmem:[%s2313_s0 + $0x188] sm:$0xff] }
  0x14   :  { %v313_v30 = vpack.c.bf16 %v269_v21, %v268_v16  ;;  %v206_v31 = vadd.f32 %v1572_v6, %v135_v22  ;;  %v207_v32 = vadd.f32 %v1572_v6, %v136_v23  ;;  %v137_v33 = vmul.f32 %v1565_v3, %v66_v19  ;;  %v42_v23 = vld [vmem:[%s2313_s0 + $0x90] sm:$0xff] }
  0x15   :  { %1456 = vmatmul.mubr.msk.bf16.gmra.mxu0 %vm334_vm0, %v297_v20  ;;  %v239_v34 = vmax.f32 %v175_v25, 0.0  ;;  %v176_v35 = vadd.f32 %v1572_v6, %v105_v27  ;;  %v177_v36 = vadd.f32 %v1572_v6, %v106_v28  ;;  %v138_v37 = vmul.f32 %v1565_v3, %v67_v24  ;;  %v43_v24 = vld [vmem:[%s2313_s0 + $0x98] sm:$0xff] }
  0x16   :  { %v270_v39 = vmax.f32 %v206_v31, 0.0  ;;  %v271_v40 = vmax.f32 %v207_v32, 0.0  ;;  %v208_v41 = vadd.f32 %v1572_v6, %v137_v33  ;;  %v107_v42 = vmul.f32 %v1565_v3, %v36_v29  ;;  %v74_v29 = vld [vmem:[%s2313_s0 + $0x190] sm:$0xff] }
  0x17   :  { %1488 = vmatmul.mubr.msk.bf16.gmra.mxu1 %vm334_vm0, %v313_v30  ;;  %v298_v45 = vpack.c.bf16 %v239_v34, %v238_v26  ;;  %v240_v46 = vmax.f32 %v176_v35, 0.0  ;;  %v241_v47 = vmax.f32 %v177_v36, 0.0  ;;  %v209_v48 = vadd.f32 %v1572_v6, %v138_v37  ;;  %v75_v34 = vld [vmem:[%s2313_s0 + $0x198] sm:$0xff] }
  0x18   :  { %v314_v51 = vpack.c.bf16 %v271_v40, %v270_v39  ;;  %v272_v52 = vmax.f32 %v208_v41, 0.0  ;;  %v108_v53 = vmul.f32 %v1565_v3, %v37_v38  ;;  %v178_v54 = vadd.f32 %v1572_v6, %v107_v42  ;;  %v44_v39 = vld [vmem:[%s2313_s0 + $0xa0] sm:$0xff] }
  0x19   :  { %1459 = vmatprep.mubr.msk.bf16.mxu0 %vm334_vm0, %v298_v45  ;;  %v299_v56 = vpack.c.bf16 %v241_v47, %v240_v46  ;;  %v273_v57 = vmax.f32 %v209_v48, 0.0  ;;  %v139_v58 = vmul.f32 %v1565_v3, %v68_v43  ;;  %v140_v59 = vmul.f32 %v1565_v3, %v69_v44  ;;  %v45_v48 = vld [vmem:[%s2313_s0 + $0xa8] sm:$0xff] }
  0x1a   :  { %1491 = vmatprep.mubr.msk.bf16.mxu1 %vm334_vm0, %v314_v51  ;;  %v179_v61 = vadd.f32 %v1572_v6, %v108_v53  ;;  %v242_v62 = vmax.f32 %v178_v54, 0.0  ;;  %v109_v63 = vmul.f32 %v1565_v3, %v38_v49  ;;  %v110_v0 = vmul.f32 %v1565_v3, %v39_v50  ;;  %v76_v53 = vld [vmem:[%s2313_s0 + $0x1a0] sm:$0xff]  ;;  %v77_v54 = vld [vmem:[%s2313_s0 + $0x1a8] sm:$0xff] }
  0x1b   :  { %v315_v2 = vpack.c.bf16 %v273_v57, %v272_v52  ;;  %v210_v4 = vadd.f32 %v1572_v6, %v139_v58  ;;  %v211_v5 = vadd.f32 %v1572_v6, %v140_v59  ;;  %v141_v7 = vmul.f32 %v1565_v3, %v70_v55  ;;  %v46_v59 = vld [vmem:[%s2313_s0 + $0xb0] sm:$0xff] }
  0x1c   :  { %v243_v8 = vmax.f32 %v179_v61, 0.0  ;;  %v180_v9 = vadd.f32 %v1572_v6, %v109_v63  ;;  %v181_v10 = vadd.f32 %v1572_v6, %v110_v0  ;;  %v142_v11 = vmul.f32 %v1565_v3, %v71_v60  ;;  %v47_v60 = vld [vmem:[%s2313_s0 + $0xb8] sm:$0xff] }
  0x1d   :  { %1460 = vmatmul.mubr.msk.bf16.gmra.mxu0 %vm334_vm0, %v299_v56  ;;  %v274_v13 = vmax.f32 %v210_v4, 0.0  ;;  %v275_v14 = vmax.f32 %v211_v5, 0.0  ;;  %v212_v15 = vadd.f32 %v1572_v6, %v141_v7  ;;  %v111_v16 = vmul.f32 %v1565_v3, %v40_v1  ;;  %v78_v1 = vld [vmem:[%s2313_s0 + $0x1b0] sm:$0xff] }
  0x1e   :  { %v300_v19 = vpack.c.bf16 %v243_v8, %v242_v62  ;;  %v244_v20 = vmax.f32 %v180_v9, 0.0  ;;  %v245_v21 = vmax.f32 %v181_v10, 0.0  ;;  %v213_v22 = vadd.f32 %v1572_v6, %v142_v11  ;;  %v79_v8 = vld [vmem:[%s2313_s0 + $0x1b8] sm:$0xff] }
  0x1f   :  { %1492 = vmatmul.mubr.msk.bf16.gmra.mxu1 %vm334_vm0, %v315_v2  ;;  %v316_v25 = vpack.c.bf16 %v275_v14, %v274_v13  ;;  %v276_v26 = vmax.f32 %v212_v15, 0.0  ;;  %v112_v27 = vmul.f32 %v1565_v3, %v41_v12  ;;  %v182_v28 = vadd.f32 %v1572_v6, %v111_v16  ;;  %v48_v13 = vld [vmem:[%s2313_s0 + $0xc0] sm:$0xff] }
  0x20   :  { %1463 = vmatprep.mubr.msk.bf16.mxu0 %vm334_vm0, %v300_v19  ;;  %v301_v30 = vpack.c.bf16 %v245_v21, %v244_v20  ;;  %v277_v31 = vmax.f32 %v213_v22, 0.0  ;;  %v143_v32 = vmul.f32 %v1565_v3, %v72_v17  ;;  %v144_v33 = vmul.f32 %v1565_v3, %v73_v18  ;;  %v49_v22 = vld [vmem:[%s2313_s0 + $0xc8] sm:$0xff] }
  0x21   :  { %1495 = vmatprep.mubr.msk.bf16.mxu1 %vm334_vm0, %v316_v25  ;;  %v183_v35 = vadd.f32 %v1572_v6, %v112_v27  ;;  %v246_v36 = vmax.f32 %v182_v28, 0.0  ;;  %v113_v37 = vmul.f32 %v1565_v3, %v42_v23  ;;  %v114_v38 = vmul.f32 %v1565_v3, %v43_v24  ;;  %v80_v27 = vld [vmem:[%s2313_s0 + $0x1c0] sm:$0xff]  ;;  %v81_v28 = vld [vmem:[%s2313_s0 + $0x1c8] sm:$0xff] }
  0x22   :  { %v317_v40 = vpack.c.bf16 %v277_v31, %v276_v26  ;;  %v214_v41 = vadd.f32 %v1572_v6, %v143_v32  ;;  %v215_v42 = vadd.f32 %v1572_v6, %v144_v33  ;;  %v145_v43 = vmul.f32 %v1565_v3, %v74_v29  ;;  %v50_v33 = vld [vmem:[%s2313_s0 + $0xd0] sm:$0xff] }
  0x23   :  { %v247_v44 = vmax.f32 %v183_v35, 0.0  ;;  %v184_v45 = vadd.f32 %v1572_v6, %v113_v37  ;;  %v185_v46 = vadd.f32 %v1572_v6, %v114_v38  ;;  %v146_v47 = vmul.f32 %v1565_v3, %v75_v34  ;;  %v51_v34 = vld [vmem:[%s2313_s0 + $0xd8] sm:$0xff] }
  0x24   :  { %v278_v49 = vmax.f32 %v214_v41, 0.0  ;;  %v279_v50 = vmax.f32 %v215_v42, 0.0  ;;  %v216_v51 = vadd.f32 %v1572_v6, %v145_v43  ;;  %v115_v52 = vmul.f32 %v1565_v3, %v44_v39  ;;  %v82_v39 = vld [vmem:[%s2313_s0 + $0x1d0] sm:$0xff] }
  0x25   :  { %1464 = vmatmul.mubr.msk.bf16.gmra.mxu0 %vm334_vm0, %v301_v30  ;;  %v302_v55 = vpack.c.bf16 %v247_v44, %v246_v36  ;;  %v248_v56 = vmax.f32 %v184_v45, 0.0  ;;  %v249_v57 = vmax.f32 %v185_v46, 0.0  ;;  %v217_v58 = vadd.f32 %v1572_v6, %v146_v47  ;;  %v83_v44 = vld [vmem:[%s2313_s0 + $0x1d8] sm:$0xff] }
  0x26   :  { %v318_v61 = vpack.c.bf16 %v279_v50, %v278_v49  ;;  %v280_v62 = vmax.f32 %v216_v51, 0.0  ;;  %v116_v63 = vmul.f32 %v1565_v3, %v45_v48  ;;  %v186_v0 = vadd.f32 %v1572_v6, %v115_v52  ;;  %v52_v49 = vld [vmem:[%s2313_s0 + $0xe0] sm:$0xff] }
  0x27   :  { %1496 = vmatmul.mubr.msk.bf16.gmra.mxu1 %vm334_vm0, %v317_v40  ;;  %1467 = vmatprep.mubr.msk.bf16.mxu0 %vm334_vm0, %v302_v55  ;;  %v303_v2 = vpack.c.bf16 %v249_v57, %v248_v56  ;;  %v281_v4 = vmax.f32 %v217_v58, 0.0  ;;  %v147_v5 = vmul.f32 %v1565_v3, %v76_v53  ;;  %v148_v7 = vmul.f32 %v1565_v3, %v77_v54  ;;  %v53_v58 = vld [vmem:[%s2313_s0 + $0xe8] sm:$0xff] }
  0x28   :  { %1499 = vmatprep.mubr.msk.bf16.mxu1 %vm334_vm0, %v318_v61  ;;  %v187_v9 = vadd.f32 %v1572_v6, %v116_v63  ;;  %v250_v10 = vmax.f32 %v186_v0, 0.0  ;;  %v117_v11 = vmul.f32 %v1565_v3, %v46_v59  ;;  %v118_v12 = vmul.f32 %v1565_v3, %v47_v60  ;;  %v84_v63 = vld [vmem:[%s2313_s0 + $0x1e0] sm:$0xff]  ;;  %v85_v0 = vld [vmem:[%s2313_s0 + $0x1e8] sm:$0xff] }
  0x29   :  { %v319_v14 = vpack.c.bf16 %v281_v4, %v280_v62  ;;  %v218_v15 = vadd.f32 %v1572_v6, %v147_v5  ;;  %v219_v16 = vadd.f32 %v1572_v6, %v148_v7  ;;  %v149_v17 = vmul.f32 %v1565_v3, %v78_v1  ;;  %v54_v5 = vld [vmem:[%s2313_s0 + $0xf0] sm:$0xff]  ;;  %v55_v7 = vld [vmem:[%s2313_s0 + $0xf8] sm:$0xff] }
  0x2a   :  { %v251_v18 = vmax.f32 %v187_v9, 0.0  ;;  %v188_v19 = vadd.f32 %v1572_v6, %v117_v11  ;;  %v189_v20 = vadd.f32 %v1572_v6, %v118_v12  ;;  %v150_v21 = vmul.f32 %v1565_v3, %v79_v8  ;;  %v86_v12 = vld [vmem:[%s2313_s0 + $0x1f0] sm:$0xff] }
  0x2b   :  { %v282_v23 = vmax.f32 %v218_v15, 0.0  ;;  %v283_v24 = vmax.f32 %v219_v16, 0.0  ;;  %v220_v25 = vadd.f32 %v1572_v6, %v149_v17  ;;  %v119_v26 = vmul.f32 %v1565_v3, %v48_v13  ;;  %v87_v17 = vld [vmem:[%s2313_s0 + $0x1f8] sm:$0xff] }
  0x2c   :  { %v304_v29 = vpack.c.bf16 %v251_v18, %v250_v10  ;;  %v252_v30 = vmax.f32 %v188_v19, 0.0  ;;  %v253_v31 = vmax.f32 %v189_v20, 0.0  ;;  %v221_v32 = vadd.f32 %v1572_v6, %v150_v21 }
  0x2d   :  { %1468 = vmatmul.mubr.msk.bf16.gmra.mxu0 %vm334_vm0, %v303_v2  ;;  %v320_v35 = vpack.c.bf16 %v283_v24, %v282_v23  ;;  %v284_v36 = vmax.f32 %v220_v25, 0.0  ;;  %v120_v37 = vmul.f32 %v1565_v3, %v49_v22  ;;  %v190_v38 = vadd.f32 %v1572_v6, %v119_v26 }
  0x2e   :  { %1471 = vmatprep.mubr.msk.bf16.mxu0 %vm334_vm0, %v304_v29  ;;  %v305_v40 = vpack.c.bf16 %v253_v31, %v252_v30  ;;  %v285_v41 = vmax.f32 %v221_v32, 0.0  ;;  %v151_v42 = vmul.f32 %v1565_v3, %v80_v27  ;;  %v152_v43 = vmul.f32 %v1565_v3, %v81_v28 }
  0x2f   :  { %1500 = vmatmul.mubr.msk.bf16.gmra.mxu1 %vm334_vm0, %v319_v14  ;;  %v191_v45 = vadd.f32 %v1572_v6, %v120_v37  ;;  %v254_v46 = vmax.f32 %v190_v38, 0.0  ;;  %v121_v47 = vmul.f32 %v1565_v3, %v50_v33  ;;  %v122_v48 = vmul.f32 %v1565_v3, %v51_v34 }
  0x30   :  { %1503 = vmatprep.mubr.msk.bf16.mxu1 %vm334_vm0, %v320_v35  ;;  %v321_v50 = vpack.c.bf16 %v285_v41, %v284_v36  ;;  %v222_v51 = vadd.f32 %v1572_v6, %v151_v42  ;;  %v223_v52 = vadd.f32 %v1572_v6, %v152_v43  ;;  %v153_v53 = vmul.f32 %v1565_v3, %v82_v39  ;;  %v1926_v43 = vld [vmem:[%s2317_s5] ss:$0 sm:$0xff] }
  0x31   :  { %v255_v54 = vmax.f32 %v191_v45, 0.0  ;;  %v192_v55 = vadd.f32 %v1572_v6, %v121_v47  ;;  %v193_v56 = vadd.f32 %v1572_v6, %v122_v48  ;;  %v154_v57 = vmul.f32 %v1565_v3, %v83_v44 }
  0x32   :  { %v286_v59 = vmax.f32 %v222_v51, 0.0  ;;  %v287_v60 = vmax.f32 %v223_v52, 0.0  ;;  %v224_v61 = vadd.f32 %v1572_v6, %v153_v53  ;;  %v123_v62 = vmul.f32 %v1565_v3, %v52_v49 }
  0x33   :  { %v306_v1 = vpack.c.bf16 %v255_v54, %v254_v46  ;;  %v256_v2 = vmax.f32 %v192_v55, 0.0  ;;  %v225_v4 = vadd.f32 %v1572_v6, %v154_v57  ;;  %v257_v9 = vmax.f32 %v193_v56, 0.0 }
  0x34   :  { %v322_v8 = vpack.c.bf16 %v287_v60, %v286_v59  ;;  %v124_v10 = vmul.f32 %v1565_v3, %v53_v58  ;;  %v194_v11 = vadd.f32 %v1572_v6, %v123_v62  ;;  %v288_v13 = vmax.f32 %v224_v61, 0.0 }
  0x35   :  { %1472 = vmatmul.mubr.msk.bf16.gmra.mxu0 %vm334_vm0, %v305_v40  ;;  %v289_v14 = vmax.f32 %v225_v4, 0.0  ;;  %v155_v15 = vmul.f32 %v1565_v3, %v84_v63  ;;  %v156_v16 = vmul.f32 %v1565_v3, %v85_v0  ;;  %v125_v20 = vmul.f32 %v1565_v3, %v54_v5 }
  0x36   :  { %1475 = vmatprep.mubr.msk.bf16.mxu0 %vm334_vm0, %v306_v1  ;;  %v195_v18 = vadd.f32 %v1572_v6, %v124_v10  ;;  %v258_v19 = vmax.f32 %v194_v11, 0.0  ;;  %v126_v21 = vmul.f32 %v1565_v3, %v55_v7  ;;  %v157_v24 = vmul.f32 %v1565_v3, %v86_v12 }
  0x37   :  { %1504 = vmatmul.mubr.msk.bf16.gmra.mxu1 %vm334_vm0, %v321_v50  ;;  %v226_v22 = vadd.f32 %v1572_v6, %v155_v15  ;;  %v227_v23 = vadd.f32 %v1572_v6, %v156_v16  ;;  %v307_v25 = vpack.c.bf16 %v257_v9, %v256_v2  ;;  %v158_v27 = vmul.f32 %v1565_v3, %v87_v17 }
  0x38   :  { %1507 = vmatprep.mubr.msk.bf16.mxu1 %vm334_vm0, %v322_v8  ;;  %v259_v26 = vmax.f32 %v195_v18, 0.0  ;;  %v196_v30 = vadd.f32 %v1572_v6, %v125_v20  ;;  %v197_v31 = vadd.f32 %v1572_v6, %v126_v21  ;;  %v323_v32 = vpack.c.bf16 %v289_v14, %v288_v13 }
  0x39   :  { %v290_v28 = vmax.f32 %v226_v22, 0.0  ;;  %v291_v29 = vmax.f32 %v227_v23, 0.0  ;;  %v228_v34 = vadd.f32 %v1572_v6, %v157_v24  ;;  %v229_v35 = vadd.f32 %v1572_v6, %v158_v27  ;;  %v1921_v6 = vld [vmem:[%s2316_s4] ss:$0 sm:$0xff] }
  0x3a   :  { %v308_v33 = vpack.c.bf16 %v259_v26, %v258_v19  ;;  %v260_v37 = vmax.f32 %v196_v30, 0.0  ;;  %v261_v38 = vmax.f32 %v197_v31, 0.0 }
  0x3b   :  { %v324_v36 = vpack.c.bf16 %v291_v29, %v290_v28  ;;  %v292_v3 = vmax.f32 %v228_v34, 0.0  ;;  %v293_v39 = vmax.f32 %v229_v35, 0.0 }
  0x3c   :  { %v309_v40 = vpack.c.bf16 %v261_v38, %v260_v37 }
  0x3d   :  { %1476 = vmatmul.mubr.msk.bf16.gmra.mxu0 %vm334_vm0, %v307_v25  ;;  %v325_v41 = vpack.c.bf16 %v293_v39, %v292_v3 }
  0x3e   :  { %1479 = vmatprep.mubr.msk.bf16.mxu0 %vm334_vm0, %v308_v33 }
  0x3f   :  { %1508 = vmatmul.mubr.msk.bf16.gmra.mxu1 %vm334_vm0, %v323_v32 }
  0x40   :  { %1511 = vmatprep.mubr.msk.bf16.mxu1 %vm334_vm0, %v324_v36 }
  0x45   :  { %1480 = vmatmul.mubr.msk.bf16.gmra.mxu0 %vm334_vm0, %v309_v40 }
  0x47   :  { %1512 = vmatmul.mubr.msk.bf16.gmra.mxu1 %vm334_vm0, %v325_v41 }
  0xcd   :  { %v1453_v42 = vpop.f32.mrf.mxu0 }
  0xce   :  { %v729_v44 = vmul.f32 %v1453_v42, %v1921_v6 }
  0xcf   :  { %v1485_v45 = vpop.f32.mrf.mxu1  ;;  %v465_v47 = vpop.f32.mrf.mxu0 }
  0xd0   :  { %v761_v46 = vmul.f32 %v1485_v45, %v1921_v6  ;;  %v800_v48 = vadd.f32 %v1926_v43, %v729_v44  ;;  %v727_v49 = vmul.f32 %v1921_v6, %v465_v47 }
  0xd1   :  { %v593_v50 = vpop.f32.mrf.mxu1  ;;  %v1454_v53 = vpop.f32.mrf.mxu0 }
  0xd2   :  { %v832_v51 = vadd.f32 %v1926_v43, %v761_v46  ;;  %v759_v52 = vmul.f32 %v1921_v6, %v593_v50  ;;  %v864_v54 = vmax.f32 %v800_v48, 0.0  ;;  %v798_v55 = vadd.f32 %v1926_v43, %v727_v49 }
  0xd3   :  { %v730_v56 = vmul.f32 %v1454_v53, %v1921_v6  ;;  %v1486_v57 = vpop.f32.mrf.mxu1  ;;  %v468_v61 = vpop.f32.mrf.mxu0 }
  0xd4   :  { %v896_v58 = vmax.f32 %v832_v51, 0.0  ;;  %v830_v59 = vadd.f32 %v1926_v43, %v759_v52  ;;  %v762_v60 = vmul.f32 %v1486_v57, %v1921_v6  ;;  %v1354_v62 = vpack.c.bf16 %v864_v54, %v864_v54 }
  0xd5   :  { %v862_v63 = vmax.f32 %v798_v55, 0.0  ;;  %v801_v0 = vadd.f32 %v1926_v43, %v730_v56  ;;  %v728_v1 = vmul.f32 %v1921_v6, %v468_v61  ;;  %v596_v2 = vpop.f32.mrf.mxu1  ;;  %v1457_v9 = vpop.f32.mrf.mxu0 }
  0xd6   :  { %v1386_v4 = vpack.c.bf16 %v896_v58, %v896_v58  ;;  %v894_v5 = vmax.f32 %v830_v59, 0.0  ;;  %v833_v7 = vadd.f32 %v1926_v43, %v762_v60  ;;  %v760_v8 = vmul.f32 %v1921_v6, %v596_v2  ;;  %1185 = vst.msk [vmem:[%s2318_s6 + $0x8] sm:$0xf] %vm1182_vm1, %v1354_v62 }
  0xd7   :  { %v1352_v10 = vpack.c.bf16 %v862_v63, %v862_v63  ;;  %v865_v11 = vmax.f32 %v801_v0, 0.0  ;;  %v799_v12 = vadd.f32 %v1926_v43, %v728_v1  ;;  %v733_v13 = vmul.f32 %v1457_v9, %v1921_v6  ;;  %v1489_v14 = vpop.f32.mrf.mxu1  ;;  %v481_v19 = vpop.f32.mrf.mxu0 }
  0xd8   :  { %1217 = vst.msk [vmem:[%s2318_s6 + $0x88] sm:$0xf] %vm1182_vm1, %v1386_v4  ;;  %v1384_v15 = vpack.c.bf16 %v894_v5, %v894_v5  ;;  %v897_v16 = vmax.f32 %v833_v7, 0.0  ;;  %v831_v17 = vadd.f32 %v1926_v43, %v760_v8  ;;  %v765_v18 = vmul.f32 %v1489_v14, %v1921_v6 }
  0xd9   :  { %1183 = vst.msk [vmem:[%s2318_s6] sm:$0xf] %vm1182_vm1, %v1352_v10  ;;  %v1355_v20 = vpack.c.bf16 %v865_v11, %v865_v11  ;;  %v863_v21 = vmax.f32 %v799_v12, 0.0  ;;  %v804_v22 = vadd.f32 %v1926_v43, %v733_v13  ;;  %v731_v23 = vmul.f32 %v1921_v6, %v481_v19  ;;  %v609_v24 = vpop.f32.mrf.mxu1  ;;  %v1458_v29 = vpop.f32.mrf.mxu0 }
  0xda   :  { %1215 = vst.msk [vmem:[%s2318_s6 + $0x80] sm:$0xf] %vm1182_vm1, %v1384_v15  ;;  %v1387_v25 = vpack.c.bf16 %v897_v16, %v897_v16  ;;  %v895_v26 = vmax.f32 %v831_v17, 0.0  ;;  %v836_v27 = vadd.f32 %v1926_v43, %v765_v18  ;;  %v763_v28 = vmul.f32 %v1921_v6, %v609_v24 }
  0xdb   :  { %1186 = vst.msk [vmem:[%s2318_s6 + $0xc] sm:$0xf] %vm1182_vm1, %v1355_v20  ;;  %v1353_v30 = vpack.c.bf16 %v863_v21, %v863_v21  ;;  %v868_v31 = vmax.f32 %v804_v22, 0.0  ;;  %v802_v32 = vadd.f32 %v1926_v43, %v731_v23  ;;  %v734_v33 = vmul.f32 %v1458_v29, %v1921_v6  ;;  %v1490_v34 = vpop.f32.mrf.mxu1  ;;  %v484_v3 = vpop.f32.mrf.mxu0 }
  0xdc   :  { %1218 = vst.msk [vmem:[%s2318_s6 + $0x8c] sm:$0xf] %vm1182_vm1, %v1387_v25  ;;  %v1385_v35 = vpack.c.bf16 %v895_v26, %v895_v26  ;;  %v900_v36 = vmax.f32 %v836_v27, 0.0  ;;  %v834_v37 = vadd.f32 %v1926_v43, %v763_v28  ;;  %v766_v38 = vmul.f32 %v1490_v34, %v1921_v6 }
  0xdd   :  { %1184 = vst.msk [vmem:[%s2318_s6 + $0x4] sm:$0xf] %vm1182_vm1, %v1353_v30  ;;  %v1358_v39 = vpack.c.bf16 %v868_v31, %v868_v31  ;;  %v866_v40 = vmax.f32 %v802_v32, 0.0  ;;  %v805_v41 = vadd.f32 %v1926_v43, %v734_v33  ;;  %v732_v42 = vmul.f32 %v1921_v6, %v484_v3  ;;  %v612_v44 = vpop.f32.mrf.mxu1  ;;  %v1461_v49 = vpop.f32.mrf.mxu0 }
  0xde   :  { %1216 = vst.msk [vmem:[%s2318_s6 + $0x84] sm:$0xf] %vm1182_vm1, %v1385_v35  ;;  %v1390_v45 = vpack.c.bf16 %v900_v36, %v900_v36  ;;  %v898_v46 = vmax.f32 %v834_v37, 0.0  ;;  %v837_v47 = vadd.f32 %v1926_v43, %v766_v38  ;;  %v764_v48 = vmul.f32 %v1921_v6, %v612_v44 }
  0xdf   :  { %1189 = vst.msk [vmem:[%s2318_s6 + $0x18] sm:$0xf] %vm1182_vm1, %v1358_v39  ;;  %v1356_v50 = vpack.c.bf16 %v866_v40, %v866_v40  ;;  %v869_v51 = vmax.f32 %v805_v41, 0.0  ;;  %v803_v52 = vadd.f32 %v1926_v43, %v732_v42  ;;  %v737_v53 = vmul.f32 %v1461_v49, %v1921_v6  ;;  %v1493_v54 = vpop.f32.mrf.mxu1  ;;  %v497_v59 = vpop.f32.mrf.mxu0 }
  0xe0   :  { %1221 = vst.msk [vmem:[%s2318_s6 + $0x98] sm:$0xf] %vm1182_vm1, %v1390_v45  ;;  %v1388_v55 = vpack.c.bf16 %v898_v46, %v898_v46  ;;  %v901_v56 = vmax.f32 %v837_v47, 0.0  ;;  %v835_v57 = vadd.f32 %v1926_v43, %v764_v48  ;;  %v769_v58 = vmul.f32 %v1493_v54, %v1921_v6 }
  0xe1   :  { %1187 = vst.msk [vmem:[%s2318_s6 + $0x10] sm:$0xf] %vm1182_vm1, %v1356_v50  ;;  %v1359_v60 = vpack.c.bf16 %v869_v51, %v869_v51  ;;  %v867_v61 = vmax.f32 %v803_v52, 0.0  ;;  %v808_v62 = vadd.f32 %v1926_v43, %v737_v53  ;;  %v735_v63 = vmul.f32 %v1921_v6, %v497_v59  ;;  %v625_v0 = vpop.f32.mrf.mxu1  ;;  %v1462_v7 = vpop.f32.mrf.mxu0 }
  0xe2   :  { %1219 = vst.msk [vmem:[%s2318_s6 + $0x90] sm:$0xf] %vm1182_vm1, %v1388_v55  ;;  %v1391_v1 = vpack.c.bf16 %v901_v56, %v901_v56  ;;  %v899_v2 = vmax.f32 %v835_v57, 0.0  ;;  %v840_v4 = vadd.f32 %v1926_v43, %v769_v58  ;;  %v767_v5 = vmul.f32 %v1921_v6, %v625_v0 }
  0xe3   :  { %1190 = vst.msk [vmem:[%s2318_s6 + $0x1c] sm:$0xf] %vm1182_vm1, %v1359_v60  ;;  %v1357_v8 = vpack.c.bf16 %v867_v61, %v867_v61  ;;  %v872_v9 = vmax.f32 %v808_v62, 0.0  ;;  %v806_v10 = vadd.f32 %v1926_v43, %v735_v63  ;;  %v738_v11 = vmul.f32 %v1462_v7, %v1921_v6  ;;  %v1494_v12 = vpop.f32.mrf.mxu1  ;;  %v500_v17 = vpop.f32.mrf.mxu0 }
  0xe4   :  { %1222 = vst.msk [vmem:[%s2318_s6 + $0x9c] sm:$0xf] %vm1182_vm1, %v1391_v1  ;;  %v1389_v13 = vpack.c.bf16 %v899_v2, %v899_v2  ;;  %v904_v14 = vmax.f32 %v840_v4, 0.0  ;;  %v838_v15 = vadd.f32 %v1926_v43, %v767_v5  ;;  %v770_v16 = vmul.f32 %v1494_v12, %v1921_v6 }
  0xe5   :  { %1188 = vst.msk [vmem:[%s2318_s6 + $0x14] sm:$0xf] %vm1182_vm1, %v1357_v8  ;;  %v1362_v18 = vpack.c.bf16 %v872_v9, %v872_v9  ;;  %v870_v19 = vmax.f32 %v806_v10, 0.0  ;;  %v809_v20 = vadd.f32 %v1926_v43, %v738_v11  ;;  %v736_v21 = vmul.f32 %v1921_v6, %v500_v17  ;;  %v628_v22 = vpop.f32.mrf.mxu1  ;;  %v1465_v27 = vpop.f32.mrf.mxu0 }
  0xe6   :  { %1220 = vst.msk [vmem:[%s2318_s6 + $0x94] sm:$0xf] %vm1182_vm1, %v1389_v13  ;;  %v1394_v23 = vpack.c.bf16 %v904_v14, %v904_v14  ;;  %v902_v24 = vmax.f32 %v838_v15, 0.0  ;;  %v841_v25 = vadd.f32 %v1926_v43, %v770_v16  ;;  %v768_v26 = vmul.f32 %v1921_v6, %v628_v22 }
  0xe7   :  { %1193 = vst.msk [vmem:[%s2318_s6 + $0x28] sm:$0xf] %vm1182_vm1, %v1362_v18  ;;  %v1360_v28 = vpack.c.bf16 %v870_v19, %v870_v19  ;;  %v873_v29 = vmax.f32 %v809_v20, 0.0  ;;  %v807_v30 = vadd.f32 %v1926_v43, %v736_v21  ;;  %v741_v31 = vmul.f32 %v1465_v27, %v1921_v6  ;;  %v1497_v32 = vpop.f32.mrf.mxu1  ;;  %v513_v37 = vpop.f32.mrf.mxu0 }
  0xe8   :  { %1225 = vst.msk [vmem:[%s2318_s6 + $0xa8] sm:$0xf] %vm1182_vm1, %v1394_v23  ;;  %v1392_v33 = vpack.c.bf16 %v902_v24, %v902_v24  ;;  %v905_v34 = vmax.f32 %v841_v25, 0.0  ;;  %v839_v35 = vadd.f32 %v1926_v43, %v768_v26  ;;  %v773_v36 = vmul.f32 %v1497_v32, %v1921_v6 }
  0xe9   :  { %1191 = vst.msk [vmem:[%s2318_s6 + $0x20] sm:$0xf] %vm1182_vm1, %v1360_v28  ;;  %v1363_v38 = vpack.c.bf16 %v873_v29, %v873_v29  ;;  %v871_v3 = vmax.f32 %v807_v30, 0.0  ;;  %v812_v39 = vadd.f32 %v1926_v43, %v741_v31  ;;  %v739_v40 = vmul.f32 %v1921_v6, %v513_v37  ;;  %v641_v41 = vpop.f32.mrf.mxu1  ;;  %v1466_v47 = vpop.f32.mrf.mxu0 }
  0xea   :  { %1223 = vst.msk [vmem:[%s2318_s6 + $0xa0] sm:$0xf] %vm1182_vm1, %v1392_v33  ;;  %v1395_v42 = vpack.c.bf16 %v905_v34, %v905_v34  ;;  %v903_v44 = vmax.f32 %v839_v35, 0.0  ;;  %v844_v45 = vadd.f32 %v1926_v43, %v773_v36  ;;  %v771_v46 = vmul.f32 %v1921_v6, %v641_v41 }
  0xeb   :  { %1194 = vst.msk [vmem:[%s2318_s6 + $0x2c] sm:$0xf] %vm1182_vm1, %v1363_v38  ;;  %v1361_v48 = vpack.c.bf16 %v871_v3, %v871_v3  ;;  %v876_v49 = vmax.f32 %v812_v39, 0.0  ;;  %v810_v50 = vadd.f32 %v1926_v43, %v739_v40  ;;  %v742_v51 = vmul.f32 %v1466_v47, %v1921_v6  ;;  %v1498_v52 = vpop.f32.mrf.mxu1  ;;  %v516_v57 = vpop.f32.mrf.mxu0 }
  0xec   :  { %1226 = vst.msk [vmem:[%s2318_s6 + $0xac] sm:$0xf] %vm1182_vm1, %v1395_v42  ;;  %v1393_v53 = vpack.c.bf16 %v903_v44, %v903_v44  ;;  %v908_v54 = vmax.f32 %v844_v45, 0.0  ;;  %v842_v55 = vadd.f32 %v1926_v43, %v771_v46  ;;  %v774_v56 = vmul.f32 %v1498_v52, %v1921_v6 }
  0xed   :  { %1192 = vst.msk [vmem:[%s2318_s6 + $0x24] sm:$0xf] %vm1182_vm1, %v1361_v48  ;;  %v1366_v58 = vpack.c.bf16 %v876_v49, %v876_v49  ;;  %v874_v59 = vmax.f32 %v810_v50, 0.0  ;;  %v813_v60 = vadd.f32 %v1926_v43, %v742_v51  ;;  %v740_v61 = vmul.f32 %v1921_v6, %v516_v57  ;;  %v644_v62 = vpop.f32.mrf.mxu1  ;;  %v1469_v4 = vpop.f32.mrf.mxu0 }
  0xee   :  { %1224 = vst.msk [vmem:[%s2318_s6 + $0xa4] sm:$0xf] %vm1182_vm1, %v1393_v53  ;;  %v1398_v63 = vpack.c.bf16 %v908_v54, %v908_v54  ;;  %v906_v0 = vmax.f32 %v842_v55, 0.0  ;;  %v845_v1 = vadd.f32 %v1926_v43, %v774_v56  ;;  %v772_v2 = vmul.f32 %v1921_v6, %v644_v62 }
  0xef   :  { %1197 = vst.msk [vmem:[%s2318_s6 + $0x38] sm:$0xf] %vm1182_vm1, %v1366_v58  ;;  %v1364_v5 = vpack.c.bf16 %v874_v59, %v874_v59  ;;  %v877_v7 = vmax.f32 %v813_v60, 0.0  ;;  %v811_v8 = vadd.f32 %v1926_v43, %v740_v61  ;;  %v745_v9 = vmul.f32 %v1469_v4, %v1921_v6  ;;  %v1501_v10 = vpop.f32.mrf.mxu1  ;;  %v529_v15 = vpop.f32.mrf.mxu0 }
  0xf0   :  { %1229 = vst.msk [vmem:[%s2318_s6 + $0xb8] sm:$0xf] %vm1182_vm1, %v1398_v63  ;;  %v1396_v11 = vpack.c.bf16 %v906_v0, %v906_v0  ;;  %v909_v12 = vmax.f32 %v845_v1, 0.0  ;;  %v843_v13 = vadd.f32 %v1926_v43, %v772_v2  ;;  %v777_v14 = vmul.f32 %v1501_v10, %v1921_v6 }
  0xf1   :  { %1195 = vst.msk [vmem:[%s2318_s6 + $0x30] sm:$0xf] %vm1182_vm1, %v1364_v5  ;;  %v1367_v16 = vpack.c.bf16 %v877_v7, %v877_v7  ;;  %v875_v17 = vmax.f32 %v811_v8, 0.0  ;;  %v816_v18 = vadd.f32 %v1926_v43, %v745_v9  ;;  %v743_v19 = vmul.f32 %v1921_v6, %v529_v15  ;;  %v657_v20 = vpop.f32.mrf.mxu1  ;;  %v1470_v25 = vpop.f32.mrf.mxu0 }
  0xf2   :  { %1227 = vst.msk [vmem:[%s2318_s6 + $0xb0] sm:$0xf] %vm1182_vm1, %v1396_v11  ;;  %v1399_v21 = vpack.c.bf16 %v909_v12, %v909_v12  ;;  %v907_v22 = vmax.f32 %v843_v13, 0.0  ;;  %v848_v23 = vadd.f32 %v1926_v43, %v777_v14  ;;  %v775_v24 = vmul.f32 %v1921_v6, %v657_v20 }
  0xf3   :  { %1198 = vst.msk [vmem:[%s2318_s6 + $0x3c] sm:$0xf] %vm1182_vm1, %v1367_v16  ;;  %v1365_v26 = vpack.c.bf16 %v875_v17, %v875_v17  ;;  %v880_v27 = vmax.f32 %v816_v18, 0.0  ;;  %v814_v28 = vadd.f32 %v1926_v43, %v743_v19  ;;  %v746_v29 = vmul.f32 %v1470_v25, %v1921_v6  ;;  %v1502_v30 = vpop.f32.mrf.mxu1  ;;  %v532_v35 = vpop.f32.mrf.mxu0 }
  0xf4   :  { %1230 = vst.msk [vmem:[%s2318_s6 + $0xbc] sm:$0xf] %vm1182_vm1, %v1399_v21  ;;  %v1397_v31 = vpack.c.bf16 %v907_v22, %v907_v22  ;;  %v912_v32 = vmax.f32 %v848_v23, 0.0  ;;  %v846_v33 = vadd.f32 %v1926_v43, %v775_v24  ;;  %v778_v34 = vmul.f32 %v1502_v30, %v1921_v6 }
  0xf5   :  { %1196 = vst.msk [vmem:[%s2318_s6 + $0x34] sm:$0xf] %vm1182_vm1, %v1365_v26  ;;  %v1370_v36 = vpack.c.bf16 %v880_v27, %v880_v27  ;;  %v878_v37 = vmax.f32 %v814_v28, 0.0  ;;  %v817_v38 = vadd.f32 %v1926_v43, %v746_v29  ;;  %v744_v3 = vmul.f32 %v1921_v6, %v532_v35  ;;  %v660_v39 = vpop.f32.mrf.mxu1  ;;  %v1473_v45 = vpop.f32.mrf.mxu0 }
  0xf6   :  { %1228 = vst.msk [vmem:[%s2318_s6 + $0xb4] sm:$0xf] %vm1182_vm1, %v1397_v31  ;;  %v1402_v40 = vpack.c.bf16 %v912_v32, %v912_v32  ;;  %v910_v41 = vmax.f32 %v846_v33, 0.0  ;;  %v849_v42 = vadd.f32 %v1926_v43, %v778_v34  ;;  %v776_v44 = vmul.f32 %v1921_v6, %v660_v39 }
  0xf7   :  { %1201 = vst.msk [vmem:[%s2318_s6 + $0x48] sm:$0xf] %vm1182_vm1, %v1370_v36  ;;  %v1368_v46 = vpack.c.bf16 %v878_v37, %v878_v37  ;;  %v881_v47 = vmax.f32 %v817_v38, 0.0  ;;  %v815_v48 = vadd.f32 %v1926_v43, %v744_v3  ;;  %v749_v49 = vmul.f32 %v1473_v45, %v1921_v6  ;;  %v1505_v50 = vpop.f32.mrf.mxu1  ;;  %v545_v55 = vpop.f32.mrf.mxu0 }
  0xf8   :  { %1233 = vst.msk [vmem:[%s2318_s6 + $0xc8] sm:$0xf] %vm1182_vm1, %v1402_v40  ;;  %v1400_v51 = vpack.c.bf16 %v910_v41, %v910_v41  ;;  %v913_v52 = vmax.f32 %v849_v42, 0.0  ;;  %v847_v53 = vadd.f32 %v1926_v43, %v776_v44  ;;  %v781_v54 = vmul.f32 %v1505_v50, %v1921_v6 }
  0xf9   :  { %1199 = vst.msk [vmem:[%s2318_s6 + $0x40] sm:$0xf] %vm1182_vm1, %v1368_v46  ;;  %v1371_v56 = vpack.c.bf16 %v881_v47, %v881_v47  ;;  %v879_v57 = vmax.f32 %v815_v48, 0.0  ;;  %v820_v58 = vadd.f32 %v1926_v43, %v749_v49  ;;  %v747_v59 = vmul.f32 %v1921_v6, %v545_v55  ;;  %v673_v60 = vpop.f32.mrf.mxu1  ;;  %v1474_v1 = vpop.f32.mrf.mxu0 }
  0xfa   :  { %1231 = vst.msk [vmem:[%s2318_s6 + $0xc0] sm:$0xf] %vm1182_vm1, %v1400_v51  ;;  %v1403_v61 = vpack.c.bf16 %v913_v52, %v913_v52  ;;  %v911_v62 = vmax.f32 %v847_v53, 0.0  ;;  %v852_v63 = vadd.f32 %v1926_v43, %v781_v54  ;;  %v779_v0 = vmul.f32 %v1921_v6, %v673_v60 }
  0xfb   :  { %1202 = vst.msk [vmem:[%s2318_s6 + $0x4c] sm:$0xf] %vm1182_vm1, %v1371_v56  ;;  %v1369_v2 = vpack.c.bf16 %v879_v57, %v879_v57  ;;  %v884_v4 = vmax.f32 %v820_v58, 0.0  ;;  %v818_v5 = vadd.f32 %v1926_v43, %v747_v59  ;;  %v750_v7 = vmul.f32 %v1474_v1, %v1921_v6  ;;  %v1506_v8 = vpop.f32.mrf.mxu1  ;;  %v548_v13 = vpop.f32.mrf.mxu0 }
  0xfc   :  { %1234 = vst.msk [vmem:[%s2318_s6 + $0xcc] sm:$0xf] %vm1182_vm1, %v1403_v61  ;;  %v1401_v9 = vpack.c.bf16 %v911_v62, %v911_v62  ;;  %v916_v10 = vmax.f32 %v852_v63, 0.0  ;;  %v850_v11 = vadd.f32 %v1926_v43, %v779_v0  ;;  %v782_v12 = vmul.f32 %v1506_v8, %v1921_v6 }
  0xfd   :  { %1200 = vst.msk [vmem:[%s2318_s6 + $0x44] sm:$0xf] %vm1182_vm1, %v1369_v2  ;;  %v1374_v14 = vpack.c.bf16 %v884_v4, %v884_v4  ;;  %v882_v15 = vmax.f32 %v818_v5, 0.0  ;;  %v821_v16 = vadd.f32 %v1926_v43, %v750_v7  ;;  %v748_v17 = vmul.f32 %v1921_v6, %v548_v13  ;;  %v676_v18 = vpop.f32.mrf.mxu1  ;;  %v1477_v23 = vpop.f32.mrf.mxu0 }
  0xfe   :  { %1232 = vst.msk [vmem:[%s2318_s6 + $0xc4] sm:$0xf] %vm1182_vm1, %v1401_v9  ;;  %v1406_v19 = vpack.c.bf16 %v916_v10, %v916_v10  ;;  %v914_v20 = vmax.f32 %v850_v11, 0.0  ;;  %v853_v21 = vadd.f32 %v1926_v43, %v782_v12  ;;  %v780_v22 = vmul.f32 %v1921_v6, %v676_v18 }
  0xff   :  { %1205 = vst.msk [vmem:[%s2318_s6 + $0x58] sm:$0xf] %vm1182_vm1, %v1374_v14  ;;  %v1372_v24 = vpack.c.bf16 %v882_v15, %v882_v15  ;;  %v885_v25 = vmax.f32 %v821_v16, 0.0  ;;  %v819_v26 = vadd.f32 %v1926_v43, %v748_v17  ;;  %v753_v27 = vmul.f32 %v1477_v23, %v1921_v6  ;;  %v1509_v28 = vpop.f32.mrf.mxu1  ;;  %v561_v33 = vpop.f32.mrf.mxu0 }
 0x100   :  { %1237 = vst.msk [vmem:[%s2318_s6 + $0xd8] sm:$0xf] %vm1182_vm1, %v1406_v19  ;;  %v1404_v29 = vpack.c.bf16 %v914_v20, %v914_v20  ;;  %v917_v30 = vmax.f32 %v853_v21, 0.0  ;;  %v851_v31 = vadd.f32 %v1926_v43, %v780_v22  ;;  %v785_v32 = vmul.f32 %v1509_v28, %v1921_v6 }
 0x101   :  { %1203 = vst.msk [vmem:[%s2318_s6 + $0x50] sm:$0xf] %vm1182_vm1, %v1372_v24  ;;  %v1375_v34 = vpack.c.bf16 %v885_v25, %v885_v25  ;;  %v883_v35 = vmax.f32 %v819_v26, 0.0  ;;  %v824_v36 = vadd.f32 %v1926_v43, %v753_v27  ;;  %v751_v37 = vmul.f32 %v1921_v6, %v561_v33  ;;  %v689_v38 = vpop.f32.mrf.mxu1  ;;  %v1478_v42 = vpop.f32.mrf.mxu0 }
 0x102   :  { %1235 = vst.msk [vmem:[%s2318_s6 + $0xd0] sm:$0xf] %vm1182_vm1, %v1404_v29  ;;  %v1407_v3 = vpack.c.bf16 %v917_v30, %v917_v30  ;;  %v915_v39 = vmax.f32 %v851_v31, 0.0  ;;  %v856_v40 = vadd.f32 %v1926_v43, %v785_v32  ;;  %v783_v41 = vmul.f32 %v1921_v6, %v689_v38 }
 0x103   :  { %1206 = vst.msk [vmem:[%s2318_s6 + $0x5c] sm:$0xf] %vm1182_vm1, %v1375_v34  ;;  %v1373_v44 = vpack.c.bf16 %v883_v35, %v883_v35  ;;  %v888_v45 = vmax.f32 %v824_v36, 0.0  ;;  %v822_v46 = vadd.f32 %v1926_v43, %v751_v37  ;;  %v754_v47 = vmul.f32 %v1478_v42, %v1921_v6  ;;  %v1510_v48 = vpop.f32.mrf.mxu1  ;;  %v564_v53 = vpop.f32.mrf.mxu0 }
 0x104   :  { %1238 = vst.msk [vmem:[%s2318_s6 + $0xdc] sm:$0xf] %vm1182_vm1, %v1407_v3  ;;  %v1405_v49 = vpack.c.bf16 %v915_v39, %v915_v39  ;;  %v920_v50 = vmax.f32 %v856_v40, 0.0  ;;  %v854_v51 = vadd.f32 %v1926_v43, %v783_v41  ;;  %v786_v52 = vmul.f32 %v1510_v48, %v1921_v6 }
 0x105   :  { %1204 = vst.msk [vmem:[%s2318_s6 + $0x54] sm:$0xf] %vm1182_vm1, %v1373_v44  ;;  %v1378_v54 = vpack.c.bf16 %v888_v45, %v888_v45  ;;  %v886_v55 = vmax.f32 %v822_v46, 0.0  ;;  %v825_v56 = vadd.f32 %v1926_v43, %v754_v47  ;;  %v752_v57 = vmul.f32 %v1921_v6, %v564_v53  ;;  %v692_v58 = vpop.f32.mrf.mxu1  ;;  %v1481_v63 = vpop.f32.mrf.mxu0 }
 0x106   :  { %1236 = vst.msk [vmem:[%s2318_s6 + $0xd4] sm:$0xf] %vm1182_vm1, %v1405_v49  ;;  %v1410_v59 = vpack.c.bf16 %v920_v50, %v920_v50  ;;  %v918_v60 = vmax.f32 %v854_v51, 0.0  ;;  %v857_v61 = vadd.f32 %v1926_v43, %v786_v52  ;;  %v784_v62 = vmul.f32 %v1921_v6, %v692_v58 }
 0x107   :  { %1209 = vst.msk [vmem:[%s2318_s6 + $0x68] sm:$0xf] %vm1182_vm1, %v1378_v54  ;;  %v1376_v0 = vpack.c.bf16 %v886_v55, %v886_v55  ;;  %v889_v1 = vmax.f32 %v825_v56, 0.0  ;;  %v823_v2 = vadd.f32 %v1926_v43, %v752_v57  ;;  %v757_v4 = vmul.f32 %v1481_v63, %v1921_v6  ;;  %v1513_v5 = vpop.f32.mrf.mxu1  ;;  %v577_v11 = vpop.f32.mrf.mxu0 }
 0x108   :  { %1241 = vst.msk [vmem:[%s2318_s6 + $0xe8] sm:$0xf] %vm1182_vm1, %v1410_v59  ;;  %v1408_v7 = vpack.c.bf16 %v918_v60, %v918_v60  ;;  %v921_v8 = vmax.f32 %v857_v61, 0.0  ;;  %v855_v9 = vadd.f32 %v1926_v43, %v784_v62  ;;  %v789_v10 = vmul.f32 %v1513_v5, %v1921_v6 }
 0x109   :  { %1207 = vst.msk [vmem:[%s2318_s6 + $0x60] sm:$0xf] %vm1182_vm1, %v1376_v0  ;;  %v1379_v12 = vpack.c.bf16 %v889_v1, %v889_v1  ;;  %v887_v13 = vmax.f32 %v823_v2, 0.0  ;;  %v828_v14 = vadd.f32 %v1926_v43, %v757_v4  ;;  %v755_v15 = vmul.f32 %v1921_v6, %v577_v11  ;;  %v705_v16 = vpop.f32.mrf.mxu1  ;;  %v1482_v21 = vpop.f32.mrf.mxu0 }
 0x10a   :  { %1239 = vst.msk [vmem:[%s2318_s6 + $0xe0] sm:$0xf] %vm1182_vm1, %v1408_v7  ;;  %v1411_v17 = vpack.c.bf16 %v921_v8, %v921_v8  ;;  %v919_v18 = vmax.f32 %v855_v9, 0.0  ;;  %v860_v19 = vadd.f32 %v1926_v43, %v789_v10  ;;  %v787_v20 = vmul.f32 %v1921_v6, %v705_v16 }
 0x10b   :  { %1210 = vst.msk [vmem:[%s2318_s6 + $0x6c] sm:$0xf] %vm1182_vm1, %v1379_v12  ;;  %v1377_v22 = vpack.c.bf16 %v887_v13, %v887_v13  ;;  %v892_v23 = vmax.f32 %v828_v14, 0.0  ;;  %v826_v24 = vadd.f32 %v1926_v43, %v755_v15  ;;  %v758_v25 = vmul.f32 %v1482_v21, %v1921_v6  ;;  %v1514_v26 = vpop.f32.mrf.mxu1  ;;  %v580_v31 = vpop.f32.mrf.mxu0 }
 0x10c   :  { %1242 = vst.msk [vmem:[%s2318_s6 + $0xec] sm:$0xf] %vm1182_vm1, %v1411_v17  ;;  %v1409_v27 = vpack.c.bf16 %v919_v18, %v919_v18  ;;  %v924_v28 = vmax.f32 %v860_v19, 0.0  ;;  %v858_v29 = vadd.f32 %v1926_v43, %v787_v20  ;;  %v790_v30 = vmul.f32 %v1514_v26, %v1921_v6 }
 0x10d   :  { %1208 = vst.msk [vmem:[%s2318_s6 + $0x64] sm:$0xf] %vm1182_vm1, %v1377_v22  ;;  %v1382_v32 = vpack.c.bf16 %v892_v23, %v892_v23  ;;  %v890_v33 = vmax.f32 %v826_v24, 0.0  ;;  %v829_v34 = vadd.f32 %v1926_v43, %v758_v25  ;;  %v756_v35 = vmul.f32 %v1921_v6, %v580_v31  ;;  %v708_v36 = vpop.f32.mrf.mxu1 }
 0x10e   :  { %1240 = vst.msk [vmem:[%s2318_s6 + $0xe4] sm:$0xf] %vm1182_vm1, %v1409_v27  ;;  %v1414_v37 = vpack.c.bf16 %v924_v28, %v924_v28  ;;  %v922_v38 = vmax.f32 %v858_v29, 0.0  ;;  %v861_v3 = vadd.f32 %v1926_v43, %v790_v30  ;;  %v788_v39 = vmul.f32 %v1921_v6, %v708_v36 }
 0x10f   :  { %1213 = vst.msk [vmem:[%s2318_s6 + $0x78] sm:$0xf] %vm1182_vm1, %v1382_v32  ;;  %v1380_v40 = vpack.c.bf16 %v890_v33, %v890_v33  ;;  %v893_v41 = vmax.f32 %v829_v34, 0.0  ;;  %v827_v42 = vadd.f32 %v1926_v43, %v756_v35 }
 0x110   :  { %1245 = vst.msk [vmem:[%s2318_s6 + $0xf8] sm:$0xf] %vm1182_vm1, %v1414_v37  ;;  %v1412_v44 = vpack.c.bf16 %v922_v38, %v922_v38  ;;  %v925_v45 = vmax.f32 %v861_v3, 0.0  ;;  %v859_v46 = vadd.f32 %v1926_v43, %v788_v39 }
 0x111   :  { %1211 = vst.msk [vmem:[%s2318_s6 + $0x70] sm:$0xf] %vm1182_vm1, %v1380_v40  ;;  %v1383_v6 = vpack.c.bf16 %v893_v41, %v893_v41  ;;  %v891_v47 = vmax.f32 %v827_v42, 0.0 }
 0x112   :  { %1243 = vst.msk [vmem:[%s2318_s6 + $0xf0] sm:$0xf] %vm1182_vm1, %v1412_v44  ;;  %v1415_v48 = vpack.c.bf16 %v925_v45, %v925_v45  ;;  %v923_v49 = vmax.f32 %v859_v46, 0.0 }
 0x113   :  { %1214 = vst.msk [vmem:[%s2318_s6 + $0x7c] sm:$0xf] %vm1182_vm1, %v1383_v6  ;;  %v1381_v43 = vpack.c.bf16 %v891_v47, %v891_v47 }
 0x114   :  { %1246 = vst.msk [vmem:[%s2318_s6 + $0xfc] sm:$0xf] %vm1182_vm1, %v1415_v48  ;;  %v1413_v50 = vpack.c.bf16 %v923_v49, %v923_v49 }
 0x115   :  { %1212 = vst.msk [vmem:[%s2318_s6 + $0x74] sm:$0xf] %vm1182_vm1, %v1381_v43 }
 0x116   :  { %1244 = vst.msk [vmem:[%s2318_s6 + $0xf4] sm:$0xf] %vm1182_vm1, %v1413_v50 }

// kernel: preact_bottleneck_forward.7
= control target key start
LH: loop header
LB: loop body
LE: loop exit
PB: predicated region body
PF: predicated region fallthrough
CT: control target
= control target key end

     0   :  { %vm402_vm0 = vcmask 1043456   ;;  %vm305_vm1 = vcmask 64512   ;;  %s1413_s0 = inlined_call_operand.vmem [shape: bf16[512,8], index: 0, kind: input, shape index: {}]   ;;  %s1414_s1 = inlined_call_operand.vmem [shape: bf16[8,32], index: 1, kind: input, shape index: {}]   ;;  %s1415_s2 = inlined_call_operand.vmem [shape: f32[512,32], index: 2, kind: input, shape index: {}]   ;;  %s1416_s3 = inlined_call_operand.hbm [shape: f32[512,32], index: 3, kind: output, shape index: {}]  }
   0x1   :  { %v80_v0 = vld [vmem:[%s1414_s1] sm:$0xf]  ;;  %v948_v4 = vld [vmem:[%s1413_s0 + $0x8] sm:$0xff]   ;;  %v950_v6 = vld [vmem:[%s1413_s0 + $0x10] sm:$0xff]  }
   0x2   :  { %v946_v1 = vld [vmem:[%s1413_s0] sm:$0xff]   ;;  %941 = vmatprep.subr.msk.bf16.mxu0 %vm402_vm0, %v80_v0  ;;  %942 = vmatprep.subr.msk.bf16.mxu1 %vm402_vm0, %v80_v0  ;;  %v404_v2 = vsel %vm402_vm0, %v80_v0, 0  ;;  %v949_v5 = vld [vmem:[%s1413_s0 + $0x88] sm:$0xff]   ;;  %v951_v7 = vld [vmem:[%s1413_s0 + $0x90] sm:$0xff]  }
   0x3   :  { %874 = vmatpush3.bf16.msra.mxu0 %v404_v2  ;;  %940 = vmatpush3.bf16.msra.mxu1 %v404_v2  ;;  %v947_v3 = vld [vmem:[%s1413_s0 + $0x80] sm:$0xff]   ;;  %v952_v8 = vld [vmem:[%s1413_s0 + $0x18] sm:$0xff]   ;;  %v956_v12 = vld [vmem:[%s1413_s0 + $0x28] sm:$0xff]  }
   0x4   :  { %875 = vmatprep.mubr.msk.bf16.mxu0 %vm305_vm1, %v946_v1  ;;  %907 = vmatprep.mubr.msk.bf16.mxu1 %vm305_vm1, %v947_v3  ;;  %v953_v9 = vld [vmem:[%s1413_s0 + $0x98] sm:$0xff]   ;;  %v954_v10 = vld [vmem:[%s1413_s0 + $0x20] sm:$0xff]   ;;  %v957_v13 = vld [vmem:[%s1413_s0 + $0xa8] sm:$0xff]  }
   0x5   :  { %v955_v11 = vld [vmem:[%s1413_s0 + $0xa0] sm:$0xff]   ;;  %v958_v14 = vld [vmem:[%s1413_s0 + $0x30] sm:$0xff]   ;;  %v960_v16 = vld [vmem:[%s1413_s0 + $0x38] sm:$0xff]  }
   0x6   :  { %876 = vmatmul.mubr.msk.bf16.vlgmr.msra.gmra.mxu0 %vm305_vm1, %v948_v4  ;;  %908 = vmatmul.mubr.msk.bf16.vlgmr.msra.gmra.mxu1 %vm305_vm1, %v949_v5  ;;  %v959_v15 = vld [vmem:[%s1413_s0 + $0xb0] sm:$0xff]   ;;  %v961_v17 = vld [vmem:[%s1413_s0 + $0xb8] sm:$0xff]   ;;  %v962_v18 = vld [vmem:[%s1413_s0 + $0x40] sm:$0xff]  }
   0x7   :  { %879 = vmatprep.mubr.msk.bf16.mxu0 %vm305_vm1, %v950_v6  ;;  %911 = vmatprep.mubr.msk.bf16.mxu1 %vm305_vm1, %v951_v7  ;;  %v963_v19 = vld [vmem:[%s1413_s0 + $0xc0] sm:$0xff]   ;;  %v964_v20 = vld [vmem:[%s1413_s0 + $0x48] sm:$0xff]  }
   0xe   :  { %880 = vmatmul.mubr.msk.bf16.gmra.mxu0 %vm305_vm1, %v952_v8  ;;  %912 = vmatmul.mubr.msk.bf16.gmra.mxu1 %vm305_vm1, %v953_v9 }
   0xf   :  { %883 = vmatprep.mubr.msk.bf16.mxu0 %vm305_vm1, %v954_v10  ;;  %915 = vmatprep.mubr.msk.bf16.mxu1 %vm305_vm1, %v955_v11 }
  0x16   :  { %884 = vmatmul.mubr.msk.bf16.gmra.mxu0 %vm305_vm1, %v956_v12  ;;  %916 = vmatmul.mubr.msk.bf16.gmra.mxu1 %vm305_vm1, %v957_v13 }
  0x17   :  { %887 = vmatprep.mubr.msk.bf16.mxu0 %vm305_vm1, %v958_v14  ;;  %919 = vmatprep.mubr.msk.bf16.mxu1 %vm305_vm1, %v959_v15 }
  0x1e   :  { %888 = vmatmul.mubr.msk.bf16.gmra.mxu0 %vm305_vm1, %v960_v16  ;;  %920 = vmatmul.mubr.msk.bf16.gmra.mxu1 %vm305_vm1, %v961_v17 }
  0x1f   :  { %891 = vmatprep.mubr.msk.bf16.mxu0 %vm305_vm1, %v962_v18  ;;  %923 = vmatprep.mubr.msk.bf16.mxu1 %vm305_vm1, %v963_v19 }
  0x20   :  { %8 = vsyncpa [#allocation3], 0  ;;  %v965_v21 = vld [vmem:[%s1413_s0 + $0xc8] sm:$0xff]   ;;  %v966_v22 = vld [vmem:[%s1413_s0 + $0x50] sm:$0xff]   ;;  %vm695_vm2 = vcmask 261120   ;;  %s1000_s30 = smov [#allocation2]  }
  0x21   :  { %v967_v23 = vld [vmem:[%s1413_s0 + $0xd0] sm:$0xff]   ;;  %v968_v24 = vld [vmem:[%s1413_s0 + $0x58] sm:$0xff]   ;;  %v970_v26 = vld [vmem:[%s1413_s0 + $0x60] sm:$0xff]   ;;  %s765_s4 = sshll.u32 %s1000_s30, 4  ;;  %s766_s4 = int_to_ptr.vmem [resolvable:$true] %s765_s4 }
  0x22   :  { %v969_v25 = vld [vmem:[%s1413_s0 + $0xd8] sm:$0xff]   ;;  %v971_v27 = vld [vmem:[%s1413_s0 + $0xe0] sm:$0xff]   ;;  %v972_v28 = vld [vmem:[%s1413_s0 + $0x68] sm:$0xff]   ;;  %s978_s7 = scalar_lea.vmem %s766_s4, 8192  ;;  %p983_p1 = scmp.lt.s32.totalorder %s766_s4, %s766_s4 }
  0x23   :  { %v973_v29 = vld [vmem:[%s1413_s0 + $0xe8] sm:$0xff]   ;;  %v974_v30 = vld [vmem:[%s1413_s0 + $0x70] sm:$0xff]   ;;  %v976_v32 = vld [vmem:[%s1413_s0 + $0x78] sm:$0xff]   ;;  %p979_p0 = scmp.ne.s32.totalorder %s766_s4, %s978_s7  ;;  %p984_p2 = scmp.lt.s32.totalorder %s978_s7, %s978_s7 }
  0x24   :  { %v975_v31 = vld [vmem:[%s1413_s0 + $0xf0] sm:$0xff]   ;;  %v977_v33 = vld [vmem:[%s1413_s0 + $0xf8] sm:$0xff]   ;;  %v81_v37 = vld [vmem:[%s1415_s2] sm:$0xff] }
  0x25   :  { %v83_v34 = vld [vmem:[%s1415_s2 + $0x10] sm:$0xff]  ;;  %v113_v40 = vld [vmem:[%s1415_s2 + $0x100] sm:$0xff]  ;;  %v84_v43 = vld [vmem:[%s1415_s2 + $0x18] sm:$0xff]  ;;  %p985_p3 = por %p984_p2, %p983_p1 }
  0x26   :  { %892 = vmatmul.mubr.msk.bf16.gmra.mxu0 %vm305_vm1, %v964_v20  ;;  %924 = vmatmul.mubr.msk.bf16.gmra.mxu1 %vm305_vm1, %v965_v21  ;;  %v115_v35 = vld [vmem:[%s1415_s2 + $0x110] sm:$0xff]  ;;  %v116_v46 = vld [vmem:[%s1415_s2 + $0x118] sm:$0xff]  ;;  %v82_v49 = vld [vmem:[%s1415_s2 + $0x8] sm:$0xff] }
  0x27   :  { %895 = vmatprep.mubr.msk.bf16.mxu0 %vm305_vm1, %v966_v22  ;;  %927 = vmatprep.mubr.msk.bf16.mxu1 %vm305_vm1, %v967_v23  ;;  %v114_v52 = vld [vmem:[%s1415_s2 + $0x108] sm:$0xff]  ;;  %v87_v55 = vld [vmem:[%s1415_s2 + $0x30] sm:$0xff]  ;;  %v85_v61 = vld [vmem:[%s1415_s2 + $0x20] sm:$0xff]  ;;  %p986_p4 = pnand %p985_p3, %p979_p0 }
  0x28   :  { %v119_v58 = vld [vmem:[%s1415_s2 + $0x130] sm:$0xff]  ;;  %v117_v0 = vld [vmem:[%s1415_s2 + $0x120] sm:$0xff]  ;;  %v88_v3 = vld [vmem:[%s1415_s2 + $0x38] sm:$0xff] }
  0x29   :  { %v120_v6 = vld [vmem:[%s1415_s2 + $0x138] sm:$0xff]  ;;  %v86_v9 = vld [vmem:[%s1415_s2 + $0x28] sm:$0xff]  ;;  %v91_v15 = vld [vmem:[%s1415_s2 + $0x50] sm:$0xff] }
  0x2a   :  { %v118_v12 = vld [vmem:[%s1415_s2 + $0x128] sm:$0xff]  ;;  %v123_v18 = vld [vmem:[%s1415_s2 + $0x150] sm:$0xff]  ;;  %v89_v21 = vld [vmem:[%s1415_s2 + $0x40] sm:$0xff] }
  0x2e   :  { %896 = vmatmul.mubr.msk.bf16.gmra.mxu0 %vm305_vm1, %v968_v24  ;;  %928 = vmatmul.mubr.msk.bf16.gmra.mxu1 %vm305_vm1, %v969_v25  ;;  %v121_v24 = vld [vmem:[%s1415_s2 + $0x140] sm:$0xff] }
  0x2f   :  { %899 = vmatprep.mubr.msk.bf16.mxu0 %vm305_vm1, %v970_v26  ;;  %931 = vmatprep.mubr.msk.bf16.mxu1 %vm305_vm1, %v971_v27  ;;  %v92_v27 = vld [vmem:[%s1415_s2 + $0x58] sm:$0xff] }
  0x36   :  { %900 = vmatmul.mubr.msk.bf16.gmra.mxu0 %vm305_vm1, %v972_v28  ;;  %932 = vmatmul.mubr.msk.bf16.gmra.mxu1 %vm305_vm1, %v973_v29 }
  0x37   :  { %903 = vmatprep.mubr.msk.bf16.mxu0 %vm305_vm1, %v974_v30  ;;  %935 = vmatprep.mubr.msk.bf16.mxu1 %vm305_vm1, %v975_v31  ;;  %v124_v30 = vld [vmem:[%s1415_s2 + $0x158] sm:$0xff] }
  0x3e   :  { %904 = vmatmul.mubr.msk.bf16.gmra.mxu0 %vm305_vm1, %v976_v32  ;;  %936 = vmatmul.mubr.msk.bf16.gmra.mxu1 %vm305_vm1, %v977_v33  ;;  %v90_v33 = vld [vmem:[%s1415_s2 + $0x48] sm:$0xff] }
  0xc6   :  { %v877_v36 = vpop.f32.mrf.mxu0  ;;  %v909_v39 = vpop.f32.mrf.mxu1 }
  0xc7   :  { %v449_v38 = vadd.f32 %v877_v36, %v83_v34  ;;  %v577_v41 = vadd.f32 %v909_v39, %v115_v35  ;;  %v122_v36 = vld [vmem:[%s1415_s2 + $0x148] sm:$0xff]  ;;  %v95_v39 = vld [vmem:[%s1415_s2 + $0x70] sm:$0xff] }
  0xc8   :  { %v440_v42 = vpop.f32.mrf.mxu0  ;;  %v568_v45 = vpop.f32.mrf.mxu1 }
  0xc9   :  { %698 = vst.msk [vmem:[#allocation2 + $0x10] sm:$0xff] %vm695_vm2, %v449_v38  ;;  %v441_v44 = vadd.f32 %v440_v42, %v81_v37  ;;  %730 = vst.msk [vmem:[#allocation2 + $0x110] sm:$0xff] %vm695_vm2, %v577_v41  ;;  %v569_v47 = vadd.f32 %v568_v45, %v113_v40  ;;  %v127_v42 = vld [vmem:[%s1415_s2 + $0x170] sm:$0xff]  ;;  %v93_v45 = vld [vmem:[%s1415_s2 + $0x60] sm:$0xff] }
  0xca   :  { %v878_v48 = vpop.f32.mrf.mxu0  ;;  %v910_v51 = vpop.f32.mrf.mxu1 }
  0xcb   :  { %696 = vst.msk [vmem:[#allocation2] sm:$0xff] %vm695_vm2, %v441_v44  ;;  %v452_v50 = vadd.f32 %v878_v48, %v84_v43  ;;  %728 = vst.msk [vmem:[#allocation2 + $0x100] sm:$0xff] %vm695_vm2, %v569_v47  ;;  %v580_v53 = vadd.f32 %v910_v51, %v116_v46  ;;  %v125_v48 = vld [vmem:[%s1415_s2 + $0x160] sm:$0xff]  ;;  %v96_v51 = vld [vmem:[%s1415_s2 + $0x78] sm:$0xff] }
  0xcc   :  { %v443_v54 = vpop.f32.mrf.mxu0  ;;  %v571_v57 = vpop.f32.mrf.mxu1 }
  0xcd   :  { %699 = vst.msk [vmem:[#allocation2 + $0x18] sm:$0xff] %vm695_vm2, %v452_v50  ;;  %v444_v56 = vadd.f32 %v443_v54, %v82_v49  ;;  %731 = vst.msk [vmem:[#allocation2 + $0x118] sm:$0xff] %vm695_vm2, %v580_v53  ;;  %v572_v59 = vadd.f32 %v571_v57, %v114_v52  ;;  %v128_v54 = vld [vmem:[%s1415_s2 + $0x178] sm:$0xff]  ;;  %v94_v57 = vld [vmem:[%s1415_s2 + $0x68] sm:$0xff] }
  0xce   :  { %v881_v60 = vpop.f32.mrf.mxu0  ;;  %v913_v63 = vpop.f32.mrf.mxu1 }
  0xcf   :  { %697 = vst.msk [vmem:[#allocation2 + $0x8] sm:$0xff] %vm695_vm2, %v444_v56  ;;  %v465_v62 = vadd.f32 %v881_v60, %v87_v55  ;;  %729 = vst.msk [vmem:[#allocation2 + $0x108] sm:$0xff] %vm695_vm2, %v572_v59  ;;  %v593_v1 = vadd.f32 %v913_v63, %v119_v58  ;;  %v126_v60 = vld [vmem:[%s1415_s2 + $0x168] sm:$0xff]  ;;  %v99_v63 = vld [vmem:[%s1415_s2 + $0x90] sm:$0xff] }
  0xd0   :  { %v456_v2 = vpop.f32.mrf.mxu0  ;;  %v584_v5 = vpop.f32.mrf.mxu1 }
  0xd1   :  { %702 = vst.msk [vmem:[#allocation2 + $0x30] sm:$0xff] %vm695_vm2, %v465_v62  ;;  %v457_v4 = vadd.f32 %v456_v2, %v85_v61  ;;  %734 = vst.msk [vmem:[#allocation2 + $0x130] sm:$0xff] %vm695_vm2, %v593_v1  ;;  %v585_v7 = vadd.f32 %v584_v5, %v117_v0  ;;  %v131_v2 = vld [vmem:[%s1415_s2 + $0x190] sm:$0xff]  ;;  %v97_v5 = vld [vmem:[%s1415_s2 + $0x80] sm:$0xff] }
  0xd2   :  { %v882_v8 = vpop.f32.mrf.mxu0  ;;  %v914_v11 = vpop.f32.mrf.mxu1 }
  0xd3   :  { %700 = vst.msk [vmem:[#allocation2 + $0x20] sm:$0xff] %vm695_vm2, %v457_v4  ;;  %v468_v10 = vadd.f32 %v882_v8, %v88_v3  ;;  %732 = vst.msk [vmem:[#allocation2 + $0x120] sm:$0xff] %vm695_vm2, %v585_v7  ;;  %v596_v13 = vadd.f32 %v914_v11, %v120_v6  ;;  %v129_v8 = vld [vmem:[%s1415_s2 + $0x180] sm:$0xff]  ;;  %v100_v11 = vld [vmem:[%s1415_s2 + $0x98] sm:$0xff] }
  0xd4   :  { %v459_v14 = vpop.f32.mrf.mxu0  ;;  %v587_v17 = vpop.f32.mrf.mxu1 }
  0xd5   :  { %703 = vst.msk [vmem:[#allocation2 + $0x38] sm:$0xff] %vm695_vm2, %v468_v10  ;;  %v460_v16 = vadd.f32 %v459_v14, %v86_v9  ;;  %735 = vst.msk [vmem:[#allocation2 + $0x138] sm:$0xff] %vm695_vm2, %v596_v13  ;;  %v588_v19 = vadd.f32 %v587_v17, %v118_v12  ;;  %v132_v14 = vld [vmem:[%s1415_s2 + $0x198] sm:$0xff]  ;;  %v98_v17 = vld [vmem:[%s1415_s2 + $0x88] sm:$0xff] }
  0xd6   :  { %v885_v20 = vpop.f32.mrf.mxu0  ;;  %v917_v23 = vpop.f32.mrf.mxu1 }
  0xd7   :  { %701 = vst.msk [vmem:[#allocation2 + $0x28] sm:$0xff] %vm695_vm2, %v460_v16  ;;  %v481_v22 = vadd.f32 %v885_v20, %v91_v15  ;;  %733 = vst.msk [vmem:[#allocation2 + $0x128] sm:$0xff] %vm695_vm2, %v588_v19  ;;  %v609_v25 = vadd.f32 %v917_v23, %v123_v18  ;;  %v130_v20 = vld [vmem:[%s1415_s2 + $0x188] sm:$0xff]  ;;  %v103_v23 = vld [vmem:[%s1415_s2 + $0xb0] sm:$0xff] }
  0xd8   :  { %v472_v26 = vpop.f32.mrf.mxu0  ;;  %v600_v29 = vpop.f32.mrf.mxu1 }
  0xd9   :  { %706 = vst.msk [vmem:[#allocation2 + $0x50] sm:$0xff] %vm695_vm2, %v481_v22  ;;  %v473_v28 = vadd.f32 %v472_v26, %v89_v21  ;;  %738 = vst.msk [vmem:[#allocation2 + $0x150] sm:$0xff] %vm695_vm2, %v609_v25  ;;  %v601_v31 = vadd.f32 %v600_v29, %v121_v24  ;;  %v135_v26 = vld [vmem:[%s1415_s2 + $0x1b0] sm:$0xff]  ;;  %v101_v29 = vld [vmem:[%s1415_s2 + $0xa0] sm:$0xff] }
  0xda   :  { %v886_v32 = vpop.f32.mrf.mxu0  ;;  %v918_v35 = vpop.f32.mrf.mxu1 }
  0xdb   :  { %704 = vst.msk [vmem:[#allocation2 + $0x40] sm:$0xff] %vm695_vm2, %v473_v28  ;;  %v484_v34 = vadd.f32 %v886_v32, %v92_v27  ;;  %736 = vst.msk [vmem:[#allocation2 + $0x140] sm:$0xff] %vm695_vm2, %v601_v31  ;;  %v612_v37 = vadd.f32 %v918_v35, %v124_v30  ;;  %v133_v32 = vld [vmem:[%s1415_s2 + $0x1a0] sm:$0xff]  ;;  %v104_v35 = vld [vmem:[%s1415_s2 + $0xb8] sm:$0xff] }
  0xdc   :  { %v475_v38 = vpop.f32.mrf.mxu0  ;;  %v603_v41 = vpop.f32.mrf.mxu1 }
  0xdd   :  { %707 = vst.msk [vmem:[#allocation2 + $0x58] sm:$0xff] %vm695_vm2, %v484_v34  ;;  %v476_v40 = vadd.f32 %v475_v38, %v90_v33  ;;  %739 = vst.msk [vmem:[#allocation2 + $0x158] sm:$0xff] %vm695_vm2, %v612_v37  ;;  %v604_v43 = vadd.f32 %v603_v41, %v122_v36  ;;  %v136_v38 = vld [vmem:[%s1415_s2 + $0x1b8] sm:$0xff]  ;;  %v102_v41 = vld [vmem:[%s1415_s2 + $0xa8] sm:$0xff] }
  0xde   :  { %v889_v44 = vpop.f32.mrf.mxu0  ;;  %v921_v47 = vpop.f32.mrf.mxu1 }
  0xdf   :  { %705 = vst.msk [vmem:[#allocation2 + $0x48] sm:$0xff] %vm695_vm2, %v476_v40  ;;  %v497_v46 = vadd.f32 %v889_v44, %v95_v39  ;;  %737 = vst.msk [vmem:[#allocation2 + $0x148] sm:$0xff] %vm695_vm2, %v604_v43  ;;  %v625_v49 = vadd.f32 %v921_v47, %v127_v42  ;;  %v134_v44 = vld [vmem:[%s1415_s2 + $0x1a8] sm:$0xff]  ;;  %v107_v47 = vld [vmem:[%s1415_s2 + $0xd0] sm:$0xff] }
  0xe0   :  { %v488_v50 = vpop.f32.mrf.mxu0  ;;  %v616_v53 = vpop.f32.mrf.mxu1 }
  0xe1   :  { %710 = vst.msk [vmem:[#allocation2 + $0x70] sm:$0xff] %vm695_vm2, %v497_v46  ;;  %v489_v52 = vadd.f32 %v488_v50, %v93_v45  ;;  %742 = vst.msk [vmem:[#allocation2 + $0x170] sm:$0xff] %vm695_vm2, %v625_v49  ;;  %v617_v55 = vadd.f32 %v616_v53, %v125_v48  ;;  %v139_v50 = vld [vmem:[%s1415_s2 + $0x1d0] sm:$0xff]  ;;  %v105_v53 = vld [vmem:[%s1415_s2 + $0xc0] sm:$0xff] }
  0xe2   :  { %v890_v56 = vpop.f32.mrf.mxu0  ;;  %v922_v59 = vpop.f32.mrf.mxu1 }
  0xe3   :  { %708 = vst.msk [vmem:[#allocation2 + $0x60] sm:$0xff] %vm695_vm2, %v489_v52  ;;  %v500_v58 = vadd.f32 %v890_v56, %v96_v51  ;;  %740 = vst.msk [vmem:[#allocation2 + $0x160] sm:$0xff] %vm695_vm2, %v617_v55  ;;  %v628_v61 = vadd.f32 %v922_v59, %v128_v54  ;;  %v137_v56 = vld [vmem:[%s1415_s2 + $0x1c0] sm:$0xff]  ;;  %v108_v59 = vld [vmem:[%s1415_s2 + $0xd8] sm:$0xff] }
  0xe4   :  { %v491_v62 = vpop.f32.mrf.mxu0  ;;  %v619_v1 = vpop.f32.mrf.mxu1 }
  0xe5   :  { %711 = vst.msk [vmem:[#allocation2 + $0x78] sm:$0xff] %vm695_vm2, %v500_v58  ;;  %v492_v0 = vadd.f32 %v491_v62, %v94_v57  ;;  %743 = vst.msk [vmem:[#allocation2 + $0x178] sm:$0xff] %vm695_vm2, %v628_v61  ;;  %v620_v3 = vadd.f32 %v619_v1, %v126_v60  ;;  %v140_v62 = vld [vmem:[%s1415_s2 + $0x1d8] sm:$0xff]  ;;  %v106_v1 = vld [vmem:[%s1415_s2 + $0xc8] sm:$0xff] }
  0xe6   :  { %v893_v4 = vpop.f32.mrf.mxu0  ;;  %v925_v7 = vpop.f32.mrf.mxu1 }
  0xe7   :  { %709 = vst.msk [vmem:[#allocation2 + $0x68] sm:$0xff] %vm695_vm2, %v492_v0  ;;  %v513_v6 = vadd.f32 %v893_v4, %v99_v63  ;;  %741 = vst.msk [vmem:[#allocation2 + $0x168] sm:$0xff] %vm695_vm2, %v620_v3  ;;  %v641_v9 = vadd.f32 %v925_v7, %v131_v2  ;;  %v138_v4 = vld [vmem:[%s1415_s2 + $0x1c8] sm:$0xff]  ;;  %v111_v7 = vld [vmem:[%s1415_s2 + $0xf0] sm:$0xff] }
  0xe8   :  { %v504_v10 = vpop.f32.mrf.mxu0  ;;  %v632_v13 = vpop.f32.mrf.mxu1 }
  0xe9   :  { %714 = vst.msk [vmem:[#allocation2 + $0x90] sm:$0xff] %vm695_vm2, %v513_v6  ;;  %v505_v12 = vadd.f32 %v504_v10, %v97_v5  ;;  %746 = vst.msk [vmem:[#allocation2 + $0x190] sm:$0xff] %vm695_vm2, %v641_v9  ;;  %v633_v15 = vadd.f32 %v632_v13, %v129_v8  ;;  %v143_v10 = vld [vmem:[%s1415_s2 + $0x1f0] sm:$0xff]  ;;  %v109_v13 = vld [vmem:[%s1415_s2 + $0xe0] sm:$0xff] }
  0xea   :  { %v894_v16 = vpop.f32.mrf.mxu0  ;;  %v926_v19 = vpop.f32.mrf.mxu1 }
  0xeb   :  { %712 = vst.msk [vmem:[#allocation2 + $0x80] sm:$0xff] %vm695_vm2, %v505_v12  ;;  %v516_v18 = vadd.f32 %v894_v16, %v100_v11  ;;  %744 = vst.msk [vmem:[#allocation2 + $0x180] sm:$0xff] %vm695_vm2, %v633_v15  ;;  %v644_v21 = vadd.f32 %v926_v19, %v132_v14  ;;  %v141_v16 = vld [vmem:[%s1415_s2 + $0x1e0] sm:$0xff]  ;;  %v112_v19 = vld [vmem:[%s1415_s2 + $0xf8] sm:$0xff] }
  0xec   :  { %v507_v22 = vpop.f32.mrf.mxu0  ;;  %v635_v25 = vpop.f32.mrf.mxu1 }
  0xed   :  { %715 = vst.msk [vmem:[#allocation2 + $0x98] sm:$0xff] %vm695_vm2, %v516_v18  ;;  %v508_v24 = vadd.f32 %v507_v22, %v98_v17  ;;  %747 = vst.msk [vmem:[#allocation2 + $0x198] sm:$0xff] %vm695_vm2, %v644_v21  ;;  %v636_v27 = vadd.f32 %v635_v25, %v130_v20  ;;  %v144_v22 = vld [vmem:[%s1415_s2 + $0x1f8] sm:$0xff]  ;;  %v110_v25 = vld [vmem:[%s1415_s2 + $0xe8] sm:$0xff] }
  0xee   :  { %v897_v28 = vpop.f32.mrf.mxu0  ;;  %v929_v31 = vpop.f32.mrf.mxu1 }
  0xef   :  { %713 = vst.msk [vmem:[#allocation2 + $0x88] sm:$0xff] %vm695_vm2, %v508_v24  ;;  %v529_v30 = vadd.f32 %v897_v28, %v103_v23  ;;  %745 = vst.msk [vmem:[#allocation2 + $0x188] sm:$0xff] %vm695_vm2, %v636_v27  ;;  %v657_v33 = vadd.f32 %v929_v31, %v135_v26  ;;  %v142_v28 = vld [vmem:[%s1415_s2 + $0x1e8] sm:$0xff] }
  0xf0   :  { %v520_v34 = vpop.f32.mrf.mxu0  ;;  %v648_v37 = vpop.f32.mrf.mxu1 }
  0xf1   :  { %718 = vst.msk [vmem:[#allocation2 + $0xb0] sm:$0xff] %vm695_vm2, %v529_v30  ;;  %v521_v36 = vadd.f32 %v520_v34, %v101_v29  ;;  %750 = vst.msk [vmem:[#allocation2 + $0x1b0] sm:$0xff] %vm695_vm2, %v657_v33  ;;  %v649_v39 = vadd.f32 %v648_v37, %v133_v32 }
  0xf2   :  { %v898_v40 = vpop.f32.mrf.mxu0  ;;  %v930_v43 = vpop.f32.mrf.mxu1 }
  0xf3   :  { %716 = vst.msk [vmem:[#allocation2 + $0xa0] sm:$0xff] %vm695_vm2, %v521_v36  ;;  %v532_v42 = vadd.f32 %v898_v40, %v104_v35  ;;  %748 = vst.msk [vmem:[#allocation2 + $0x1a0] sm:$0xff] %vm695_vm2, %v649_v39  ;;  %v660_v45 = vadd.f32 %v930_v43, %v136_v38 }
  0xf4   :  { %v523_v46 = vpop.f32.mrf.mxu0  ;;  %v651_v49 = vpop.f32.mrf.mxu1 }
  0xf5   :  { %719 = vst.msk [vmem:[#allocation2 + $0xb8] sm:$0xff] %vm695_vm2, %v532_v42  ;;  %v524_v48 = vadd.f32 %v523_v46, %v102_v41  ;;  %751 = vst.msk [vmem:[#allocation2 + $0x1b8] sm:$0xff] %vm695_vm2, %v660_v45  ;;  %v652_v51 = vadd.f32 %v651_v49, %v134_v44 }
  0xf6   :  { %v901_v52 = vpop.f32.mrf.mxu0  ;;  %v933_v55 = vpop.f32.mrf.mxu1 }
  0xf7   :  { %717 = vst.msk [vmem:[#allocation2 + $0xa8] sm:$0xff] %vm695_vm2, %v524_v48  ;;  %v545_v54 = vadd.f32 %v901_v52, %v107_v47  ;;  %749 = vst.msk [vmem:[#allocation2 + $0x1a8] sm:$0xff] %vm695_vm2, %v652_v51  ;;  %v673_v57 = vadd.f32 %v933_v55, %v139_v50 }
  0xf8   :  { %v536_v58 = vpop.f32.mrf.mxu0  ;;  %v664_v61 = vpop.f32.mrf.mxu1 }
  0xf9   :  { %722 = vst.msk [vmem:[#allocation2 + $0xd0] sm:$0xff] %vm695_vm2, %v545_v54  ;;  %v537_v60 = vadd.f32 %v536_v58, %v105_v53  ;;  %754 = vst.msk [vmem:[#allocation2 + $0x1d0] sm:$0xff] %vm695_vm2, %v673_v57  ;;  %v665_v63 = vadd.f32 %v664_v61, %v137_v56 }
  0xfa   :  { %v902_v0 = vpop.f32.mrf.mxu0  ;;  %v934_v3 = vpop.f32.mrf.mxu1 }
  0xfb   :  { %720 = vst.msk [vmem:[#allocation2 + $0xc0] sm:$0xff] %vm695_vm2, %v537_v60  ;;  %v548_v2 = vadd.f32 %v902_v0, %v108_v59  ;;  %752 = vst.msk [vmem:[#allocation2 + $0x1c0] sm:$0xff] %vm695_vm2, %v665_v63  ;;  %v676_v5 = vadd.f32 %v934_v3, %v140_v62 }
  0xfc   :  { %v539_v6 = vpop.f32.mrf.mxu0  ;;  %v667_v9 = vpop.f32.mrf.mxu1 }
  0xfd   :  { %723 = vst.msk [vmem:[#allocation2 + $0xd8] sm:$0xff] %vm695_vm2, %v548_v2  ;;  %v540_v8 = vadd.f32 %v539_v6, %v106_v1  ;;  %755 = vst.msk [vmem:[#allocation2 + $0x1d8] sm:$0xff] %vm695_vm2, %v676_v5  ;;  %v668_v11 = vadd.f32 %v667_v9, %v138_v4 }
  0xfe   :  { %v905_v12 = vpop.f32.mrf.mxu0  ;;  %v937_v15 = vpop.f32.mrf.mxu1 }
  0xff   :  { %721 = vst.msk [vmem:[#allocation2 + $0xc8] sm:$0xff] %vm695_vm2, %v540_v8  ;;  %v561_v14 = vadd.f32 %v905_v12, %v111_v7  ;;  %753 = vst.msk [vmem:[#allocation2 + $0x1c8] sm:$0xff] %vm695_vm2, %v668_v11  ;;  %v689_v17 = vadd.f32 %v937_v15, %v143_v10 }
 0x100   :  { %v552_v18 = vpop.f32.mrf.mxu0  ;;  %v680_v21 = vpop.f32.mrf.mxu1 }
 0x101   :  { %726 = vst.msk [vmem:[#allocation2 + $0xf0] sm:$0xff] %vm695_vm2, %v561_v14  ;;  %v553_v20 = vadd.f32 %v552_v18, %v109_v13  ;;  %758 = vst.msk [vmem:[#allocation2 + $0x1f0] sm:$0xff] %vm695_vm2, %v689_v17  ;;  %v681_v23 = vadd.f32 %v680_v21, %v141_v16 }
 0x102   :  { %v906_v24 = vpop.f32.mrf.mxu0  ;;  %v938_v27 = vpop.f32.mrf.mxu1 }
 0x103   :  { %724 = vst.msk [vmem:[#allocation2 + $0xe0] sm:$0xff] %vm695_vm2, %v553_v20  ;;  %v564_v26 = vadd.f32 %v906_v24, %v112_v19  ;;  %756 = vst.msk [vmem:[#allocation2 + $0x1e0] sm:$0xff] %vm695_vm2, %v681_v23  ;;  %v692_v29 = vadd.f32 %v938_v27, %v144_v22 }
 0x104   :  { %v555_v30 = vpop.f32.mrf.mxu0  ;;  %v683_v32 = vpop.f32.mrf.mxu1 }
 0x105   :  { %727 = vst.msk [vmem:[#allocation2 + $0xf8] sm:$0xff] %vm695_vm2, %v564_v26  ;;  %v556_v31 = vadd.f32 %v555_v30, %v110_v25  ;;  %759 = vst.msk [vmem:[#allocation2 + $0x1f8] sm:$0xff] %vm695_vm2, %v692_v29  ;;  %v684_v33 = vadd.f32 %v683_v32, %v142_v28 }
 0x107   :  { %725 = vst.msk [vmem:[#allocation2 + $0xe8] sm:$0xff] %vm695_vm2, %v556_v31  ;;  %757 = vst.msk [vmem:[#allocation2 + $0x1e8] sm:$0xff] %vm695_vm2, %v684_v33 }
 0x108   :  { %989 = shalt.err (!%p986_p4)
}
 0x109   :  { %s1001_s2 = smov 128   ;;  %s1002_s8 = smov 8  }
 0x10a   :  { %771 = dma.vmem_to_hbm [thread:$0]  %s766_s4, 8192, %s1416_s3, [#allocation3], %s1001_s2, %s1001_s2, %s1002_s8  }
 0x10b   :  { %998 = dma.done.wait [#allocation3], 8192  }
 0x10c   :  { %999 = vsyncadd [#allocation3], 4294959104 }
 0x10d   :  { %775 = vsyncpa [#allocation3], 1 }

// kernel: preact_bottleneck_forward.5
= control target key start
LH: loop header
LB: loop body
LE: loop exit
PB: predicated region body
PF: predicated region fallthrough
CT: control target
= control target key end

     0   :  { %s4073_s15 = smov 0   ;;  %s5657_s0 = inlined_call_operand.vmem [shape: bf16[2,18,18,8], index: 0, kind: input, shape index: {}]   ;;  %s5658_s1 = inlined_call_operand.vmem [shape: bf16[9,8,8], index: 1, kind: input, shape index: {}]   ;;  %s5659_s2 = inlined_call_operand.vmem [shape: f32[1,8], index: 2, kind: input, shape index: {}]   ;;  %s5660_s3 = inlined_call_operand.vmem [shape: f32[1,8], index: 3, kind: input, shape index: {}]   ;;  %s5661_s4 = inlined_call_operand.vmem [shape: bf16[512,8], index: 4, kind: output, shape index: {}]  }
   0x1 LB: > { %s4079_s16 = sadd.s32 4294967295, %s4046_s15   ;;  %p3246_p0 = scmp.ge.s32.totalorder %s4046_s15, 1  ;;  %s4046_s15 = sphi %s4073_s15, %s14_s15  }
   0x2   : > { %p162_p1 = scmp.lt.s32.totalorder %s4046_s15, 3 }
   0x4   : > { %p163_p2 = pnand %p3246_p0, %p162_p1 }
   0x6   : > { %166 = sbr.rel (%p163_p2) target bundleno = 561 (0x231), region = 36 }
   0xb   : > { %v3250_v0 = vld [vmem:[%s5658_s1 + $0x4] sm:$0xf]  ;;  %vm741_vm0 = vcmask 1043456   ;;  %p188_p3 = scmp.lt.s32.totalorder %s4079_s16, 1  ;;  %v254_v2 = vld [vmem:[%s5658_s1] sm:$0xf] }
   0xc   : > { %4004 = vmatprep.subr.msk.bf16.mxu1 %vm741_vm0, %v3250_v0  ;;  %4003 = vmatprep.subr.msk.bf16.mxu0 %vm741_vm0, %v3250_v0  ;;  %v743_v1 = vsel %vm741_vm0, %v3250_v0, 0  ;;  %v3331_v3 = vld [vmem:[%s5658_s1 + $0x8] sm:$0xf]  ;;  %vm255_vm1 = vsmask.f32 3328  ;;  %v4105_v4 = vsel %vm741_vm0, %v254_v2, 0 }
   0xd   : > { %4002 = vmatpush3.bf16.msra.mxu1 %v743_v1  ;;  %3696 = vmatpush3.bf16.msra.mxu0 %v743_v1  ;;  %s189_s21 = scalar_select %p188_p3, %s4079_s16, 1  ;;  %vm256_vm2 = vsmask.f32 7440  ;;  %v4108_v5 = vsel %vm741_vm0, %v3331_v3, 0  ;;  %vm692_vm3 = vcmask 64512   ;;  %v5705_v32 = vmov 0 }
   0xe   : > { %4005 = vmatprep.subr.msk.bf16.mxu1 %vm741_vm0, %v254_v2  ;;  %4006 = vmatprep.subr.msk.bf16.mxu0 %vm741_vm0, %v3331_v3  ;;  %vm4147_vm4 = vmor %vm255_vm1, %vm256_vm2  ;;  %vm1214_vm5 = vcmask 1042432   ;;  %vm1215_vm6 = vcmask 1046532   ;;  %s3248_s14 = sshll.u32 %s4079_s16, 5  ;;  %vm3153_vm8 = vcmask 60416  }
   0xf   : > { %s4013_s24 = smul.u32 216, %s189_s21  ;;  %v5706_v32 = vsel %vm4147_vm4, 4294967295, %v5705_v32  ;;  %vm4470_vm7 = vmor %vm1214_vm5, %vm1215_vm6  ;;  %p194_p4 = scmp.lt.s32.totalorder %s3248_s14, 63 }
  0x10   : > { %5707 = vst [vmem:[#allocation2_spill] sm:$0xff] %v5706_v32 }
  0x11   : > { %s4102_s27 = scalar_lea.vmem %s5657_s0, %s4013_s24  ;;  %s5865_s14 = smov (!%p194_p4, %s3248_s14), 63 }
  0x12   : > { %v4111_v6 = vld [vmem:[%s4102_s27] sm:$0xf]  ;;  %v4114_v7 = vld [vmem:[%s4102_s27 + $0x4] sm:$0xf]  ;;  %v4117_v8 = vld [vmem:[%s4102_s27 + $0x8] sm:$0x1] }
  0x13   : > { %v259_v9 = vshrl.u32 %v4111_v6, 16  ;;  %v262_v10 = vshll.u32 %v4111_v6, 16  ;;  %v268_v11 = vshll.u32 %v4114_v7, 16  ;;  %v272_v12 = vshrl.u32 %v4114_v7, 16  ;;  %v4124_v13 = vld [vmem:[%s4102_s27 + $0x60] sm:$0xf] }
  0x14   : > { %v278_v14 = vshll.u32 %v4117_v8, 16  ;;  %v4129_v16 = vld [vmem:[%s4102_s27 + $0x64] sm:$0xf]  ;;  %v4132_v17 = vld [vmem:[%s4102_s27 + $0x68] sm:$0x1]  ;;  %v451_v23 = vshrl.u32 %v4124_v13, 16 }
  0x15   : > { %v261_v18 = vrot.slane %v259_v9, 4  ;;  %v264_v19 = vrot.slane %v262_v10, 5  ;;  %v270_v20 = vrot.slane %v268_v11, 5  ;;  %v274_v21 = vrot.slane %v272_v12, 4  ;;  %v4140_v30 = vld [vmem:[%s4102_s27 + $0xc] sm:$0xf] }
  0x16   : > { %v280_v22 = vrot.slane %v278_v14, 5  ;;  %v454_v24 = vshll.u32 %v4124_v13, 16  ;;  %v460_v25 = vshll.u32 %v4129_v16, 16  ;;  %v464_v28 = vshrl.u32 %v4129_v16, 16  ;;  %v4143_v31 = vld [vmem:[%s4102_s27 + $0x10] sm:$0xf] }
  0x17   : > { %v265_v26 = vor.u32 %v264_v19, %v261_v18  ;;  %v275_v27 = vor.u32 %v274_v21, %v270_v20  ;;  %v470_v29 = vshll.u32 %v4132_v17, 16  ;;  %v453_v33 = vrot.slane %v451_v23, 4  ;;  %v4154_v42 = vld [vmem:[%s4102_s27 + $0x14] sm:$0x1]  ;;  %v4165_v54 = vld [vmem:[%s4102_s27 + $0x6c] sm:$0xf] }
  0x18   : > { %v456_v34 = vrot.slane %v454_v24, 5  ;;  %v462_v35 = vrot.slane %v460_v25, 5  ;;  %v466_v39 = vrot.slane %v464_v28, 4  ;;  %v283_v43 = vshrl.u32 %v4140_v30, 16  ;;  %5708 = vst [vmem:[#allocation3_spill] sm:$0xff] %v4165_v54  ;;  %s3249_s20 = sshll.u32 %s5865_s14, 2 }
  0x19   : > { %v266_v37 = vrot.slane %v265_v26, 4  ;;  %v276_v38 = vrot.slane %v275_v27, 4  ;;  %v472_v40 = vrot.slane %v470_v29, 5  ;;  %v286_v44 = vshll.u32 %v4140_v30, 16  ;;  %v4169_v59 = vld [vmem:[%s4102_s27 + $0x70] sm:$0xf]  ;;  %s5458_s23 = scalar_lea.vmem %s5661_s4, %s3249_s20 }
  0x1a   : > { %v457_v41 = vor.u32 %v456_v34, %v453_v33  ;;  %v292_v45 = vshll.u32 %v4143_v31, 16  ;;  %v467_v48 = vor.u32 %v466_v39, %v462_v35  ;;  %v296_v49 = vshrl.u32 %v4143_v31, 16  ;;  %v4177_v0 = vld [vmem:[%s4102_s27 + $0x74] sm:$0x1]  ;;  %v4183_v10 = vld [vmem:[%s4102_s27 + $0x18] sm:$0xf] }
  0x1b   : > { %v271_v46 = vsel %vm4147_vm4, %v266_v37, %v270_v20  ;;  %v281_v47 = vsel %vm4147_vm4, %v276_v38, %v280_v22  ;;  %v285_v52 = vrot.slane %v283_v43, 4  ;;  %v288_v53 = vrot.slane %v286_v44, 5  ;;  %5709 = vst [vmem:[#allocation4_spill] sm:$0xff] %v4177_v0  ;;  %v4192_v23 = vld [vmem:[%s4102_s27 + $0x1c] sm:$0xf] }
  0x1c   : > { %v3251_v50 = vcombine.low %v271_v46, %v281_v47  ;;  %v458_v51 = vrot.slane %v457_v41, 4  ;;  %v468_v55 = vrot.slane %v467_v48, 4  ;;  %v294_v56 = vrot.slane %v292_v45, 5  ;;  %v4199_v27 = vld [vmem:[%s4102_s27 + $0x20] sm:$0x1] }
  0x1d   : > { %v298_v57 = vrot.slane %v296_v49, 4  ;;  %v302_v58 = vshll.u32 %v4154_v42, 16  ;;  %v289_v61 = vor.u32 %v288_v53, %v285_v52  ;;  %v475_v9 = vshrl.u32 %v4165_v54, 16  ;;  %v4206_v37 = vld [vmem:[%s4102_s27 + $0x78] sm:$0xf] }
  0x1e   : > { %3697 = vmatprep.mubr.msk.bf16.mxu0 %vm692_vm3, %v3251_v50  ;;  %v463_v60 = vsel %vm4147_vm4, %v458_v51, %v462_v35  ;;  %v473_v1 = vsel %vm4147_vm4, %v468_v55, %v472_v40  ;;  %v478_v14 = vshll.u32 %v4165_v54, 16  ;;  %v484_v18 = vshll.u32 %v4169_v59, 16  ;;  %5711 = vst [vmem:[#allocation6_spill] sm:$0xff] %v4206_v37  ;;  %v4214_v43 = vld [vmem:[%s5658_s1 + $0x10] sm:$0xf] }
  0x1f   : > { %v299_v2 = vor.u32 %v298_v57, %v294_v56  ;;  %v304_v3 = vrot.slane %v302_v58, 5  ;;  %v4185_v11 = vcombine.low %v463_v60, %v473_v1  ;;  %v290_v12 = vrot.slane %v289_v61, 4  ;;  %v4219_v48 = vld [vmem:[%s4102_s27 + $0x7c] sm:$0xf]  ;;  %v4227_v58 = vld [vmem:[%s4102_s27 + $0x80] sm:$0x1] }
  0x20   : > { %v477_v20 = vrot.slane %v475_v9, 4  ;;  %v488_v21 = vshrl.u32 %v4169_v59, 16  ;;  %v494_v22 = vshll.u32 %v4177_v0, 16  ;;  %v480_v25 = vrot.slane %v478_v14, 5  ;;  %5713 = vst [vmem:[#allocation8_spill] sm:$0xff] %v4219_v48  ;;  %5714 = vst [vmem:[#allocation9_spill] sm:$0xff] %v4227_v58 }
  0x21   : > { %5710 = vst [vmem:[#allocation5_spill] sm:$0xff] %v4185_v11  ;;  %v300_v19 = vrot.slane %v299_v2, 4  ;;  %3713 = vmatprep.mubr.msk.bf16.mxu1 %vm692_vm3, %v4185_v11  ;;  %v295_v24 = vsel %vm4147_vm4, %v290_v12, %v294_v56  ;;  %v486_v26 = vrot.slane %v484_v18, 5  ;;  %v307_v28 = vshrl.u32 %v4183_v10, 16  ;;  %v4241_v18 = vld [vmem:[%s4102_s27 + $0x28] sm:$0xf] }
  0x22   : > { %v490_v33 = vrot.slane %v488_v21, 4  ;;  %v496_v34 = vrot.slane %v494_v22, 5  ;;  %v310_v35 = vshll.u32 %v4183_v10, 16  ;;  %v481_v39 = vor.u32 %v480_v25, %v477_v20 }
  0x23   : > { %v305_v29 = vsel %vm4147_vm4, %v300_v19, %v304_v3  ;;  %v309_v40 = vrot.slane %v307_v28, 4  ;;  %v316_v41 = vshll.u32 %v4192_v23, 16  ;;  %v320_v46 = vshrl.u32 %v4192_v23, 16  ;;  %v4233_v3 = vld [vmem:[%s4102_s27 + $0x24] sm:$0xf] }
  0x24   : > { %v4208_v38 = vcombine.low %v295_v24, %v305_v29  ;;  %v491_v44 = vor.u32 %v490_v33, %v486_v26  ;;  %v312_v45 = vrot.slane %v310_v35, 5  ;;  %v326_v47 = vshll.u32 %v4199_v27, 16  ;;  %v4249_v24 = vld [vmem:[%s5658_s1 + $0xc] sm:$0xf] }
  0x25   : > { %v482_v49 = vrot.slane %v481_v39, 4  ;;  %v318_v50 = vrot.slane %v316_v41, 5  ;;  %v499_v51 = vshrl.u32 %v4206_v37, 16  ;;  %v502_v52 = vshll.u32 %v4206_v37, 16  ;;  %v4254_v29 = vld [vmem:[%s4102_s27 + $0x2c] sm:$0x1] }
  0x26   : > { %5712 = vst [vmem:[#allocation7_spill] sm:$0xff] %v4208_v38  ;;  %3698 = vmatmul.mubr.msk.bf16.vlgmr.msra.gmra.mxu0 %vm692_vm3, %v4208_v38  ;;  %v492_v53 = vrot.slane %v491_v44, 4  ;;  %v313_v55 = vor.u32 %v312_v45, %v309_v40  ;;  %v322_v56 = vrot.slane %v320_v46, 4  ;;  %v328_v57 = vrot.slane %v326_v47, 5  ;;  %v4262_v41 = vld [vmem:[%s4102_s27 + $0x84] sm:$0xf] }
  0x27   : > { %3764 = vmatpush3.bf16.msra.mxu0 %v4108_v5  ;;  %v487_v60 = vsel %vm4147_vm4, %v482_v49, %v486_v26  ;;  %v501_v61 = vrot.slane %v499_v51, 4  ;;  %v504_v1 = vrot.slane %v502_v52, 5  ;;  %v508_v2 = vshll.u32 %v4219_v48, 16  ;;  %v4269_v49 = vld [vmem:[%s4102_s27 + $0x88] sm:$0xf] }
  0x28   : > { %4008 = vmatprep.subr.msk.bf16.mxu0 %vm741_vm0, %v4214_v43  ;;  %v497_v5 = vsel %vm4147_vm4, %v492_v53, %v496_v34  ;;  %v314_v9 = vrot.slane %v313_v55, 4  ;;  %v323_v12 = vor.u32 %v322_v56, %v318_v50  ;;  %v512_v14 = vshrl.u32 %v4219_v48, 16  ;;  %v4409_v38 = vld [vmem:[%s4102_s27 + $0xb0] sm:$0x1]  ;;  %v4431_v48 = vld [vmem:[%s4102_s27 + $0x5c] sm:$0x1] }
  0x29   : > { %v4243_v19 = vcombine.low %v487_v60, %v497_v5  ;;  %v505_v20 = vor.u32 %v504_v1, %v501_v61  ;;  %v510_v21 = vrot.slane %v508_v2, 5  ;;  %v518_v22 = vshll.u32 %v4227_v58, 16  ;;  %5726 = vst [vmem:[#allocation21_spill] sm:$0xff] %v4409_v38 }
  0x2a   : > { %v319_v25 = vsel %vm4147_vm4, %v314_v9, %v318_v50  ;;  %v324_v26 = vrot.slane %v323_v12, 4  ;;  %v514_v28 = vrot.slane %v512_v14, 4  ;;  %v331_v33 = vshrl.u32 %v4233_v3, 16  ;;  %v4288_v9 = vld [vmem:[%s4102_s27 + $0x30] sm:$0xf] }
  0x2b   : > { %5715 = vst [vmem:[#allocation10_spill] sm:$0xff] %v4243_v19  ;;  %3714 = vmatmul.mubr.msk.bf16.vlgmr.msra.gmra.mxu1 %vm692_vm3, %v4243_v19  ;;  %v506_v34 = vrot.slane %v505_v20, 4  ;;  %v520_v35 = vrot.slane %v518_v22, 5  ;;  %v334_v39 = vshll.u32 %v4233_v3, 16  ;;  %v340_v40 = vshll.u32 %v4241_v18, 16 }
  0x2c   : > { %3730 = vmatpush3.bf16.msra.mxu1 %v4105_v4  ;;  %v329_v44 = vsel %vm4147_vm4, %v324_v26, %v328_v57  ;;  %v515_v45 = vor.u32 %v514_v28, %v510_v21  ;;  %v333_v46 = vrot.slane %v331_v33, 4  ;;  %v344_v47 = vshrl.u32 %v4241_v18, 16  ;;  %v4279_v57 = vld [vmem:[%s4102_s27 + $0x8c] sm:$0x1]  ;;  %v4293_v22 = vld [vmem:[%s4102_s27 + $0x34] sm:$0xf] }
  0x2d   : > { %v4271_v50 = vcombine.low %v319_v25, %v329_v44  ;;  %v511_v51 = vsel %vm4147_vm4, %v506_v34, %v510_v21  ;;  %v336_v52 = vrot.slane %v334_v39, 5  ;;  %v342_v53 = vrot.slane %v340_v40, 5  ;;  %4007 = vmatprep.subr.msk.bf16.mxu1 %vm741_vm0, %v4249_v24 }
  0x2e   : > { %v516_v4 = vrot.slane %v515_v45, 4  ;;  %v346_v55 = vrot.slane %v344_v47, 4  ;;  %v350_v56 = vshll.u32 %v4254_v29, 16  ;;  %v523_v60 = vshrl.u32 %v4262_v41, 16 }
  0x2f   : > { %5716 = vst [vmem:[#allocation11_spill] sm:$0xff] %v4271_v50  ;;  %3701 = vmatprep.mubr.msk.bf16.mxu0 %vm692_vm3, %v4271_v50  ;;  %v337_v61 = vor.u32 %v336_v52, %v333_v46  ;;  %v526_v1 = vshll.u32 %v4262_v41, 16  ;;  %v532_v2 = vshll.u32 %v4269_v49, 16  ;;  %v536_v5 = vshrl.u32 %v4269_v49, 16  ;;  %v4304_v46 = vld [vmem:[%s4102_s27 + $0x38] sm:$0x1] }
  0x30   : > { %v521_v12 = vsel %vm4147_vm4, %v516_v4, %v520_v35  ;;  %v347_v14 = vor.u32 %v346_v55, %v342_v53  ;;  %v352_v20 = vrot.slane %v350_v56, 5  ;;  %v525_v21 = vrot.slane %v523_v60, 4  ;;  %v4309_v52 = vld [vmem:[%s4102_s27 + $0x90] sm:$0xf] }
  0x31   : > { %v4295_v25 = vcombine.low %v511_v51, %v521_v12  ;;  %v338_v26 = vrot.slane %v337_v61, 4  ;;  %v528_v28 = vrot.slane %v526_v1, 5  ;;  %v534_v33 = vrot.slane %v532_v2, 5  ;;  %v4314_v61 = vld [vmem:[%s4102_s27 + $0x94] sm:$0xf] }
  0x32   : > { %v348_v34 = vrot.slane %v347_v14, 4  ;;  %v538_v39 = vrot.slane %v536_v5, 4  ;;  %v542_v40 = vshll.u32 %v4279_v57, 16  ;;  %v355_v44 = vshrl.u32 %v4288_v9, 16 }
  0x33   : > { %5717 = vst [vmem:[#allocation12_spill] sm:$0xff] %v4295_v25  ;;  %3717 = vmatprep.mubr.msk.bf16.mxu1 %vm692_vm3, %v4295_v25  ;;  %v343_v35 = vsel %vm4147_vm4, %v338_v26, %v342_v53  ;;  %v529_v45 = vor.u32 %v528_v28, %v525_v21  ;;  %v358_v47 = vshll.u32 %v4288_v9, 16  ;;  %v364_v51 = vshll.u32 %v4293_v22, 16  ;;  %v4360_v25 = vld [vmem:[%s4102_s27 + $0xa0] sm:$0xf] }
  0x34   : > { %v353_v4 = vsel %vm4147_vm4, %v348_v34, %v352_v20  ;;  %v539_v55 = vor.u32 %v538_v39, %v534_v33  ;;  %v544_v56 = vrot.slane %v542_v40, 5  ;;  %v357_v60 = vrot.slane %v355_v44, 4  ;;  %v4326_v34 = vld [vmem:[%s4102_s27 + $0x98] sm:$0x1]  ;;  %v4331_v44 = vld [vmem:[%s4102_s27 + $0x3c] sm:$0xf] }
  0x35   : > { %v4316_v53 = vcombine.low %v343_v35, %v353_v4  ;;  %v530_v1 = vrot.slane %v529_v45, 4  ;;  %v360_v2 = vrot.slane %v358_v47, 5  ;;  %v366_v5 = vrot.slane %v364_v51, 5  ;;  %v4336_v4 = vld [vmem:[%s4102_s27 + $0x40] sm:$0xf] }
  0x36   : > { %v540_v12 = vrot.slane %v539_v55, 4  ;;  %v368_v14 = vshrl.u32 %v4293_v22, 16  ;;  %v374_v21 = vshll.u32 %v4304_v46, 16  ;;  %v547_v20 = vshrl.u32 %v4309_v52, 16 }
  0x37   : > { %5718 = vst [vmem:[#allocation13_spill] sm:$0xff] %v4316_v53  ;;  %3702 = vmatmul.mubr.msk.bf16.gmra.mxu0 %vm692_vm3, %v4316_v53  ;;  %v535_v26 = vsel %vm4147_vm4, %v530_v1, %v534_v33  ;;  %v361_v28 = vor.u32 %v360_v2, %v357_v60  ;;  %v550_v39 = vshll.u32 %v4309_v52, 16  ;;  %v556_v40 = vshll.u32 %v4314_v61, 16 }
  0x38   : > { %v545_v35 = vsel %vm4147_vm4, %v540_v12, %v544_v56  ;;  %v370_v45 = vrot.slane %v368_v14, 4  ;;  %v376_v47 = vrot.slane %v374_v21, 5  ;;  %v549_v51 = vrot.slane %v547_v20, 4  ;;  %v4348_v14 = vld [vmem:[%s4102_s27 + $0x44] sm:$0x1] }
  0x39   : > { %v4338_v33 = vcombine.low %v535_v26, %v545_v35  ;;  %v362_v55 = vrot.slane %v361_v28, 4  ;;  %v552_v60 = vrot.slane %v550_v39, 5  ;;  %v558_v1 = vrot.slane %v556_v40, 5  ;;  %v4353_v26 = vld [vmem:[%s4102_s27 + $0x9c] sm:$0xf] }
  0x3a   : > { %v371_v2 = vor.u32 %v370_v45, %v366_v5  ;;  %v560_v36 = vshrl.u32 %v4314_v61, 16  ;;  %v566_v63 = vshll.u32 %v4326_v34, 16  ;;  %v379_v15 = vshrl.u32 %v4331_v44, 16 }
  0x3b   : > { %5719 = vst [vmem:[#allocation14_spill] sm:$0xff] %v4338_v33  ;;  %3718 = vmatmul.mubr.msk.bf16.gmra.mxu1 %vm692_vm3, %v4338_v33  ;;  %v367_v56 = vsel %vm4147_vm4, %v362_v55, %v366_v5  ;;  %v553_v12 = vor.u32 %v552_v60, %v549_v51  ;;  %v382_v21 = vshll.u32 %v4331_v44, 16  ;;  %v388_v20 = vshll.u32 %v4336_v4, 16 }
  0x3c   : > { %v372_v28 = vrot.slane %v371_v2, 4  ;;  %v562_v39 = vrot.slane %v560_v36, 4  ;;  %v568_v40 = vrot.slane %v566_v63, 5  ;;  %v381_v35 = vrot.slane %v379_v15, 4 }
  0x3d   : > { %v554_v45 = vrot.slane %v553_v12, 4  ;;  %v384_v62 = vrot.slane %v382_v21, 5  ;;  %v390_v33 = vrot.slane %v388_v20, 5  ;;  %v392_v5 = vshrl.u32 %v4336_v4, 16  ;;  %v4368_v21 = vld [vmem:[%s4102_s27 + $0xa4] sm:$0x1] }
  0x3e   : > { %v377_v51 = vsel %vm4147_vm4, %v372_v28, %v376_v47  ;;  %v563_v55 = vor.u32 %v562_v39, %v558_v1  ;;  %v398_v60 = vshll.u32 %v4348_v14, 16  ;;  %v571_v2 = vshrl.u32 %v4353_v26, 16  ;;  %5721 = vst [vmem:[#allocation16_spill] sm:$0xff] %v4368_v21  ;;  %v4371_v20 = vld [vmem:[%s4102_s27 + $0x48] sm:$0xf] }
  0x3f   : > { %v4363_v36 = vcombine.low %v367_v56, %v377_v51  ;;  %v559_v15 = vsel %vm4147_vm4, %v554_v45, %v558_v1  ;;  %v385_v63 = vor.u32 %v384_v62, %v381_v35  ;;  %v394_v12 = vrot.slane %v392_v5, 4 }
  0x40   : > { %v564_v47 = vrot.slane %v563_v55, 4  ;;  %v400_v28 = vrot.slane %v398_v60, 5  ;;  %v573_v39 = vrot.slane %v571_v2, 4  ;;  %v574_v19 = vshll.u32 %v4353_v26, 16  ;;  %v4382_v55 = vld [vmem:[%s4102_s27 + $0x4c] sm:$0xf] }
  0x41   : > { %5720 = vst [vmem:[#allocation15_spill] sm:$0xff] %v4363_v36  ;;  %3705 = vmatprep.mubr.msk.bf16.mxu0 %vm692_vm3, %v4363_v36  ;;  %v386_v56 = vrot.slane %v385_v63, 4  ;;  %v395_v51 = vor.u32 %v394_v12, %v390_v33  ;;  %v580_v1 = vshll.u32 %v4360_v25, 16  ;;  %v584_v62 = vshrl.u32 %v4360_v25, 16  ;;  %v4390_v36 = vld [vmem:[%s4102_s27 + $0x50] sm:$0x1] }
  0x42   : > { %v569_v35 = vsel %vm4147_vm4, %v564_v47, %v568_v40  ;;  %v576_v45 = vrot.slane %v574_v19, 5  ;;  %v590_v5 = vshll.u32 %v4368_v21, 16  ;;  %v403_v60 = vshrl.u32 %v4371_v20, 16  ;;  %v4393_v47 = vld [vmem:[%s4102_s27 + $0xa8] sm:$0xf] }
  0x43   : > { %v4385_v2 = vcombine.low %v559_v15, %v569_v35  ;;  %v391_v63 = vsel %vm4147_vm4, %v386_v56, %v390_v33  ;;  %v396_v12 = vrot.slane %v395_v51, 4  ;;  %v582_v11 = vrot.slane %v580_v1, 5  ;;  %5723 = vst [vmem:[#allocation18_spill] sm:$0xff] %v4393_v47 }
  0x44   : > { %v577_v53 = vor.u32 %v576_v45, %v573_v39  ;;  %v586_v50 = vrot.slane %v584_v62, 4  ;;  %v592_v40 = vrot.slane %v590_v5, 5  ;;  %v405_v19 = vrot.slane %v403_v60, 4  ;;  %v4406_v45 = vld [vmem:[%s4102_s27 + $0xac] sm:$0xf] }
  0x45   : > { %5722 = vst [vmem:[#allocation17_spill] sm:$0xff] %v4385_v2  ;;  %3721 = vmatprep.mubr.msk.bf16.mxu1 %vm692_vm3, %v4385_v2  ;;  %v401_v15 = vsel %vm4147_vm4, %v396_v12, %v400_v28  ;;  %v406_v33 = vshll.u32 %v4371_v20, 16  ;;  %v412_v56 = vshll.u32 %v4382_v55, 16  ;;  %v416_v51 = vshrl.u32 %v4382_v55, 16  ;;  %5725 = vst [vmem:[#allocation20_spill] sm:$0xff] %v4406_v45 }
  0x46   : > { %v4402_v1 = vcombine.low %v391_v63, %v401_v15  ;;  %v578_v39 = vrot.slane %v577_v53, 4  ;;  %v587_v62 = vor.u32 %v586_v50, %v582_v11  ;;  %v422_v35 = vshll.u32 %v4390_v36, 16 }
  0x47   : > { %v408_v5 = vrot.slane %v406_v33, 5  ;;  %v414_v60 = vrot.slane %v412_v56, 5  ;;  %v418_v2 = vrot.slane %v416_v51, 4  ;;  %v595_v28 = vshrl.u32 %v4393_v47, 16  ;;  %v4419_v51 = vld [vmem:[%s4102_s27 + $0x54] sm:$0xf] }
  0x48   : > { %5724 = vst [vmem:[#allocation19_spill] sm:$0xff] %v4402_v1  ;;  %3706 = vmatmul.mubr.msk.bf16.gmra.mxu0 %vm692_vm3, %v4402_v1  ;;  %v583_v53 = vsel %vm4147_vm4, %v578_v39, %v582_v11  ;;  %v588_v50 = vrot.slane %v587_v62, 4  ;;  %v424_v63 = vrot.slane %v422_v35, 5  ;;  %v598_v12 = vshll.u32 %v4393_v47, 16  ;;  %v4426_v62 = vld [vmem:[%s4102_s27 + $0x58] sm:$0xf] }
  0x49   : > { %v409_v15 = vor.u32 %v408_v5, %v405_v19  ;;  %v419_v58 = vor.u32 %v418_v2, %v414_v60  ;;  %v597_v33 = vrot.slane %v595_v28, 4  ;;  %v604_v56 = vshll.u32 %v4406_v45, 16 }
  0x4a   : > { %v593_v1 = vsel %vm4147_vm4, %v588_v50, %v592_v40  ;;  %v600_v37 = vrot.slane %v598_v12, 5  ;;  %v608_v11 = vshrl.u32 %v4406_v45, 16  ;;  %v614_v39 = vshll.u32 %v4409_v38, 16 }
  0x4b   : > { %v4428_v2 = vcombine.low %v583_v53, %v593_v1  ;;  %v410_v19 = vrot.slane %v409_v15, 4  ;;  %v420_v35 = vrot.slane %v419_v58, 4  ;;  %v606_v5 = vrot.slane %v604_v56, 5 }
  0x4c   : > { %v601_v28 = vor.u32 %v600_v37, %v597_v33  ;;  %v610_v0 = vrot.slane %v608_v11, 4  ;;  %v616_v54 = vrot.slane %v614_v39, 5  ;;  %v427_v40 = vshrl.u32 %v4419_v51, 16  ;;  %v4443_v37 = vld [vmem:[%s4102_s27 + $0xb4] sm:$0xf] }
  0x4d   : > { %5727 = vst [vmem:[#allocation22_spill] sm:$0xff] %v4428_v2  ;;  %3722 = vmatmul.mubr.msk.bf16.gmra.mxu1 %vm692_vm3, %v4428_v2  ;;  %v415_v50 = vsel %vm4147_vm4, %v410_v19, %v414_v60  ;;  %v425_v1 = vsel %vm4147_vm4, %v420_v35, %v424_v63  ;;  %v430_v58 = vshll.u32 %v4419_v51, 16  ;;  %v436_v53 = vshll.u32 %v4426_v62, 16  ;;  %5728 = vst [vmem:[#allocation23_spill] sm:$0xff] %v4443_v37  ;;  %v4448_v11 = vld [vmem:[%s4102_s27 + $0xb8] sm:$0xf] }
  0x4e   : > { %v4445_v12 = vcombine.low %v415_v50, %v425_v1  ;;  %v602_v15 = vrot.slane %v601_v28, 4  ;;  %v611_v33 = vor.u32 %v610_v0, %v606_v5  ;;  %v429_v56 = vrot.slane %v427_v40, 4 }
  0x4f   : > { %v432_v39 = vrot.slane %v430_v58, 5  ;;  %v438_v2 = vrot.slane %v436_v53, 5  ;;  %v440_v60 = vshrl.u32 %v4426_v62, 16  ;;  %v446_v63 = vshll.u32 %v4431_v48, 16  ;;  %v4459_v58 = vld [vmem:[%s4102_s27 + $0xbc] sm:$0x1] }
  0x50   : > { %5729 = vst [vmem:[#allocation24_spill] sm:$0xff] %v4445_v12  ;;  %3709 = vmatprep.mubr.msk.bf16.mxu0 %vm692_vm3, %v4445_v12  ;;  %v607_v19 = vsel %vm4147_vm4, %v602_v15, %v606_v5  ;;  %v612_v35 = vrot.slane %v611_v33, 4  ;;  %v619_v28 = vshrl.u32 %v4443_v37, 16  ;;  %v622_v0 = vshll.u32 %v4443_v37, 16 }
  0x51   : > { %v433_v40 = vor.u32 %v432_v39, %v429_v56  ;;  %v442_v50 = vrot.slane %v440_v60, 4  ;;  %v448_v1 = vrot.slane %v446_v63, 5  ;;  %v628_v53 = vshll.u32 %v4448_v11, 16 }
  0x52   : > { %v617_v38 = vsel %vm4147_vm4, %v612_v35, %v616_v54  ;;  %v621_v47 = vrot.slane %v619_v28, 4  ;;  %v624_v12 = vrot.slane %v622_v0, 5  ;;  %v632_v45 = vshrl.u32 %v4448_v11, 16 }
  0x53   : > { %v4465_v5 = vcombine.low %v607_v19, %v617_v38  ;;  %v434_v15 = vrot.slane %v433_v40, 4  ;;  %v443_v33 = vor.u32 %v442_v50, %v438_v2  ;;  %v630_v21 = vrot.slane %v628_v53, 5 }
  0x54   : > { %v625_v37 = vor.u32 %v624_v12, %v621_v47  ;;  %v634_v56 = vrot.slane %v632_v45, 4  ;;  %v638_v39 = vshll.u32 %v4459_v58, 16  ;;  %v3315_v54 = vrot.slane %v4111_v6, 9 }
  0x55   : > { %3725 = vmatprep.mubr.msk.bf16.mxu1 %vm692_vm3, %v4465_v5  ;;  %v439_v38 = vsel %vm4147_vm4, %v434_v15, %v438_v2  ;;  %v444_v63 = vrot.slane %v443_v33, 4  ;;  %v1219_v47 = vrot.slane %v4114_v7, 5  ;;  %v4482_v45 = vcombine.low %v4140_v30, %v4143_v31 }
  0x56   : > { %v626_v12 = vrot.slane %v625_v37, 4  ;;  %v635_v19 = vor.u32 %v634_v56, %v630_v21  ;;  %v640_v35 = vrot.slane %v638_v39, 5  ;;  %v3316_v28 = vrot.slane %v4140_v30, 9 }
  0x57   : > { %v449_v0 = vsel %vm4147_vm4, %v444_v63, %v448_v1  ;;  %v1220_v40 = vsel %vm4470_vm7, %v3315_v54, %v1219_v47  ;;  %v1221_v50 = vrot.slane %v1219_v47, 4  ;;  %v5732_v2 = vrot.slane %v4143_v31, 5 }
  0x58   : > { %v4491_v15 = vcombine.low %v439_v38, %v449_v0  ;;  %v631_v33 = vsel %vm4147_vm4, %v626_v12, %v630_v21  ;;  %v636_v37 = vrot.slane %v635_v19, 4  ;;  %v5734_v1 = vrot.slane %v4117_v8, 5 }
  0x59   : > { %v1228_v53 = vrot.slane %v5732_v2, 4  ;;  %v5733_v56 = vmov %v5732_v2  ;;  %v5735_v54 = vrot.slane %v4154_v42, 5  ;;  %v4509_v63 = vcombine.low %v4183_v10, %v4192_v23 }
  0x5a   : > { %v1227_v30 = vsel %vm4470_vm7, %v3316_v28, %v5733_v56  ;;  %v1223_v39 = vsel %vm4470_vm7, %v1221_v50, %v5734_v1  ;;  %v3317_v21 = vrot.slane %v4183_v10, 9  ;;  %3710 = vmatmul.mubr.msk.bf16.gmra.mxu0 %vm692_vm3, %v4491_v15  ;;  %v641_v8 = vsel %vm4147_vm4, %v636_v37, %v640_v35 }
  0x5b   : > { %v1230_v38 = vsel %vm4470_vm7, %v1228_v53, %v5735_v54  ;;  %v3332_v31 = vcombine.low %v1220_v40, %v1223_v39  ;;  %v1233_v42 = vrot.slane %v4192_v23, 5  ;;  %v4519_v12 = vcombine.low %v631_v33, %v641_v8 }
  0x5c   : > { %v4516_v47 = vcombine.low %v1227_v30, %v1230_v38  ;;  %v1236_v19 = vrot.slane %v4199_v27, 5  ;;  %v1240_v0 = vrot.slane %v4241_v18, 5  ;;  %v3318_v35 = vrot.slane %v4233_v3, 9 }
  0x5d   : > { %5736 = vst [vmem:[#allocation25_spill] sm:$0xff] %v4519_v12  ;;  %3765 = vmatprep.mubr.msk.bf16.mxu0 %vm692_vm3, %v3332_v31  ;;  %v1234_v10 = vsel %vm4470_vm7, %v3317_v21, %v1233_v42  ;;  %v1235_v28 = vrot.slane %v1233_v42, 4  ;;  %3726 = vmatmul.mubr.msk.bf16.gmra.mxu1 %vm692_vm3, %v4519_v12  ;;  %v3319_v40 = vrot.slane %v4288_v9, 9  ;;  %v1247_v23 = vrot.slane %v4293_v22, 5 }
  0x5e   : > { %v5737_v27 = vcombine.low %v4111_v6, %v4114_v7  ;;  %v1242_v2 = vrot.slane %v1240_v0, 4  ;;  %v1243_v53 = vrot.slane %v4254_v29, 5  ;;  %v1250_v33 = vrot.slane %v4304_v46, 5  ;;  %v4554_v46 = vld [vmem:[%s5658_s1 + $0x18] sm:$0xf] }
  0x5f   : > { %v1237_v50 = vsel %vm4470_vm7, %v1235_v28, %v1236_v19  ;;  %v1249_v56 = vrot.slane %v1247_v23, 4  ;;  %v1862_v30 = vsel %vm741_vm0, %v4214_v43, 0  ;;  %v1254_v1 = vrot.slane %v4336_v4, 5  ;;  %v4571_v19 = vld [vmem:[%s5658_s1 + $0x14] sm:$0xf] }
  0x60   : > { %3731 = vmatprep.mubr.msk.bf16.mxu1 %vm692_vm3, %v5737_v27  ;;  %v4539_v37 = vcombine.low %v1234_v10, %v1237_v50  ;;  %v1634_v6 = vsel %vm741_vm0, %v4249_v24, 0  ;;  %v1241_v7 = vsel %vm4470_vm7, %v3318_v35, %v1240_v0  ;;  %v1248_v39 = vsel %vm4470_vm7, %v3319_v40, %v1247_v23 }
  0x61   : > { %v1261_v29 = vrot.slane %v4382_v55, 5  ;;  %v1244_v43 = vsel %vm4470_vm7, %v1242_v2, %v1243_v53  ;;  %v1251_v24 = vsel %vm4470_vm7, %v1249_v56, %v1250_v33  ;;  %v3320_v54 = vrot.slane %v4331_v44, 9 }
  0x62   : > { %3766 = vmatmul.mubr.msk.bf16.vlgmr.msra.gmra.mxu0 %vm692_vm3, %v4516_v47  ;;  %v1257_v38 = vrot.slane %v4348_v14, 5  ;;  %v1256_v21 = vrot.slane %v1254_v1, 4  ;;  %v3321_v8 = vrot.slane %v4371_v20, 9  ;;  %v1264_v42 = vrot.slane %v4390_v36, 5 }
  0x63   : > { %3832 = vmatpush3.bf16.msra.mxu0 %v1862_v30  ;;  %3769 = vmatprep.mubr.msk.bf16.mxu0 %vm692_vm3, %v4539_v37  ;;  %v1263_v31 = vrot.slane %v1261_v29, 4  ;;  %v4579_v14 = vcombine.low %v1241_v7, %v1244_v43  ;;  %v4581_v10 = vcombine.low %v1248_v39, %v1251_v24  ;;  %v1255_v36 = vsel %vm4470_vm7, %v3320_v54, %v1254_v1 }
  0x64   : > { %4010 = vmatprep.subr.msk.bf16.mxu0 %vm741_vm0, %v4554_v46  ;;  %v1258_v28 = vsel %vm4470_vm7, %v1256_v21, %v1257_v38  ;;  %v1262_v0 = vsel %vm4470_vm7, %v3321_v8, %v1261_v29  ;;  %v1268_v40 = vrot.slane %v4426_v62, 5  ;;  %v1278_v23 = vrot.slane %v4132_v17, 5  ;;  %v5738_v8 = vld [vmem:[#allocation16_spill] sm:$0xff] }
  0x65   : > { %3732 = vmatmul.mubr.msk.bf16.vlgmr.msra.gmra.mxu1 %vm692_vm3, %v4482_v45  ;;  %v1265_v35 = vsel %vm4470_vm7, %v1263_v31, %v1264_v42  ;;  %v3322_v27 = vrot.slane %v4419_v51, 9  ;;  %v3323_v50 = vrot.slane %v4124_v13, 9  ;;  %v1275_v2 = vrot.slane %v4129_v16, 5  ;;  %v5739_v42 = vld [vmem:[#allocation20_spill] sm:$0xff] }
  0x66   : > { %3798 = vmatpush3.bf16.msra.mxu1 %v1634_v6  ;;  %3735 = vmatprep.mubr.msk.bf16.mxu1 %vm692_vm3, %v4509_v63  ;;  %v4600_v53 = vcombine.low %v4233_v3, %v4241_v18  ;;  %v4604_v33 = vcombine.low %v4288_v9, %v4293_v22  ;;  %v4608_v56 = vcombine.low %v4331_v44, %v4336_v4  ;;  %v1271_v3 = vrot.slane %v4431_v48, 5 }
  0x67   : > { %4009 = vmatprep.subr.msk.bf16.mxu1 %vm741_vm0, %v4571_v19  ;;  %v4612_v17 = vcombine.low %v4371_v20, %v4382_v55  ;;  %v4616_v30 = vcombine.low %v1255_v36, %v1258_v28  ;;  %v4618_v1 = vcombine.low %v1262_v0, %v1265_v35  ;;  %v4623_v18 = vcombine.low %v4262_v41, %v4269_v49  ;;  %v5740_v36 = vld [vmem:[#allocation18_spill] sm:$0xff] }
  0x68   : > { %v1270_v9 = vrot.slane %v1268_v40, 4  ;;  %v3326_v22 = vrot.slane %v4262_v41, 9  ;;  %v1296_v44 = vrot.slane %v4269_v49, 5  ;;  %v1299_v4 = vrot.slane %v4279_v57, 5 }
  0x69   : > { %v1269_v20 = vsel %vm4470_vm7, %v3322_v27, %v1268_v40  ;;  %v1276_v48 = vsel %vm4470_vm7, %v3323_v50, %v1275_v2  ;;  %v1277_v55 = vrot.slane %v1275_v2, 4  ;;  %v4636_v6 = vcombine.low %v4309_v52, %v4314_v61  ;;  %v5741_v40 = vld [vmem:[#allocation21_spill] sm:$0xff] }
  0x6a   : > { %3770 = vmatmul.mubr.msk.bf16.gmra.mxu0 %vm692_vm3, %v4579_v14  ;;  %v1297_v41 = vsel %vm4470_vm7, %v3326_v22, %v1296_v44  ;;  %v1298_v49 = vrot.slane %v1296_v44, 4  ;;  %v3327_v57 = vrot.slane %v4309_v52, 9  ;;  %v1303_v7 = vrot.slane %v4314_v61, 5 }
  0x6b   : > { %3773 = vmatprep.mubr.msk.bf16.mxu0 %vm692_vm3, %v4581_v10  ;;  %v1282_v39 = vrot.slane %v4169_v59, 5  ;;  %v1306_v29 = vrot.slane %v4326_v34, 5  ;;  %v4650_v43 = vcombine.low %v4353_v26, %v4360_v25  ;;  %v3328_v24 = vrot.slane %v4353_v26, 9 }
  0x6c   : > { %v1272_v54 = vsel %vm4470_vm7, %v1270_v9, %v1271_v3  ;;  %v1300_v52 = vsel %vm4470_vm7, %v1298_v49, %v1299_v4  ;;  %v1304_v61 = vsel %vm4470_vm7, %v3327_v57, %v1303_v7  ;;  %v1305_v38 = vrot.slane %v1303_v7, 4  ;;  %v5742_v3 = vld [vmem:[#allocation23_spill] sm:$0xff]  ;;  %v5743_v57 = vld [vmem:[#allocation8_spill] sm:$0xff] }
  0x6d   : > { %3736 = vmatmul.mubr.msk.bf16.gmra.mxu1 %vm692_vm3, %v4600_v53  ;;  %v4659_v21 = vcombine.low %v1297_v41, %v1300_v52  ;;  %v1310_v34 = vrot.slane %v4360_v25, 5  ;;  %v1313_v31 = vrot.slane %v5738_v8, 5  ;;  %v4665_v28 = vcombine.low %v5740_v36, %v5739_v42 }
  0x6e   : > { %3739 = vmatprep.mubr.msk.bf16.mxu1 %vm692_vm3, %v4604_v33  ;;  %v1307_v26 = vsel %vm4470_vm7, %v1305_v38, %v1306_v29  ;;  %v3329_v0 = vrot.slane %v5740_v36, 9  ;;  %v1317_v35 = vrot.slane %v5739_v42, 5  ;;  %v1320_v27 = vrot.slane %v5741_v40, 5  ;;  %v5745_v42 = vld [vmem:[#allocation4_spill] sm:$0xff] }
  0x6f   : > { %v4674_v50 = vcombine.low %v1304_v61, %v1307_v26  ;;  %v1311_v25 = vsel %vm4470_vm7, %v3328_v24, %v1310_v34  ;;  %v1312_v2 = vrot.slane %v1310_v34, 4  ;;  %v4680_v9 = vcombine.low %v5742_v3, %v4448_v11 }
  0x70   : > { %v1318_v22 = vsel %vm4470_vm7, %v3329_v0, %v1317_v35  ;;  %v1319_v44 = vrot.slane %v1317_v35, 4  ;;  %v3330_v4 = vrot.slane %v5742_v3, 9  ;;  %v1324_v41 = vrot.slane %v4448_v11, 5  ;;  %v5746_v0 = vld [vmem:[#allocation6_spill] sm:$0xff] }
  0x71   : > { %v1279_v49 = vsel %vm4470_vm7, %v1277_v55, %v1278_v23  ;;  %v1289_v7 = vrot.slane %v5743_v57, 5  ;;  %v1314_v29 = vsel %vm4470_vm7, %v1312_v2, %v1313_v31  ;;  %v1327_v24 = vrot.slane %v4459_v58, 5  ;;  %v5744_v55 = vld [vmem:[#allocation3_spill] sm:$0xff] }
  0x72   : > { %3774 = vmatmul.mubr.msk.bf16.gmra.mxu0 %vm692_vm3, %v4616_v30  ;;  %v4696_v52 = vcombine.low %v1311_v25, %v1314_v29  ;;  %v1321_v61 = vsel %vm4470_vm7, %v1319_v44, %v1320_v27  ;;  %v1325_v11 = vsel %vm4470_vm7, %v3330_v4, %v1324_v41  ;;  %v1326_v38 = vrot.slane %v1324_v41, 4  ;;  %v5747_v27 = vld [vmem:[#allocation9_spill] sm:$0xff]  ;;  %v4783_v4 = vld [vmem:[%s4102_s27 + $0xc0] sm:$0xf]  ;;  %v250_v41 = vld [vmem:[%s4102_s27 + $0xc8] sm:$0x1] }
  0x73   : > { %3777 = vmatprep.mubr.msk.bf16.mxu0 %vm692_vm3, %v4618_v1  ;;  %v4704_v23 = vcombine.low %v1269_v20, %v1272_v54  ;;  %v3324_v34 = vrot.slane %v5744_v55, 9  ;;  %v4707_v58 = vcombine.low %v1318_v22, %v1321_v61  ;;  %v4709_v8 = vcombine.low %v1276_v48, %v1279_v49  ;;  %v5748_v61 = vld [vmem:[#allocation7_spill] sm:$0xff] }
  0x74   : > { %v1284_v31 = vrot.slane %v1282_v39, 4  ;;  %v1285_v36 = vrot.slane %v5745_v42, 5  ;;  %v1328_v26 = vsel %vm4470_vm7, %v1326_v38, %v1327_v24  ;;  %v3325_v35 = vrot.slane %v5746_v0, 9  ;;  %v5750_v42 = vld [vmem:[#allocation13_spill] sm:$0xff] }
  0x75   : > { %3740 = vmatmul.mubr.msk.bf16.gmra.mxu1 %vm692_vm3, %v4608_v56  ;;  %v1291_v40 = vrot.slane %v1289_v7, 4  ;;  %v1292_v25 = vrot.slane %v5747_v27, 5  ;;  %v4716_v2 = vcombine.low %v1325_v11, %v1328_v26  ;;  %v4720_v20 = vcombine.low %v4419_v51, %v4426_v62  ;;  %v5754_v26 = vld [vmem:[#allocation5_spill] sm:$0xff] }
  0x76   : > { %3743 = vmatprep.mubr.msk.bf16.mxu1 %vm692_vm3, %v4612_v17  ;;  %v4726_v48 = vcombine.low %v4124_v13, %v4129_v16  ;;  %v1283_v54 = vsel %vm4470_vm7, %v3324_v34, %v1282_v39  ;;  %v1286_v3 = vsel %vm4470_vm7, %v1284_v31, %v1285_v36  ;;  %v1290_v51 = vsel %vm4470_vm7, %v3325_v35, %v1289_v7  ;;  %v5749_v34 = vld [vmem:[#allocation11_spill] sm:$0xff]  ;;  %v5753_v36 = vld [vmem:[#allocation24_spill] sm:$0xff] }
  0x77   : > { %v1293_v62 = vsel %vm4470_vm7, %v1291_v40, %v1292_v25  ;;  %v4742_v13 = vcombine.low %v1283_v54, %v1286_v3  ;;  %v4748_v39 = vcombine.low %v5744_v55, %v4169_v59  ;;  %v4754_v22 = vcombine.low %v5746_v0, %v5743_v57  ;;  %v4777_v59 = vld [vmem:[%s4102_s27 + $0xc4] sm:$0xf]  ;;  %v3456_v55 = vld [vmem:[%s5658_s1 + $0x20] sm:$0xf]  ;;  %v5756_v35 = vld [vmem:[#allocation12_spill] sm:$0xff] }
  0x78   : > { %v4744_v16 = vcombine.low %v1290_v51, %v1293_v62  ;;  %v2060_v44 = vrot.slane %v4777_v59, 5  ;;  %v3400_v49 = vrot.slane %v4783_v4, 9  ;;  %v2063_v7 = vrot.slane %v250_v41, 5  ;;  %v5755_v0 = vld [vmem:[#allocation10_spill] sm:$0xff] }
  0x79   : > { %v2280_v38 = vsel %vm741_vm0, %v4554_v46, 0  ;;  %v2074_v31 = vsel %vm741_vm0, %v4571_v19, 0  ;;  %v5751_v46 = vld [vmem:[#allocation15_spill] sm:$0xff]  ;;  %v5757_v40 = vld [vmem:[#allocation14_spill] sm:$0xff]  ;;  %v1830_v27 = vshrl.u32 %v4783_v4, 16  ;;  %v1833_v25 = vshll.u32 %v4783_v4, 16 }
  0x7a   : > { %3778 = vmatmul.mubr.msk.bf16.gmra.mxu0 %vm692_vm3, %v4704_v23  ;;  %v2062_v57 = vrot.slane %v2060_v44, 4  ;;  %v2061_v29 = vsel %vm4470_vm7, %v3400_v49, %v2060_v44  ;;  %v5752_v19 = vld [vmem:[#allocation19_spill] sm:$0xff]  ;;  %v1843_v54 = vshrl.u32 %v4777_v59, 16  ;;  %v1839_v3 = vshll.u32 %v4777_v59, 16 }
  0x7b   : > { %3781 = vmatprep.mubr.msk.bf16.mxu0 %vm692_vm3, %v4709_v8  ;;  %v1832_v51 = vrot.slane %v1830_v27, 4  ;;  %v1835_v62 = vrot.slane %v1833_v25, 5 }
  0x7c   : > { %v2064_v24 = vsel %vm4470_vm7, %v2062_v57, %v2063_v7  ;;  %v1841_v44 = vrot.slane %v1839_v3, 5  ;;  %v1845_v49 = vrot.slane %v1843_v54, 4  ;;  %v5758_v57 = vld [vmem:[#allocation17_spill] sm:$0xff]  ;;  %v5759_v7 = vld [vmem:[#allocation22_spill] sm:$0xff]  ;;  %v3365_v3 = vcombine.low %v4783_v4, %v4777_v59 }
  0x7d   : > { %3744 = vmatmul.mubr.msk.bf16.gmra.mxu1 %vm692_vm3, %v4720_v20  ;;  %v4795_v11 = vcombine.low %v2061_v29, %v2064_v24  ;;  %v1836_v29 = vor.u32 %v1835_v62, %v1832_v51  ;;  %v2720_v51 = vsel %vm741_vm0, %v3456_v55, 0 }
  0x7e   : > { %3747 = vmatprep.mubr.msk.bf16.mxu1 %vm692_vm3, %v4726_v48  ;;  %v1846_v24 = vor.u32 %v1845_v49, %v1841_v44 }
  0x82   : > { %3782 = vmatmul.mubr.msk.bf16.gmra.mxu0 %vm692_vm3, %v4742_v13 }
  0x83   : > { %3785 = vmatprep.mubr.msk.bf16.mxu0 %vm692_vm3, %v4744_v16 }
  0x85   : > { %3748 = vmatmul.mubr.msk.bf16.gmra.mxu1 %vm692_vm3, %v4748_v39 }
  0x86   : > { %3751 = vmatprep.mubr.msk.bf16.mxu1 %vm692_vm3, %v4754_v22 }
  0x8a   : > { %3786 = vmatmul.mubr.msk.bf16.gmra.mxu0 %vm692_vm3, %v4659_v21 }
  0x8b   : > { %3789 = vmatprep.mubr.msk.bf16.mxu0 %vm692_vm3, %v4674_v50 }
  0x8d   : > { %3752 = vmatmul.mubr.msk.bf16.gmra.mxu1 %vm692_vm3, %v4623_v18 }
  0x8e   : > { %3755 = vmatprep.mubr.msk.bf16.mxu1 %vm692_vm3, %v4636_v6 }
  0x92   : > { %3790 = vmatmul.mubr.msk.bf16.gmra.mxu0 %vm692_vm3, %v4696_v52 }
  0x93   : > { %3793 = vmatprep.mubr.msk.bf16.mxu0 %vm692_vm3, %v4707_v58 }
  0x95   : > { %3756 = vmatmul.mubr.msk.bf16.gmra.mxu1 %vm692_vm3, %v4650_v43 }
  0x96   : > { %3759 = vmatprep.mubr.msk.bf16.mxu1 %vm692_vm3, %v4665_v28 }
  0x9a   : > { %3794 = vmatmul.mubr.msk.bf16.gmra.mxu0 %vm692_vm3, %v4716_v2 }
  0x9b   : > { %3833 = vmatprep.mubr.msk.bf16.mxu0 %vm692_vm3, %v5748_v61  ;;  %v1849_v61 = vshll.u32 %v250_v41, 16 }
  0x9d   : > { %3760 = vmatmul.mubr.msk.bf16.gmra.mxu1 %vm692_vm3, %v4680_v9  ;;  %v1851_v27 = vrot.slane %v1849_v61, 5  ;;  %v4987_v61 = vld [vmem:[%s4102_s27 + $0xd0] sm:$0xf] }
  0x9e   : > { %3799 = vmatprep.mubr.msk.bf16.mxu1 %vm692_vm3, %v4482_v45  ;;  %v3437_v45 = vld [vmem:[%s5658_s1 + $0x1c] sm:$0xf] }
  0x9f   : > { %v2508_v62 = vsel %vm741_vm0, %v3437_v45, 0 }
  0xa2   : > { %3834 = vmatmul.mubr.msk.bf16.vlgmr.msra.gmra.mxu0 %vm692_vm3, %v5749_v34 }
  0xa3   : > { %3900 = vmatpush3.bf16.msra.mxu0 %v2280_v38  ;;  %3837 = vmatprep.mubr.msk.bf16.mxu0 %vm692_vm3, %v5750_v42  ;;  %v1837_v38 = vrot.slane %v1836_v29, 4 }
  0xa4   : > { %4012 = vmatprep.subr.msk.bf16.mxu0 %vm741_vm0, %v3456_v55 }
  0xa5   : > { %3800 = vmatmul.mubr.msk.bf16.vlgmr.msra.gmra.mxu1 %vm692_vm3, %v4509_v63  ;;  %v1842_v25 = vsel %vm4147_vm4, %v1837_v38, %v1841_v44 }
  0xa6   : > { %3866 = vmatpush3.bf16.msra.mxu1 %v2074_v31  ;;  %3803 = vmatprep.mubr.msk.bf16.mxu1 %vm692_vm3, %v4600_v53  ;;  %v1847_v31 = vrot.slane %v1846_v24, 4 }
  0xa7   : > { %4011 = vmatprep.subr.msk.bf16.mxu1 %vm741_vm0, %v3437_v45 }
  0xa8   : > { %v1852_v41 = vsel %vm4147_vm4, %v1847_v31, %v1851_v27 }
  0xa9   : > { %v4877_v54 = vcombine.low %v1842_v25, %v1852_v41 }
  0xaa   : > { %3838 = vmatmul.mubr.msk.bf16.gmra.mxu0 %vm692_vm3, %v5751_v46 }
  0xab   : > { %3841 = vmatprep.mubr.msk.bf16.mxu0 %vm692_vm3, %v5752_v19  ;;  %5760 = vst [vmem:[#allocation16_spill] sm:$0xff] %v4877_v54 }
  0xad   : > { %3804 = vmatmul.mubr.msk.bf16.gmra.mxu1 %vm692_vm3, %v4604_v33 }
  0xae   : > { %3807 = vmatprep.mubr.msk.bf16.mxu1 %vm692_vm3, %v4608_v56 }
  0xb2   : > { %3842 = vmatmul.mubr.msk.bf16.gmra.mxu0 %vm692_vm3, %v5753_v36 }
  0xb3   : > { %3845 = vmatprep.mubr.msk.bf16.mxu0 %vm692_vm3, %v4491_v15 }
  0xb5   : > { %3808 = vmatmul.mubr.msk.bf16.gmra.mxu1 %vm692_vm3, %v4612_v17 }
  0xb6   : > { %3811 = vmatprep.mubr.msk.bf16.mxu1 %vm692_vm3, %v4720_v20 }
  0xba   : > { %3846 = vmatmul.mubr.msk.bf16.gmra.mxu0 %vm692_vm3, %v5754_v26 }
  0xbb   : > { %3849 = vmatprep.mubr.msk.bf16.mxu0 %vm692_vm3, %v5755_v0 }
  0xbd   : > { %3812 = vmatmul.mubr.msk.bf16.gmra.mxu1 %vm692_vm3, %v4726_v48 }
  0xbe   : > { %3815 = vmatprep.mubr.msk.bf16.mxu1 %vm692_vm3, %v4748_v39 }
  0xc2   : > { %3850 = vmatmul.mubr.msk.bf16.gmra.mxu0 %vm692_vm3, %v5756_v35 }
  0xc3   : > { %3853 = vmatprep.mubr.msk.bf16.mxu0 %vm692_vm3, %v5757_v40 }
  0xc5   : > { %3816 = vmatmul.mubr.msk.bf16.gmra.mxu1 %vm692_vm3, %v4754_v22 }
  0xc6   : > { %3819 = vmatprep.mubr.msk.bf16.mxu1 %vm692_vm3, %v4623_v18 }
  0xca   : > { %3854 = vmatmul.mubr.msk.bf16.gmra.mxu0 %vm692_vm3, %v5758_v57 }
  0xcb   : > { %3857 = vmatprep.mubr.msk.bf16.mxu0 %vm692_vm3, %v5759_v7 }
  0xcd   : > { %3820 = vmatmul.mubr.msk.bf16.gmra.mxu1 %vm692_vm3, %v4636_v6 }
  0xce   : > { %3823 = vmatprep.mubr.msk.bf16.mxu1 %vm692_vm3, %v4650_v43 }
  0xd2   : > { %3858 = vmatmul.mubr.msk.bf16.gmra.mxu0 %vm692_vm3, %v4465_v5 }
  0xd3   : > { %3861 = vmatprep.mubr.msk.bf16.mxu0 %vm692_vm3, %v4519_v12 }
  0xd5   : > { %3824 = vmatmul.mubr.msk.bf16.gmra.mxu1 %vm692_vm3, %v4665_v28 }
  0xd6   : > { %3827 = vmatprep.mubr.msk.bf16.mxu1 %vm692_vm3, %v4680_v9 }
  0xda   : > { %3862 = vmatmul.mubr.msk.bf16.gmra.mxu0 %vm692_vm3, %v4877_v54 }
  0xdb   : > { %3901 = vmatprep.mubr.msk.bf16.mxu0 %vm692_vm3, %v4509_v63 }
  0xdd   : > { %3828 = vmatmul.mubr.msk.bf16.gmra.mxu1 %vm692_vm3, %v3365_v3 }
  0xde   : > { %3867 = vmatprep.mubr.msk.bf16.mxu1 %vm692_vm3, %v4516_v47 }
  0xe2   : > { %3902 = vmatmul.mubr.msk.bf16.vlgmr.msra.gmra.mxu0 %vm692_vm3, %v4600_v53 }
  0xe3   : > { %3968 = vmatpush3.bf16.msra.mxu0 %v2720_v51  ;;  %3905 = vmatprep.mubr.msk.bf16.mxu0 %vm692_vm3, %v4604_v33 }
  0xe5   : > { %3868 = vmatmul.mubr.msk.bf16.vlgmr.msra.gmra.mxu1 %vm692_vm3, %v4539_v37 }
  0xe6   : > { %3934 = vmatpush3.bf16.msra.mxu1 %v2508_v62  ;;  %3871 = vmatprep.mubr.msk.bf16.mxu1 %vm692_vm3, %v4579_v14  ;;  %v4900_v63 = vpop.f32.mrf.mxu0 }
  0xe8   : > { %v4910_v53 = vpop.f32.mrf.mxu0 }
  0xea   : > { %3906 = vmatmul.mubr.msk.bf16.gmra.mxu0 %vm692_vm3, %v4608_v56  ;;  %v4916_v56 = vpop.f32.mrf.mxu0 }
  0xeb   : > { %3909 = vmatprep.mubr.msk.bf16.mxu0 %vm692_vm3, %v4612_v17  ;;  %v4906_v47 = vpop.f32.mrf.mxu1 }
  0xec   : > { %v4926_v59 = vpop.f32.mrf.mxu0 }
  0xed   : > { %3872 = vmatmul.mubr.msk.bf16.gmra.mxu1 %vm692_vm3, %v4581_v10  ;;  %v4912_v33 = vpop.f32.mrf.mxu1 }
  0xee   : > { %3875 = vmatprep.mubr.msk.bf16.mxu1 %vm692_vm3, %v4616_v30 }
  0xef   : > { %v4922_v17 = vpop.f32.mrf.mxu1 }
  0xf1   : > { %v4928_v4 = vpop.f32.mrf.mxu1 }
  0xf2   : > { %3910 = vmatmul.mubr.msk.bf16.gmra.mxu0 %vm692_vm3, %v4720_v20 }
  0xf3   : > { %3913 = vmatprep.mubr.msk.bf16.mxu0 %vm692_vm3, %v4726_v48 }
  0xf5   : > { %3876 = vmatmul.mubr.msk.bf16.gmra.mxu1 %vm692_vm3, %v4618_v1 }
  0xf6   : > { %3879 = vmatprep.mubr.msk.bf16.mxu1 %vm692_vm3, %v4704_v23 }
  0xf7   : > { %v4932_v20 = vpop.f32.mrf.mxu0 }
  0xf9   : > { %v4942_v55 = vpop.f32.mrf.mxu0 }
  0xfa   : > { %3914 = vmatmul.mubr.msk.bf16.gmra.mxu0 %vm692_vm3, %v4748_v39 }
  0xfb   : > { %3917 = vmatprep.mubr.msk.bf16.mxu0 %vm692_vm3, %v4754_v22  ;;  %v4938_v48 = vpop.f32.mrf.mxu1  ;;  %v4948_v39 = vpop.f32.mrf.mxu0 }
  0xfd   : > { %3880 = vmatmul.mubr.msk.bf16.gmra.mxu1 %vm692_vm3, %v4709_v8  ;;  %v4944_v45 = vpop.f32.mrf.mxu1  ;;  %v4958_v44 = vpop.f32.mrf.mxu0 }
  0xfe   : > { %3883 = vmatprep.mubr.msk.bf16.mxu1 %vm692_vm3, %v4742_v13 }
  0xff   : > { %v4954_v22 = vpop.f32.mrf.mxu1 }
 0x101   : > { %v4960_v49 = vpop.f32.mrf.mxu1 }
 0x102   : > { %3918 = vmatmul.mubr.msk.bf16.gmra.mxu0 %vm692_vm3, %v4623_v18 }
 0x103   : > { %3921 = vmatprep.mubr.msk.bf16.mxu0 %vm692_vm3, %v4636_v6 }
 0x105   : > { %3884 = vmatmul.mubr.msk.bf16.gmra.mxu1 %vm692_vm3, %v4744_v16 }
 0x106   : > { %3887 = vmatprep.mubr.msk.bf16.mxu1 %vm692_vm3, %v4659_v21 }
 0x108   : > { %v4964_v18 = vpop.f32.mrf.mxu0 }
 0x10a   : > { %3922 = vmatmul.mubr.msk.bf16.gmra.mxu0 %vm692_vm3, %v4650_v43  ;;  %v4974_v29 = vpop.f32.mrf.mxu0 }
 0x10b   : > { %3925 = vmatprep.mubr.msk.bf16.mxu0 %vm692_vm3, %v4665_v28  ;;  %v4984_v28 = vld [vmem:[%s4102_s27 + $0xcc] sm:$0xf] }
 0x10c   : > { %v4980_v43 = vpop.f32.mrf.mxu0 }
 0x10d   : > { %3888 = vmatmul.mubr.msk.bf16.gmra.mxu1 %vm692_vm3, %v4674_v50  ;;  %v4970_v6 = vpop.f32.mrf.mxu1 }
 0x10e   : > { %5761 = vst [vmem:[#allocation20_spill] sm:$0xff] %v4970_v6  ;;  %3891 = vmatprep.mubr.msk.bf16.mxu1 %vm692_vm3, %v4696_v52  ;;  %v4993_v31 = vpop.f32.mrf.mxu0 }
 0x10f   : > { %v4976_v24 = vpop.f32.mrf.mxu1 }
 0x110   : > { %5762 = vst [vmem:[#allocation18_spill] sm:$0xff] %v4976_v24 }
 0x111   : > { %v4991_v38 = vpop.f32.mrf.mxu1 }
 0x112   : > { %3926 = vmatmul.mubr.msk.bf16.gmra.mxu0 %vm692_vm3, %v4680_v9  ;;  %5763 = vst [vmem:[#allocation21_spill] sm:$0xff] %v4991_v38  ;;  %v3420_v9 = vcombine.low %v4984_v28, %v4987_v61 }
 0x113   : > { %3929 = vmatprep.mubr.msk.bf16.mxu0 %vm692_vm3, %v3365_v3  ;;  %v4999_v27 = vpop.f32.mrf.mxu1 }
 0x114   : > { %5764 = vst [vmem:[#allocation23_spill] sm:$0xff] %v4999_v27 }
 0x115   : > { %3892 = vmatmul.mubr.msk.bf16.gmra.mxu1 %vm692_vm3, %v4707_v58 }
 0x116   : > { %3895 = vmatprep.mubr.msk.bf16.mxu1 %vm692_vm3, %v4716_v2 }
 0x11a   : > { %v5001_v25 = vpop.f32.mrf.mxu0  ;;  %3930 = vmatmul.mubr.msk.bf16.gmra.mxu0 %vm692_vm3, %v3420_v9 }
 0x11b   : > { %3969 = vmatprep.mubr.msk.bf16.mxu0 %vm692_vm3, %v4539_v37 }
 0x11c   : > { %v5006_v41 = vpop.f32.mrf.mxu0 }
 0x11d   : > { %v5008_v3 = vpop.f32.mrf.mxu1  ;;  %3896 = vmatmul.mubr.msk.bf16.gmra.mxu1 %vm692_vm3, %v4795_v11 }
 0x11e   : > { %5765 = vst [vmem:[#allocation8_spill] sm:$0xff] %v5008_v3  ;;  %v5012_v51 = vpop.f32.mrf.mxu0  ;;  %3935 = vmatprep.mubr.msk.bf16.mxu1 %vm692_vm3, %v5749_v34 }
 0x11f   : > { %v5016_v62 = vpop.f32.mrf.mxu1 }
 0x120   : > { %5766 = vst [vmem:[#allocation3_spill] sm:$0xff] %v5016_v62  ;;  %v5018_v27 = vpop.f32.mrf.mxu0 }
 0x121   : > { %v5020_v9 = vpop.f32.mrf.mxu1 }
 0x122   : > { %5767 = vst [vmem:[#allocation4_spill] sm:$0xff] %v5020_v9  ;;  %v3767_v38 = vpop.f32.mrf.mxu0  ;;  %3970 = vmatmul.mubr.msk.bf16.vlgmr.msra.gmra.mxu0 %vm692_vm3, %v4579_v14 }
 0x123   : > { %v5024_v37 = vpop.f32.mrf.mxu1  ;;  %3973 = vmatprep.mubr.msk.bf16.mxu0 %vm692_vm3, %v4581_v10 }
 0x124   : > { %5768 = vst [vmem:[#allocation6_spill] sm:$0xff] %v5024_v37  ;;  %v1464_v3 = vpop.f32.mrf.mxu0 }
 0x125   : > { %v3733_v24 = vpop.f32.mrf.mxu1  ;;  %3936 = vmatmul.mubr.msk.bf16.vlgmr.msra.gmra.mxu1 %vm692_vm3, %v5750_v42 }
 0x126   : > { %v1080_v34 = vadd.f32 %v3733_v24, %v4900_v63  ;;  %v3768_v62 = vpop.f32.mrf.mxu0  ;;  %3939 = vmatprep.mubr.msk.bf16.mxu1 %vm692_vm3, %v5751_v46 }
 0x127   : > { %v1071_v9 = vpop.f32.mrf.mxu1 }
 0x128   : > { %v5033_v54 = vadd.f32 %v3767_v38, %v1080_v34  ;;  %v1072_v14 = vadd.f32 %v1071_v9, %v4910_v53  ;;  %v1467_v37 = vpop.f32.mrf.mxu0 }
 0x129   : > { %v3734_v6 = vpop.f32.mrf.mxu1 }
 0x12a   : > { %v5036_v32 = vadd.f32 %v1464_v3, %v1072_v14  ;;  %v1083_v10 = vadd.f32 %v3734_v6, %v4916_v56  ;;  %v3771_v12 = vpop.f32.mrf.mxu0  ;;  %3974 = vmatmul.mubr.msk.bf16.gmra.mxu0 %vm692_vm3, %v4616_v30 }
 0x12b   : > { %v1074_v42 = vpop.f32.mrf.mxu1  ;;  %3977 = vmatprep.mubr.msk.bf16.mxu0 %vm692_vm3, %v4618_v1 }
 0x12c   : > { %v5043_v46 = vadd.f32 %v3768_v62, %v1083_v10  ;;  %v1075_v63 = vadd.f32 %v1074_v42, %v4926_v59  ;;  %v1480_v24 = vpop.f32.mrf.mxu0 }
 0x12d   : > { %v3737_v53 = vpop.f32.mrf.mxu1  ;;  %3940 = vmatmul.mubr.msk.bf16.gmra.mxu1 %vm692_vm3, %v5752_v19 }
 0x12e   : > { %v5048_v38 = vadd.f32 %v1467_v37, %v1075_v63  ;;  %v1096_v56 = vadd.f32 %v3737_v53, %v4932_v20  ;;  %v3772_v6 = vpop.f32.mrf.mxu0  ;;  %3943 = vmatprep.mubr.msk.bf16.mxu1 %vm692_vm3, %v5753_v36 }
 0x12f   : > { %v1087_v30 = vpop.f32.mrf.mxu1 }
 0x130   : > { %v5053_v3 = vadd.f32 %v3771_v12, %v1096_v56  ;;  %v1088_v1 = vadd.f32 %v1087_v30, %v4942_v55  ;;  %v1483_v62 = vpop.f32.mrf.mxu0 }
 0x131   : > { %v3738_v59 = vpop.f32.mrf.mxu1 }
 0x132   : > { %v5056_v9 = vadd.f32 %v1480_v24, %v1088_v1  ;;  %v1099_v34 = vadd.f32 %v3738_v59, %v4948_v39  ;;  %v3775_v19 = vpop.f32.mrf.mxu0  ;;  %3978 = vmatmul.mubr.msk.bf16.gmra.mxu0 %vm692_vm3, %v4704_v23 }
 0x133   : > { %v1090_v20 = vpop.f32.mrf.mxu1  ;;  %3981 = vmatprep.mubr.msk.bf16.mxu0 %vm692_vm3, %v4709_v8 }
 0x134   : > { %v5063_v36 = vadd.f32 %v3772_v6, %v1099_v34  ;;  %v1091_v12 = vadd.f32 %v1090_v20, %v4958_v44  ;;  %v1496_v37 = vpop.f32.mrf.mxu0 }
 0x135   : > { %v3741_v55 = vpop.f32.mrf.mxu1  ;;  %3944 = vmatmul.mubr.msk.bf16.gmra.mxu1 %vm692_vm3, %v4491_v15 }
 0x136   : > { %v5068_v14 = vadd.f32 %v1483_v62, %v1091_v12  ;;  %v1112_v39 = vadd.f32 %v3741_v55, %v4964_v18  ;;  %v3776_v10 = vpop.f32.mrf.mxu0  ;;  %3947 = vmatprep.mubr.msk.bf16.mxu1 %vm692_vm3, %v5754_v26 }
 0x137   : > { %v1103_v23 = vpop.f32.mrf.mxu1 }
 0x138   : > { %v5073_v42 = vadd.f32 %v3775_v19, %v1112_v39  ;;  %v1104_v8 = vadd.f32 %v1103_v23, %v4974_v29  ;;  %v1499_v63 = vpop.f32.mrf.mxu0 }
 0x139   : > { %v3742_v44 = vpop.f32.mrf.mxu1 }
 0x13a   : > { %v5076_v24 = vadd.f32 %v1496_v37, %v1104_v8  ;;  %v1115_v53 = vadd.f32 %v3742_v44, %v4980_v43  ;;  %v3779_v15 = vpop.f32.mrf.mxu0  ;;  %3982 = vmatmul.mubr.msk.bf16.gmra.mxu0 %vm692_vm3, %v4742_v13  ;;  %v2479_v37 = vshll.u32 %v4984_v28, 16 }
 0x13b   : > { %v1106_v18 = vpop.f32.mrf.mxu1  ;;  %3985 = vmatprep.mubr.msk.bf16.mxu0 %vm692_vm3, %v4744_v16 }
 0x13c   : > { %v5083_v26 = vadd.f32 %v3776_v10, %v1115_v53  ;;  %v1107_v56 = vadd.f32 %v1106_v18, %v4993_v31  ;;  %v1512_v6 = vpop.f32.mrf.mxu0  ;;  %v2481_v44 = vrot.slane %v2479_v37, 5 }
 0x13d   : > { %v3745_v29 = vpop.f32.mrf.mxu1  ;;  %3948 = vmatmul.mubr.msk.bf16.gmra.mxu1 %vm692_vm3, %v5755_v0 }
 0x13e   : > { %v5088_v30 = vadd.f32 %v1499_v63, %v1107_v56  ;;  %v1128_v43 = vadd.f32 %v3745_v29, %v5001_v25  ;;  %v3780_v1 = vpop.f32.mrf.mxu0  ;;  %3951 = vmatprep.mubr.msk.bf16.mxu1 %vm692_vm3, %v5756_v35 }
 0x13f   : > { %v1119_v13 = vpop.f32.mrf.mxu1 }
 0x140   : > { %v5093_v62 = vadd.f32 %v3779_v15, %v1128_v43  ;;  %v1120_v16 = vadd.f32 %v1119_v13, %v5006_v41  ;;  %v1515_v59 = vpop.f32.mrf.mxu0  ;;  %v2476_v41 = vshrl.u32 %v4984_v28, 16 }
 0x141   : > { %v3746_v31 = vpop.f32.mrf.mxu1 }
 0x142   : > { %v5096_v34 = vadd.f32 %v1512_v6, %v1120_v16  ;;  %v1131_v19 = vadd.f32 %v3746_v31, %v5012_v51  ;;  %v3783_v0 = vpop.f32.mrf.mxu0  ;;  %3986 = vmatmul.mubr.msk.bf16.gmra.mxu0 %vm692_vm3, %v4659_v21  ;;  %v2485_v51 = vshll.u32 %v4987_v61, 16  ;;  %v2489_v21 = vshrl.u32 %v4987_v61, 16 }
 0x143   : > { %v1122_v25 = vpop.f32.mrf.mxu1  ;;  %3989 = vmatprep.mubr.msk.bf16.mxu0 %vm692_vm3, %v4674_v50 }
 0x144   : > { %v5103_v35 = vadd.f32 %v3780_v1, %v1131_v19  ;;  %v1123_v20 = vadd.f32 %v1122_v25, %v5018_v27  ;;  %v1528_v12 = vpop.f32.mrf.mxu0  ;;  %v2487_v15 = vrot.slane %v2485_v51, 5  ;;  %v2491_v18 = vrot.slane %v2489_v21, 4 }
 0x145   : > { %v3749_v55 = vpop.f32.mrf.mxu1  ;;  %3952 = vmatmul.mubr.msk.bf16.gmra.mxu1 %vm692_vm3, %v5757_v40  ;;  %v2478_v40 = vrot.slane %v2476_v41, 4  ;;  %v3455_v19 = vrot.slane %v4984_v28, 9 }
 0x146   : > { %v5112_v39 = vadd.f32 %v1515_v59, %v1123_v20  ;;  %v1144_v50 = vadd.f32 %v3749_v55, %v4906_v47  ;;  %v3784_v10 = vpop.f32.mrf.mxu0  ;;  %3955 = vmatprep.mubr.msk.bf16.mxu1 %vm692_vm3, %v5758_v57  ;;  %v2706_v57 = vrot.slane %v4987_v61, 5 }
 0x147   : > { %v1135_v27 = vpop.f32.mrf.mxu1 }
 0x148   : > { %v5117_v23 = vadd.f32 %v3783_v0, %v1144_v50  ;;  %v1136_v8 = vadd.f32 %v1135_v27, %v4912_v33  ;;  %v1531_v63 = vpop.f32.mrf.mxu0  ;;  %v253_v33 = vld [vmem:[%s4102_s27 + $0xd4] sm:$0x1] }
 0x149   : > { %v3750_v53 = vpop.f32.mrf.mxu1  ;;  %v2495_v31 = vshll.u32 %v253_v33, 16  ;;  %v2709_v25 = vrot.slane %v253_v33, 5 }
 0x14a   : > { %v5120_v56 = vadd.f32 %v1528_v12, %v1136_v8  ;;  %v1147_v47 = vadd.f32 %v3750_v53, %v4922_v17  ;;  %v3787_v6 = vpop.f32.mrf.mxu0  ;;  %3990 = vmatmul.mubr.msk.bf16.gmra.mxu0 %vm692_vm3, %v4696_v52  ;;  %v2482_v17 = vor.u32 %v2481_v44, %v2478_v40 }
 0x14b   : > { %v1138_v29 = vpop.f32.mrf.mxu1  ;;  %3993 = vmatprep.mubr.msk.bf16.mxu0 %vm692_vm3, %v4707_v58  ;;  %v2492_v58 = vor.u32 %v2491_v18, %v2487_v15  ;;  %v2497_v28 = vrot.slane %v2495_v31, 5 }
 0x14c   : > { %v5129_v43 = vadd.f32 %v3784_v10, %v1147_v47  ;;  %v1139_v1 = vadd.f32 %v1138_v29, %v4928_v4  ;;  %v1544_v13 = vpop.f32.mrf.mxu0  ;;  %v2708_v4 = vrot.slane %v2706_v57, 4  ;;  %v2483_v37 = vrot.slane %v2482_v17, 4  ;;  %v5772_v47 = vld [vmem:[#allocation16_spill] sm:$0xff]  ;;  %v5773_v29 = vld [vmem:[#allocation18_spill] sm:$0xff]  ;;  %v5774_v17 = vld [vmem:[#allocation21_spill] sm:$0xff] }
 0x14d   : > { %v3753_v16 = vpop.f32.mrf.mxu1  ;;  %3956 = vmatmul.mubr.msk.bf16.gmra.mxu1 %vm692_vm3, %v5759_v7 }
 0x14e   : > { %v5134_v59 = vadd.f32 %v1531_v63, %v1139_v1  ;;  %v1160_v52 = vadd.f32 %v3753_v16, %v4938_v48  ;;  %v3788_v61 = vpop.f32.mrf.mxu0  ;;  %3959 = vmatprep.mubr.msk.bf16.mxu1 %vm692_vm3, %v4465_v5  ;;  %v2493_v5 = vrot.slane %v2492_v58, 4  ;;  %v2710_v50 = vsel %vm4470_vm7, %v2708_v4, %v2709_v25  ;;  %v5769_v63 = vld [vmem:[#allocation25_spill] sm:$0xff] }
 0x14f   : > { %v1151_v0 = vpop.f32.mrf.mxu1  ;;  %v2488_v40 = vsel %vm4147_vm4, %v2483_v37, %v2487_v15 }
 0x150   : > { %v5140_v20 = vadd.f32 %v3787_v6, %v1160_v52  ;;  %v1152_v7 = vadd.f32 %v1151_v0, %v4944_v45  ;;  %v1547_v12 = vpop.f32.mrf.mxu0  ;;  %v2707_v45 = vsel %vm4470_vm7, %v3455_v19, %v2706_v57  ;;  %v2498_v60 = vsel %vm4147_vm4, %v2493_v5, %v2497_v28  ;;  %v5775_v19 = vld [vmem:[#allocation23_spill] sm:$0xff] }
 0x151   : > { %v3754_v41 = vpop.f32.mrf.mxu1  ;;  %v3438_v15 = vcombine.low %v2488_v40, %v2498_v60  ;;  %v5777_v5 = vld [vmem:[#allocation3_spill] sm:$0xff]  ;;  %v5779_v40 = vld [vmem:[#allocation6_spill] sm:$0xff] }
 0x152   : > { %v5143_v55 = vadd.f32 %v1544_v13, %v1152_v7  ;;  %v1163_v48 = vadd.f32 %v3754_v41, %v4954_v22  ;;  %v3791_v51 = vpop.f32.mrf.mxu0  ;;  %3994 = vmatmul.mubr.msk.bf16.gmra.mxu0 %vm692_vm3, %v4716_v2 }
 0x153   : > { %v1154_v21 = vpop.f32.mrf.mxu1  ;;  %3997 = vmatprep.mubr.msk.bf16.mxu0 %vm692_vm3, %v4795_v11  ;;  %v5771_v11 = vld [vmem:[#allocation20_spill] sm:$0xff] }
 0x154   : > { %v5154_v10 = vadd.f32 %v3788_v61, %v1163_v48  ;;  %v1155_v22 = vadd.f32 %v1154_v21, %v4960_v49  ;;  %v1560_v27 = vpop.f32.mrf.mxu0  ;;  %v3457_v49 = vcombine.low %v2707_v45, %v2710_v50 }
 0x155   : > { %v3757_v8 = vpop.f32.mrf.mxu1  ;;  %3960 = vmatmul.mubr.msk.bf16.gmra.mxu1 %vm692_vm3, %v5769_v63 }
 0x156   : > { %v5161_v44 = vadd.f32 %v1547_v12, %v1155_v22  ;;  %v1176_v53 = vadd.f32 %v3757_v8, %v5771_v11  ;;  %v3792_v18 = vpop.f32.mrf.mxu0  ;;  %3963 = vmatprep.mubr.msk.bf16.mxu1 %vm692_vm3, %v5772_v47  ;;  %v5776_v12 = vld [vmem:[#allocation8_spill] sm:$0xff] }
 0x157   : > { %v1167_v6 = vpop.f32.mrf.mxu1  ;;  %v5778_v22 = vld [vmem:[#allocation4_spill] sm:$0xff] }
 0x158   : > { %v5168_v57 = vadd.f32 %v3791_v51, %v1176_v53  ;;  %v1168_v33 = vadd.f32 %v1167_v6, %v5773_v29  ;;  %v1563_v1 = vpop.f32.mrf.mxu0 }
 0x159   : > { %v3758_v13 = vpop.f32.mrf.mxu1 }
 0x15a   : > { %v5171_v16 = vadd.f32 %v1560_v27, %v1168_v33  ;;  %v1179_v52 = vadd.f32 %v3758_v13, %v5774_v17  ;;  %v3795_v61 = vpop.f32.mrf.mxu0  ;;  %3998 = vmatmul.mubr.msk.bf16.gmra.mxu0 %vm692_vm3, %v3457_v49 }
 0x15b   : > { %v1170_v58 = vpop.f32.mrf.mxu1 }
 0x15c   : > { %v5175_v31 = vadd.f32 %v3792_v18, %v1179_v52  ;;  %v1171_v0 = vadd.f32 %v1170_v58, %v5775_v19  ;;  %v1576_v4 = vpop.f32.mrf.mxu0 }
 0x15d   : > { %v3761_v25 = vpop.f32.mrf.mxu1  ;;  %3964 = vmatmul.mubr.msk.bf16.gmra.mxu1 %vm692_vm3, %v3438_v15 }
 0x15e   : > { %v5179_v7 = vadd.f32 %v1563_v1, %v1171_v0  ;;  %v1192_v41 = vadd.f32 %v3761_v25, %v5776_v12  ;;  %v3796_v37 = vpop.f32.mrf.mxu0 }
 0x15f   : > { %v1183_v48 = vpop.f32.mrf.mxu1 }
 0x160   : > { %v5182_v51 = vadd.f32 %v3795_v61, %v1192_v41  ;;  %v1184_v28 = vadd.f32 %v1183_v48, %v5777_v5  ;;  %v1579_v21 = vpop.f32.mrf.mxu0 }
 0x161   : > { %v3762_v45 = vpop.f32.mrf.mxu1 }
 0x162   : > { %v5185_v50 = vadd.f32 %v1576_v4, %v1184_v28  ;;  %v1195_v27 = vadd.f32 %v3762_v45, %v5778_v22  ;;  %v3835_v8 = vpop.f32.mrf.mxu0 }
 0x163   : > { %v1186_v63 = vpop.f32.mrf.mxu1 }
 0x164   : > { %v5188_v2 = vadd.f32 %v3796_v37, %v1195_v27  ;;  %v1187_v11 = vadd.f32 %v1186_v63, %v5779_v40  ;;  %v1898_v53 = vpop.f32.mrf.mxu0 }
 0x165   : > { %v3801_v18 = vpop.f32.mrf.mxu1 }
 0x166   : > { %v5191_v47 = vadd.f32 %v1579_v21, %v1187_v11  ;;  %v1799_v60 = vadd.f32 %v3801_v18, %v5033_v54  ;;  %v3836_v49 = vpop.f32.mrf.mxu0 }
 0x167   : > { %v1670_v6 = vpop.f32.mrf.mxu1 }
 0x168   : > { %v5194_v29 = vadd.f32 %v3835_v8, %v1799_v60  ;;  %v1797_v33 = vadd.f32 %v1670_v6, %v5036_v32  ;;  %v1901_v1 = vpop.f32.mrf.mxu0 }
 0x169   : > { %v3802_v13 = vpop.f32.mrf.mxu1 }
 0x16a   : > { %v5197_v15 = vadd.f32 %v1898_v53, %v1797_v33  ;;  %v1800_v17 = vadd.f32 %v3802_v13, %v5043_v46  ;;  %v3839_v52 = vpop.f32.mrf.mxu0 }
 0x16b   : > { %v1673_v61 = vpop.f32.mrf.mxu1 }
 0x16c   : > { %v5200_v58 = vadd.f32 %v3836_v49, %v1800_v17  ;;  %v1798_v19 = vadd.f32 %v1673_v61, %v5048_v38  ;;  %v1914_v0 = vpop.f32.mrf.mxu0 }
 0x16d   : > { %v3805_v54 = vpop.f32.mrf.mxu1 }
 0x16e   : > { %v5203_v4 = vadd.f32 %v1901_v1, %v1798_v19  ;;  %v1803_v25 = vadd.f32 %v3805_v54, %v5053_v3  ;;  %v3840_v12 = vpop.f32.mrf.mxu0 }
 0x16f   : > { %v1686_v32 = vpop.f32.mrf.mxu1 }
 0x170   : > { %v5206_v41 = vadd.f32 %v3839_v52, %v1803_v25  ;;  %v1801_v37 = vadd.f32 %v1686_v32, %v5056_v9  ;;  %v1917_v48 = vpop.f32.mrf.mxu0 }
 0x171   : > { %v3806_v46 = vpop.f32.mrf.mxu1 }
 0x172   : > { %v5209_v5 = vadd.f32 %v1914_v0, %v1801_v37  ;;  %v1804_v28 = vadd.f32 %v3806_v46, %v5063_v36  ;;  %v3843_v21 = vpop.f32.mrf.mxu0 }
 0x173   : > { %v1689_v38 = vpop.f32.mrf.mxu1 }
 0x174   : > { %v5212_v45 = vadd.f32 %v3840_v12, %v1804_v28  ;;  %v1802_v22 = vadd.f32 %v1689_v38, %v5068_v14  ;;  %v1930_v27 = vpop.f32.mrf.mxu0 }
 0x175   : > { %v3809_v3 = vpop.f32.mrf.mxu1 }
 0x176   : > { %v5215_v8 = vadd.f32 %v1917_v48, %v1802_v22  ;;  %v1807_v63 = vadd.f32 %v3809_v3, %v5073_v42  ;;  %v3844_v40 = vpop.f32.mrf.mxu0 }
 0x177   : > { %v1702_v9 = vpop.f32.mrf.mxu1 }
 0x178   : > { %v5218_v11 = vadd.f32 %v3843_v21, %v1807_v63  ;;  %v1805_v53 = vadd.f32 %v1702_v9, %v5076_v24  ;;  %v1933_v18 = vpop.f32.mrf.mxu0 }
 0x179   : > { %v3810_v36 = vpop.f32.mrf.mxu1 }
 0x17a   : > { %v5221_v60 = vadd.f32 %v1930_v27, %v1805_v53  ;;  %v1808_v49 = vadd.f32 %v3810_v36, %v5083_v26  ;;  %v3847_v6 = vpop.f32.mrf.mxu0 }
 0x17b   : > { %v1705_v14 = vpop.f32.mrf.mxu1 }
 0x17c   : > { %v5224_v33 = vadd.f32 %v3844_v40, %v1808_v49  ;;  %v1806_v1 = vadd.f32 %v1705_v14, %v5088_v30  ;;  %v1946_v13 = vpop.f32.mrf.mxu0 }
 0x17d   : > { %v3813_v42 = vpop.f32.mrf.mxu1 }
 0x17e   : > { %v5227_v17 = vadd.f32 %v1933_v18, %v1806_v1  ;;  %v1811_v52 = vadd.f32 %v3813_v42, %v5093_v62  ;;  %v3848_v61 = vpop.f32.mrf.mxu0 }
 0x17f   : > { %v1718_v24 = vpop.f32.mrf.mxu1 }
 0x180   : > { %v5230_v19 = vadd.f32 %v3847_v6, %v1811_v52  ;;  %v1809_v0 = vadd.f32 %v1718_v24, %v5096_v34  ;;  %v1949_v54 = vpop.f32.mrf.mxu0 }
 0x181   : > { %v3814_v26 = vpop.f32.mrf.mxu1 }
 0x182   : > { %v5233_v25 = vadd.f32 %v1946_v13, %v1809_v0  ;;  %v1812_v12 = vadd.f32 %v3814_v26, %v5103_v35  ;;  %v3851_v32 = vpop.f32.mrf.mxu0 }
 0x183   : > { %v1721_v30 = vpop.f32.mrf.mxu1 }
 0x184   : > { %v5236_v37 = vadd.f32 %v3848_v61, %v1812_v12  ;;  %v1810_v48 = vadd.f32 %v1721_v30, %v5112_v39  ;;  %v1962_v46 = vpop.f32.mrf.mxu0 }
 0x185   : > { %v3817_v62 = vpop.f32.mrf.mxu1 }
 0x186   : > { %v5239_v28 = vadd.f32 %v1949_v54, %v1810_v48  ;;  %v1815_v21 = vadd.f32 %v3817_v62, %v5117_v23  ;;  %v3852_v38 = vpop.f32.mrf.mxu0 }
 0x187   : > { %v1734_v34 = vpop.f32.mrf.mxu1 }
 0x188   : > { %v5242_v22 = vadd.f32 %v3851_v32, %v1815_v21  ;;  %v1813_v27 = vadd.f32 %v1734_v34, %v5120_v56  ;;  %v1965_v3 = vpop.f32.mrf.mxu0 }
 0x189   : > { %v3818_v35 = vpop.f32.mrf.mxu1 }
 0x18a   : > { %v5245_v63 = vadd.f32 %v1962_v46, %v1813_v27  ;;  %v1816_v40 = vadd.f32 %v3818_v35, %v5129_v43  ;;  %v3855_v9 = vpop.f32.mrf.mxu0 }
 0x18b   : > { %v1737_v39 = vpop.f32.mrf.mxu1 }
 0x18c   : > { %v5248_v53 = vadd.f32 %v3852_v38, %v1816_v40  ;;  %v1814_v18 = vadd.f32 %v1737_v39, %v5134_v59  ;;  %v1978_v36 = vpop.f32.mrf.mxu0 }
 0x18d   : > { %v3821_v23 = vpop.f32.mrf.mxu1 }
 0x18e   : > { %5780 = vst [vmem:[#allocation9_spill] sm:$0xff] %v5248_v53  ;;  %v5251_v49 = vadd.f32 %v1965_v3, %v1814_v18  ;;  %v1819_v6 = vadd.f32 %v3821_v23, %v5140_v20  ;;  %v3856_v14 = vpop.f32.mrf.mxu0 }
 0x18f   : > { %v1750_v56 = vpop.f32.mrf.mxu1 }
 0x190   : > { %5781 = vst [vmem:[#allocation7_spill] sm:$0xff] %v5251_v49  ;;  %v5254_v1 = vadd.f32 %v3855_v9, %v1819_v6  ;;  %v1817_v13 = vadd.f32 %v1750_v56, %v5143_v55  ;;  %v1981_v42 = vpop.f32.mrf.mxu0 }
 0x191   : > { %v3822_v43 = vpop.f32.mrf.mxu1 }
 0x192   : > { %5782 = vst [vmem:[#allocation11_spill] sm:$0xff] %v5254_v1  ;;  %v5257_v52 = vadd.f32 %v1978_v36, %v1817_v13  ;;  %v1820_v61 = vadd.f32 %v3822_v43, %v5154_v10  ;;  %v3859_v24 = vpop.f32.mrf.mxu0 }
 0x193   : > { %v1753_v59 = vpop.f32.mrf.mxu1 }
 0x194   : > { %5783 = vst [vmem:[#allocation13_spill] sm:$0xff] %v5257_v52  ;;  %v5260_v0 = vadd.f32 %v3856_v14, %v1820_v61  ;;  %v1818_v54 = vadd.f32 %v1753_v59, %v5161_v44  ;;  %v1994_v26 = vpop.f32.mrf.mxu0 }
 0x195   : > { %v3825_v20 = vpop.f32.mrf.mxu1 }
 0x196   : > { %5784 = vst [vmem:[#allocation15_spill] sm:$0xff] %v5260_v0  ;;  %v5263_v12 = vadd.f32 %v1981_v42, %v1818_v54  ;;  %v1823_v32 = vadd.f32 %v3825_v20, %v5168_v57  ;;  %v3860_v30 = vpop.f32.mrf.mxu0 }
 0x197   : > { %v1766_v55 = vpop.f32.mrf.mxu1 }
 0x198   : > { %5785 = vst [vmem:[#allocation19_spill] sm:$0xff] %v5263_v12  ;;  %v5266_v48 = vadd.f32 %v3859_v24, %v1823_v32  ;;  %v1821_v46 = vadd.f32 %v1766_v55, %v5171_v16  ;;  %v1997_v62 = vpop.f32.mrf.mxu0 }
 0x199   : > { %v3826_v10 = vpop.f32.mrf.mxu1 }
 0x19a   : > { %5786 = vst [vmem:[#allocation24_spill] sm:$0xff] %v5266_v48  ;;  %v5269_v21 = vadd.f32 %v1994_v26, %v1821_v46  ;;  %v1824_v38 = vadd.f32 %v3826_v10, %v5175_v31  ;;  %v3863_v34 = vpop.f32.mrf.mxu0 }
 0x19b   : > { %v1769_v44 = vpop.f32.mrf.mxu1 }
 0x19c   : > { %5787 = vst [vmem:[#allocation5_spill] sm:$0xff] %v5269_v21  ;;  %v5272_v27 = vadd.f32 %v3860_v30, %v1824_v38  ;;  %v1822_v3 = vadd.f32 %v1769_v44, %v5179_v7  ;;  %v2010_v35 = vpop.f32.mrf.mxu0 }
 0x19d   : > { %v3829_v57 = vpop.f32.mrf.mxu1 }
 0x19e   : > { %5788 = vst [vmem:[#allocation10_spill] sm:$0xff] %v5272_v27  ;;  %v5275_v40 = vadd.f32 %v1997_v62, %v1822_v3  ;;  %v1827_v9 = vadd.f32 %v3829_v57, %v5182_v51  ;;  %v3864_v39 = vpop.f32.mrf.mxu0 }
 0x19f   : > { %v1782_v16 = vpop.f32.mrf.mxu1 }
 0x1a0   : > { %5789 = vst [vmem:[#allocation12_spill] sm:$0xff] %v5275_v40  ;;  %v5278_v18 = vadd.f32 %v3863_v34, %v1827_v9  ;;  %v1825_v36 = vadd.f32 %v1782_v16, %v5185_v50  ;;  %v2013_v23 = vpop.f32.mrf.mxu0 }
 0x1a1   : > { %v3830_v31 = vpop.f32.mrf.mxu1 }
 0x1a2   : > { %5790 = vst [vmem:[#allocation14_spill] sm:$0xff] %v5278_v18  ;;  %v5281_v6 = vadd.f32 %v2010_v35, %v1825_v36  ;;  %v1828_v14 = vadd.f32 %v3830_v31, %v5188_v2  ;;  %v5284_v56 = vpop.f32.mrf.mxu0 }
 0x1a3   : > { %v1785_v7 = vpop.f32.mrf.mxu1 }
 0x1a4   : > { %5791 = vst [vmem:[#allocation17_spill] sm:$0xff] %v5281_v6  ;;  %v5286_v13 = vadd.f32 %v3864_v39, %v1828_v14  ;;  %v1826_v42 = vadd.f32 %v1785_v7, %v5191_v47  ;;  %v5289_v51 = vpop.f32.mrf.mxu0 }
 0x1a5   : > { %v3869_v43 = vpop.f32.mrf.mxu1 }
 0x1a6   : > { %5792 = vst [vmem:[#allocation22_spill] sm:$0xff] %v5286_v13  ;;  %v5291_v61 = vadd.f32 %v2013_v23, %v1826_v42  ;;  %v5293_v24 = vpop.f32.mrf.mxu0 }
 0x1a7   : > { %v2110_v50 = vpop.f32.mrf.mxu1 }
 0x1a8   : > { %5793 = vst [vmem:[#allocation25_spill] sm:$0xff] %v5291_v61  ;;  %v5295_v59 = vpop.f32.mrf.mxu0 }
 0x1a9   : > { %v5297_v54 = vpop.f32.mrf.mxu1 }
 0x1aa   : > { %v5299_v2 = vpop.f32.mrf.mxu0 }
 0x1ab   : > { %v5301_v26 = vpop.f32.mrf.mxu1 }
 0x1ac   : > { %v5303_v20 = vpop.f32.mrf.mxu0 }
 0x1ad   : > { %v5305_v32 = vpop.f32.mrf.mxu1 }
 0x1ae   : > { %v5307_v47 = vpop.f32.mrf.mxu0 }
 0x1af   : > { %v5309_v30 = vpop.f32.mrf.mxu1 }
 0x1b0   : > { %v5311_v55 = vpop.f32.mrf.mxu0 }
 0x1b1   : > { %v5313_v46 = vpop.f32.mrf.mxu1 }
 0x1b2   : > { %v5315_v62 = vpop.f32.mrf.mxu0 }
 0x1b3   : > { %v5317_v10 = vpop.f32.mrf.mxu1 }
 0x1b4   : > { %v5319_v38 = vpop.f32.mrf.mxu0 }
 0x1b5   : > { %v5321_v34 = vpop.f32.mrf.mxu1 }
 0x1b6   : > { %v5323_v44 = vpop.f32.mrf.mxu0 }
 0x1b7   : > { %v5325_v3 = vpop.f32.mrf.mxu1 }
 0x1b8   : > { %v5327_v35 = vpop.f32.mrf.mxu0 }
 0x1b9   : > { %v5329_v57 = vpop.f32.mrf.mxu1 }
 0x1ba   : > { %v5331_v9 = vpop.f32.mrf.mxu0 }
 0x1bb   : > { %v5333_v39 = vpop.f32.mrf.mxu1 }
 0x1bc   : > { %v5335_v16 = vpop.f32.mrf.mxu0 }
 0x1bd   : > { %v5337_v36 = vpop.f32.mrf.mxu1 }
 0x1be   : > { %v5339_v23 = vpop.f32.mrf.mxu0 }
 0x1bf   : > { %v5341_v31 = vpop.f32.mrf.mxu1 }
 0x1c0   : > { %v5343_v14 = vpop.f32.mrf.mxu0 }
 0x1c1   : > { %v5345_v7 = vpop.f32.mrf.mxu1 }
 0x1c2   : > { %v5347_v42 = vpop.f32.mrf.mxu0 }
 0x1c3   : > { %v5349_v61 = vpop.f32.mrf.mxu1 }
 0x1c4   : > { %v5351_v13 = vpop.f32.mrf.mxu0 }
 0x1c5   : > { %5794 = vst [vmem:[#allocation2_spill] sm:$0xff] %v5351_v13  ;;  %v5353_v6 = vpop.f32.mrf.mxu1 }
 0x1c6   : > { %v5355_v18 = vpop.f32.mrf.mxu0 }
 0x1c7   : > { %5795 = vst [vmem:[#allocation20_spill] sm:$0xff] %v5355_v18  ;;  %v5357_v40 = vpop.f32.mrf.mxu1 }
 0x1c8   : > { %v5359_v27 = vpop.f32.mrf.mxu0 }
 0x1c9   : > { %5796 = vst [vmem:[#allocation16_spill] sm:$0xff] %v5359_v27  ;;  %v5361_v21 = vpop.f32.mrf.mxu1 }
 0x1ca   : > { %5797 = vst [vmem:[#allocation18_spill] sm:$0xff] %v5361_v21  ;;  %v5363_v48 = vpop.f32.mrf.mxu0 }
 0x1cb   : > { %5798 = vst [vmem:[#allocation21_spill] sm:$0xff] %v5363_v48  ;;  %v5365_v12 = vpop.f32.mrf.mxu1 }
 0x1cc   : > { %5799 = vst [vmem:[#allocation23_spill] sm:$0xff] %v5365_v12  ;;  %v5367_v0 = vpop.f32.mrf.mxu0 }
 0x1cd   : > { %5800 = vst [vmem:[#allocation8_spill] sm:$0xff] %v5367_v0  ;;  %v5369_v52 = vpop.f32.mrf.mxu1 }
 0x1ce   : > { %5801 = vst [vmem:[#allocation3_spill] sm:$0xff] %v5369_v52  ;;  %v5371_v1 = vpop.f32.mrf.mxu0 }
 0x1cf   : > { %5802 = vst [vmem:[#allocation4_spill] sm:$0xff] %v5371_v1  ;;  %v5373_v49 = vpop.f32.mrf.mxu1 }
 0x1d0   : > { %5803 = vst [vmem:[#allocation6_spill] sm:$0xff] %v5373_v49  ;;  %v5375_v13 = vpop.f32.mrf.mxu0 }
 0x1d1   : > { %5804 = vst [vmem:[#allocation26_spill] sm:$0xff] %v5375_v13  ;;  %v5377_v18 = vpop.f32.mrf.mxu1 }
 0x1d2   : > { %5805 = vst [vmem:[#allocation27_spill] sm:$0xff] %v5377_v18  ;;  %v5379_v53 = vpop.f32.mrf.mxu0 }
 0x1d3   : > { %5806 = vst [vmem:[#allocation28_spill] sm:$0xff] %v5379_v53  ;;  %v5381_v27 = vpop.f32.mrf.mxu1 }
 0x1d4   : > { %5807 = vst [vmem:[#allocation29_spill] sm:$0xff] %v5381_v27  ;;  %v5383_v48 = vpop.f32.mrf.mxu0 }
 0x1d5   : > { %5808 = vst [vmem:[#allocation30_spill] sm:$0xff] %v5383_v48  ;;  %v5385_v12 = vpop.f32.mrf.mxu1 }
 0x1d6   : > { %5809 = vst [vmem:[#allocation31_spill] sm:$0xff] %v5385_v12  ;;  %v5387_v0 = vpop.f32.mrf.mxu0 }
 0x1d7   : > { %5810 = vst [vmem:[#allocation32_spill] sm:$0xff] %v5387_v0  ;;  %v5389_v52 = vpop.f32.mrf.mxu1  ;;  %v2239_v0 = vadd.f32 %v3869_v43, %v5194_v29  ;;  %v2238_v43 = vadd.f32 %v5301_v26, %v5203_v4  ;;  %v5435_v4 = vld [vmem:[%s5660_s3] ss:$0 sm:$0xff] }
 0x1d8   : > { %5811 = vst [vmem:[#allocation33_spill] sm:$0xff] %v5389_v52  ;;  %v5391_v1 = vpop.f32.mrf.mxu0 }
 0x1d9   : > { %5812 = vst [vmem:[#allocation34_spill] sm:$0xff] %v5391_v1  ;;  %v5393_v49 = vpop.f32.mrf.mxu1  ;;  %v2237_v1 = vadd.f32 %v2110_v50, %v5197_v15  ;;  %v5425_v15 = vld [vmem:[%s5659_s2] ss:$0 sm:$0xff] }
 0x1da   : > { %5813 = vst [vmem:[#allocation35_spill] sm:$0xff] %v5393_v49  ;;  %v5395_v13 = vpop.f32.mrf.mxu0 }
 0x1db   : > { %5814 = vst [vmem:[#allocation36_spill] sm:$0xff] %v5395_v13  ;;  %v5397_v18 = vpop.f32.mrf.mxu1  ;;  %v2443_v29 = vadd.f32 %v5289_v51, %v2237_v1  ;;  %v2243_v1 = vadd.f32 %v5305_v32, %v5206_v41 }
 0x1dc   : > { %v5399_v53 = vpop.f32.mrf.mxu0 }
 0x1dd   : > { %5815 = vst [vmem:[#allocation37_spill] sm:$0xff] %v5399_v53  ;;  %v5401_v27 = vpop.f32.mrf.mxu1  ;;  %v2445_v53 = vadd.f32 %v5284_v56, %v2239_v0 }
 0x1de   : > { %5816 = vst [vmem:[#allocation38_spill] sm:$0xff] %v5401_v27  ;;  %v5403_v21 = vpop.f32.mrf.mxu0  ;;  %v2240_v27 = vadd.f32 %v5297_v54, %v5200_v58 }
 0x1df   : > { %5817 = vst [vmem:[#allocation39_spill] sm:$0xff] %v5403_v21  ;;  %v5405_v48 = vpop.f32.mrf.mxu1 }
 0x1e0   : > { %5818 = vst [vmem:[#allocation40_spill] sm:$0xff] %v5405_v48  ;;  %v5408_v12 = vpop.f32.mrf.mxu0  ;;  %v2446_v0 = vadd.f32 %v5293_v24, %v2240_v27 }
 0x1e1   : > { %5819 = vst [vmem:[#allocation41_spill] sm:$0xff] %v5408_v12  ;;  %v5410_v52 = vpop.f32.mrf.mxu1 }
 0x1e2   : > { %5820 = vst [vmem:[#allocation42_spill] sm:$0xff] %v5410_v52  ;;  %v3971_v13 = vpop.f32.mrf.mxu0 }
 0x1e3   : > { %v5414_v49 = vpop.f32.mrf.mxu1 }
 0x1e4   : > { %5821 = vst [vmem:[#allocation43_spill] sm:$0xff] %v5414_v49  ;;  %v2756_v21 = vpop.f32.mrf.mxu0 }
 0x1e5   : > { %v3937_v48 = vpop.f32.mrf.mxu1 }
 0x1e6   : > { %v2673_v12 = vadd.f32 %v3937_v48, %v2445_v53  ;;  %v3972_v52 = vpop.f32.mrf.mxu0  ;;  %v2444_v48 = vadd.f32 %v5295_v59, %v2238_v43  ;;  %v2449_v43 = vadd.f32 %v5299_v2, %v2243_v1 }
 0x1e7   : > { %v2544_v50 = vpop.f32.mrf.mxu1 }
 0x1e8   : > { %v2885_v58 = vadd.f32 %v3971_v13, %v2673_v12  ;;  %v2671_v56 = vadd.f32 %v2544_v50, %v2443_v29  ;;  %v2759_v54 = vpop.f32.mrf.mxu0  ;;  %v2241_v12 = vadd.f32 %v5309_v30, %v5209_v5  ;;  %v2244_v13 = vadd.f32 %v5313_v46, %v5212_v45 }
 0x1e9   : > { %v3938_v53 = vpop.f32.mrf.mxu1 }
 0x1ea   : > { %v2924_v51 = vmul.f32 %v5425_v15, %v2885_v58  ;;  %v2883_v27 = vadd.f32 %v2756_v21, %v2671_v56  ;;  %v2674_v24 = vadd.f32 %v3938_v53, %v2446_v0  ;;  %v3975_v26 = vpop.f32.mrf.mxu0  ;;  %v2242_v21 = vadd.f32 %v5317_v10, %v5215_v8 }
 0x1eb   : > { %v2547_v41 = vpop.f32.mrf.mxu1  ;;  %v2447_v56 = vadd.f32 %v5303_v20, %v2241_v12  ;;  %v2247_v53 = vadd.f32 %v5321_v34, %v5218_v11  ;;  %v2245_v11 = vadd.f32 %v5325_v3, %v5221_v60 }
 0x1ec   : > { %v2963_v32 = vadd.f32 %v5435_v4, %v2924_v51  ;;  %v2922_v29 = vmul.f32 %v5425_v15, %v2883_v27  ;;  %v2886_v50 = vadd.f32 %v3972_v52, %v2674_v24  ;;  %v2672_v49 = vadd.f32 %v2547_v41, %v2444_v48  ;;  %v2772_v59 = vpop.f32.mrf.mxu0 }
 0x1ed   : > { %v3941_v0 = vpop.f32.mrf.mxu1  ;;  %v2450_v52 = vadd.f32 %v5307_v47, %v2244_v13  ;;  %v2448_v47 = vadd.f32 %v5311_v55, %v2242_v21  ;;  %v2248_v55 = vadd.f32 %v5329_v57, %v5224_v33 }
 0x1ee   : > { %v2995_v5 = vmax.f32 %v2963_v32, 0.0  ;;  %v2961_v30 = vadd.f32 %v5435_v4, %v2922_v29  ;;  %v2925_v45 = vmul.f32 %v5425_v15, %v2886_v50  ;;  %v2884_v46 = vadd.f32 %v2759_v54, %v2672_v49  ;;  %v3976_v58 = vpop.f32.mrf.mxu0 }
 0x1ef   : > { %v2677_v8 = vadd.f32 %v3941_v0, %v2449_v43  ;;  %v2560_v2 = vpop.f32.mrf.mxu1  ;;  %v2453_v32 = vadd.f32 %v5315_v62, %v2247_v53  ;;  %v2246_v62 = vadd.f32 %v5333_v39, %v5227_v17 }
 0x1f0   : > { %v3512_v10 = vpack.c.bf16 %v2995_v5, %v2995_v5  ;;  %v2993_v1 = vmax.f32 %v2961_v30, 0.0  ;;  %v2964_v49 = vadd.f32 %v5435_v4, %v2925_v45  ;;  %v2923_v54 = vmul.f32 %v5425_v15, %v2884_v46  ;;  %v2775_v20 = vpop.f32.mrf.mxu0 }
 0x1f1   : > { %v2889_v34 = vadd.f32 %v3975_v26, %v2677_v8  ;;  %v2675_v48 = vadd.f32 %v2560_v2, %v2447_v56  ;;  %v3942_v51 = vpop.f32.mrf.mxu1  ;;  %v2451_v5 = vadd.f32 %v5319_v38, %v2245_v11  ;;  %v2251_v38 = vadd.f32 %v5337_v36, %v5230_v19 }
 0x1f2   : > { %3156 = vst.msk [vmem:[%s5458_s23 + $0x8] sm:$0xf] %vm3153_vm8, %v3512_v10  ;;  %v3510_v27 = vpack.c.bf16 %v2993_v1, %v2993_v1  ;;  %v2996_v24 = vmax.f32 %v2964_v49, 0.0  ;;  %v2962_v12 = vadd.f32 %v5435_v4, %v2923_v54  ;;  %v2678_v13 = vadd.f32 %v3942_v51, %v2450_v52  ;;  %v3979_v41 = vpop.f32.mrf.mxu0 }
 0x1f3   : > { %v2928_v29 = vmul.f32 %v5425_v15, %v2889_v34  ;;  %v2887_v60 = vadd.f32 %v2772_v59, %v2675_v48  ;;  %v2563_v3 = vpop.f32.mrf.mxu1  ;;  %v2454_v52 = vadd.f32 %v5323_v44, %v2248_v55  ;;  %v2452_v54 = vadd.f32 %v5327_v35, %v2246_v62 }
 0x1f4   : > { %3154 = vst.msk [vmem:[%s5458_s23] sm:$0xf] %vm3153_vm8, %v3510_v27  ;;  %v3513_v26 = vpack.c.bf16 %v2996_v24, %v2996_v24  ;;  %v2994_v50 = vmax.f32 %v2962_v12, 0.0  ;;  %v2890_v43 = vadd.f32 %v3976_v58, %v2678_v13  ;;  %v2676_v21 = vadd.f32 %v2563_v3, %v2448_v47  ;;  %v2788_v0 = vpop.f32.mrf.mxu0 }
 0x1f5   : > { %v2967_v30 = vadd.f32 %v5435_v4, %v2928_v29  ;;  %v2926_v33 = vmul.f32 %v5425_v15, %v2887_v60  ;;  %v3945_v57 = vpop.f32.mrf.mxu1  ;;  %v2249_v44 = vadd.f32 %v5341_v31, %v5233_v25  ;;  %v2457_v27 = vadd.f32 %v5331_v9, %v2251_v38 }
 0x1f6   : > { %3157 = vst.msk [vmem:[%s5458_s23 + $0xc] sm:$0xf] %vm3153_vm8, %v3513_v26  ;;  %v3511_v59 = vpack.c.bf16 %v2994_v50, %v2994_v50  ;;  %v2929_v45 = vmul.f32 %v5425_v15, %v2890_v43  ;;  %v2888_v46 = vadd.f32 %v2775_v20, %v2676_v21  ;;  %v2681_v58 = vadd.f32 %v3945_v57, %v2453_v32  ;;  %v3980_v56 = vpop.f32.mrf.mxu0 }
 0x1f7   : > { %v2999_v53 = vmax.f32 %v2967_v30, 0.0  ;;  %v2965_v17 = vadd.f32 %v5435_v4, %v2926_v33  ;;  %v2576_v39 = vpop.f32.mrf.mxu1  ;;  %v2252_v24 = vadd.f32 %v5345_v7, %v5236_v37  ;;  %v2455_v29 = vadd.f32 %v5335_v16, %v2249_v44 }
 0x1f8   : > { %3155 = vst.msk [vmem:[%s5458_s23 + $0x4] sm:$0xf] %vm3153_vm8, %v3511_v59  ;;  %v2968_v8 = vadd.f32 %v5435_v4, %v2929_v45  ;;  %v2927_v2 = vmul.f32 %v5425_v15, %v2888_v46  ;;  %v2893_v10 = vadd.f32 %v3979_v41, %v2681_v58  ;;  %v2679_v1 = vadd.f32 %v2576_v39, %v2451_v5  ;;  %v2791_v49 = vpop.f32.mrf.mxu0  ;;  %v5823_v39 = vld [vmem:[#allocation18_spill] sm:$0xff] }
 0x1f9   : > { %v3516_v19 = vpack.c.bf16 %v2999_v53, %v2999_v53  ;;  %v2997_v36 = vmax.f32 %v2965_v17, 0.0  ;;  %v3946_v20 = vpop.f32.mrf.mxu1  ;;  %v2250_v9 = vadd.f32 %v5349_v61, %v5239_v28  ;;  %v2255_v28 = vadd.f32 %v5353_v6, %v5242_v22 }
 0x1fa   : > { %v3000_v47 = vmax.f32 %v2968_v8, 0.0  ;;  %v2966_v11 = vadd.f32 %v5435_v4, %v2927_v2  ;;  %v2932_v34 = vmul.f32 %v5425_v15, %v2893_v10  ;;  %v2891_v48 = vadd.f32 %v2788_v0, %v2679_v1  ;;  %v3983_v51 = vpop.f32.mrf.mxu0 }
 0x1fb   : > { %3160 = vst.msk [vmem:[%s5458_s23 + $0x18] sm:$0xf] %vm3153_vm8, %v3516_v19  ;;  %v3514_v25 = vpack.c.bf16 %v2997_v36, %v2997_v36  ;;  %v2682_v35 = vadd.f32 %v3946_v20, %v2454_v52  ;;  %v2579_v31 = vpop.f32.mrf.mxu1  ;;  %v2458_v0 = vadd.f32 %v5339_v23, %v2252_v24  ;;  %v2456_v45 = vadd.f32 %v5343_v14, %v2250_v9  ;;  %v5822_v14 = vld [vmem:[#allocation9_spill] sm:$0xff]  ;;  %v5824_v19 = vld [vmem:[#allocation2_spill] sm:$0xff]  ;;  %v5826_v20 = vld [vmem:[#allocation23_spill] sm:$0xff] }
 0x1fc   : > { %v3517_v12 = vpack.c.bf16 %v3000_v47, %v3000_v47  ;;  %v2998_v13 = vmax.f32 %v2966_v11, 0.0  ;;  %v2971_v41 = vadd.f32 %v5435_v4, %v2932_v34  ;;  %v2930_v32 = vmul.f32 %v5425_v15, %v2891_v48  ;;  %v2804_v55 = vpop.f32.mrf.mxu0 }
 0x1fd   : > { %3158 = vst.msk [vmem:[%s5458_s23 + $0x10] sm:$0xf] %vm3153_vm8, %v3514_v25  ;;  %v2894_v37 = vadd.f32 %v3980_v56, %v2682_v35  ;;  %v2680_v7 = vadd.f32 %v2579_v31, %v2452_v54  ;;  %v3949_v60 = vpop.f32.mrf.mxu1  ;;  %v2253_v23 = vadd.f32 %v5357_v40, %v5245_v63  ;;  %v2461_v17 = vadd.f32 %v5347_v42, %v2255_v28  ;;  %v5825_v42 = vld [vmem:[#allocation7_spill] sm:$0xff]  ;;  %v5827_v31 = vld [vmem:[#allocation20_spill] sm:$0xff] }
 0x1fe   : > { %3161 = vst.msk [vmem:[%s5458_s23 + $0x1c] sm:$0xf] %vm3153_vm8, %v3517_v12  ;;  %v3515_v3 = vpack.c.bf16 %v2998_v13, %v2998_v13  ;;  %v3003_v26 = vmax.f32 %v2971_v41, 0.0  ;;  %v2969_v50 = vadd.f32 %v5435_v4, %v2930_v32  ;;  %v2685_v43 = vadd.f32 %v3949_v60, %v2457_v27  ;;  %v3984_v21 = vpop.f32.mrf.mxu0  ;;  %v5828_v13 = vld [vmem:[#allocation11_spill] sm:$0xff] }
 0x1ff   : > { %v2933_v61 = vmul.f32 %v5425_v15, %v2894_v37  ;;  %v2892_v16 = vadd.f32 %v2791_v49, %v2680_v7  ;;  %v2592_v5 = vpop.f32.mrf.mxu1  ;;  %v2256_v8 = vadd.f32 %v5823_v39, %v5822_v14  ;;  %v2459_v36 = vadd.f32 %v5824_v19, %v2253_v23  ;;  %v5829_v41 = vld [vmem:[#allocation3_spill] sm:$0xff] }
 0x200   : > { %3159 = vst.msk [vmem:[%s5458_s23 + $0x14] sm:$0xf] %vm3153_vm8, %v3515_v3  ;;  %v3520_v62 = vpack.c.bf16 %v3003_v26, %v3003_v26  ;;  %v3001_v30 = vmax.f32 %v2969_v50, 0.0  ;;  %v2897_v33 = vadd.f32 %v3983_v51, %v2685_v43  ;;  %v2683_v57 = vadd.f32 %v2592_v5, %v2455_v29  ;;  %v2807_v59 = vpop.f32.mrf.mxu0  ;;  %v5830_v50 = vld [vmem:[#allocation16_spill] sm:$0xff] }
 0x201   : > { %v2972_v46 = vadd.f32 %v5435_v4, %v2933_v61  ;;  %v2931_v22 = vmul.f32 %v5425_v15, %v2892_v16  ;;  %v3950_v6 = vpop.f32.mrf.mxu1  ;;  %v2254_v47 = vadd.f32 %v5826_v20, %v5825_v42  ;;  %v2462_v12 = vadd.f32 %v5827_v31, %v2256_v8  ;;  %v5836_v8 = vld [vmem:[#allocation8_spill] sm:$0xff] }
 0x202   : > { %3164 = vst.msk [vmem:[%s5458_s23 + $0x28] sm:$0xf] %vm3153_vm8, %v3520_v62  ;;  %v3518_v58 = vpack.c.bf16 %v3001_v30, %v3001_v30  ;;  %v2936_v56 = vmul.f32 %v5425_v15, %v2897_v33  ;;  %v2895_v52 = vadd.f32 %v2804_v55, %v2683_v57  ;;  %v2686_v38 = vadd.f32 %v3950_v6, %v2458_v0  ;;  %v3987_v53 = vpop.f32.mrf.mxu0  ;;  %v5832_v0 = vld [vmem:[#allocation6_spill] sm:$0xff] }
 0x203   : > { %v3004_v2 = vmax.f32 %v2972_v46, 0.0  ;;  %v2970_v63 = vadd.f32 %v5435_v4, %v2931_v22  ;;  %v2595_v40 = vpop.f32.mrf.mxu1  ;;  %v2259_v32 = vadd.f32 %v5829_v41, %v5828_v13  ;;  %v2460_v43 = vadd.f32 %v5830_v50, %v2254_v47  ;;  %v5834_v46 = vld [vmem:[#allocation15_spill] sm:$0xff]  ;;  %v5839_v47 = vld [vmem:[#allocation4_spill] sm:$0xff] }
 0x204   : > { %3162 = vst.msk [vmem:[%s5458_s23 + $0x20] sm:$0xf] %vm3153_vm8, %v3518_v58  ;;  %v2975_v10 = vadd.f32 %v5435_v4, %v2936_v56  ;;  %v2934_v1 = vmul.f32 %v5425_v15, %v2895_v52  ;;  %v2898_v49 = vadd.f32 %v3984_v21, %v2686_v38  ;;  %v2684_v54 = vadd.f32 %v2595_v40, %v2456_v45  ;;  %v2820_v44 = vpop.f32.mrf.mxu0  ;;  %v5831_v21 = vld [vmem:[#allocation13_spill] sm:$0xff]  ;;  %v5835_v22 = vld [vmem:[#allocation27_spill] sm:$0xff] }
 0x205   : > { %v3521_v11 = vpack.c.bf16 %v3004_v2, %v3004_v2  ;;  %v3002_v34 = vmax.f32 %v2970_v63, 0.0  ;;  %v3953_v48 = vpop.f32.mrf.mxu1  ;;  %v2257_v28 = vadd.f32 %v5832_v0, %v5831_v21  ;;  %v5833_v45 = vld [vmem:[#allocation21_spill] sm:$0xff]  ;;  %v2260_v6 = vadd.f32 %v5835_v22, %v5834_v46  ;;  %v5837_v63 = vld [vmem:[#allocation19_spill] sm:$0xff] }
 0x206   : > { %v3007_v51 = vmax.f32 %v2975_v10, 0.0  ;;  %v2973_v27 = vadd.f32 %v5435_v4, %v2934_v1  ;;  %v2937_v24 = vmul.f32 %v5425_v15, %v2898_v49  ;;  %v2896_v25 = vadd.f32 %v2807_v59, %v2684_v54  ;;  %v3988_v35 = vpop.f32.mrf.mxu0  ;;  %v5838_v40 = vld [vmem:[#allocation29_spill] sm:$0xff] }
 0x207   : > { %3165 = vst.msk [vmem:[%s5458_s23 + $0x2c] sm:$0xf] %vm3153_vm8, %v3521_v11  ;;  %v3519_v55 = vpack.c.bf16 %v3002_v34, %v3002_v34  ;;  %v2689_v29 = vadd.f32 %v3953_v48, %v2461_v17  ;;  %v2608_v9 = vpop.f32.mrf.mxu1  ;;  %v2465_v23 = vadd.f32 %v5833_v45, %v2259_v32  ;;  %v2463_v2 = vadd.f32 %v5836_v8, %v2257_v28  ;;  %v5840_v34 = vld [vmem:[#allocation24_spill] sm:$0xff]  ;;  %v5841_v48 = vld [vmem:[#allocation31_spill] sm:$0xff]  ;;  %v5842_v32 = vld [vmem:[#allocation26_spill] sm:$0xff] }
 0x208   : > { %v3524_v37 = vpack.c.bf16 %v3007_v51, %v3007_v51  ;;  %v3005_v7 = vmax.f32 %v2973_v27, 0.0  ;;  %v2976_v60 = vadd.f32 %v5435_v4, %v2937_v24  ;;  %v2935_v3 = vmul.f32 %v5425_v15, %v2896_v25  ;;  %v2823_v26 = vpop.f32.mrf.mxu0  ;;  %v5845_v28 = vld [vmem:[#allocation28_spill] sm:$0xff] }
 0x209   : > { %3163 = vst.msk [vmem:[%s5458_s23 + $0x24] sm:$0xf] %vm3153_vm8, %v3519_v55  ;;  %v2901_v61 = vadd.f32 %v3987_v53, %v2689_v29  ;;  %v2687_v16 = vadd.f32 %v2608_v9, %v2459_v36  ;;  %v3954_v5 = vpop.f32.mrf.mxu1  ;;  %v2258_v10 = vadd.f32 %v5838_v40, %v5837_v63  ;;  %v2466_v11 = vadd.f32 %v5839_v47, %v2260_v6  ;;  %v5843_v29 = vld [vmem:[#allocation5_spill] sm:$0xff]  ;;  %v5848_v6 = vld [vmem:[#allocation30_spill] sm:$0xff]  ;;  %v5850_v40 = vld [vmem:[#allocation32_spill] sm:$0xff] }
 0x20a   : > { %3168 = vst.msk [vmem:[%s5458_s23 + $0x38] sm:$0xf] %vm3153_vm8, %v3524_v37  ;;  %v3522_v62 = vpack.c.bf16 %v3005_v7, %v3005_v7  ;;  %v3008_v30 = vmax.f32 %v2976_v60, 0.0  ;;  %v2974_v33 = vadd.f32 %v5435_v4, %v2935_v3  ;;  %v2690_v57 = vadd.f32 %v3954_v5, %v2462_v12  ;;  %v3991_v59 = vpop.f32.mrf.mxu0  ;;  %v5844_v9 = vld [vmem:[#allocation33_spill] sm:$0xff]  ;;  %v5847_v5 = vld [vmem:[#allocation35_spill] sm:$0xff] }
 0x20b   : > { %v2940_v58 = vmul.f32 %v5425_v15, %v2901_v61  ;;  %v2899_v56 = vadd.f32 %v2820_v44, %v2687_v16  ;;  %v2611_v52 = vpop.f32.mrf.mxu1  ;;  %v2263_v51 = vadd.f32 %v5841_v48, %v5840_v34  ;;  %v2464_v55 = vadd.f32 %v5842_v32, %v2258_v10  ;;  %v5846_v16 = vld [vmem:[#allocation10_spill] sm:$0xff]  ;;  %v5855_v32 = vld [vmem:[#allocation40_spill] sm:$0xff] }
 0x20c   : > { %3166 = vst.msk [vmem:[%s5458_s23 + $0x30] sm:$0xf] %vm3153_vm8, %v3522_v62  ;;  %v3525_v38 = vpack.c.bf16 %v3008_v30, %v3008_v30  ;;  %v3006_v53 = vmax.f32 %v2974_v33, 0.0  ;;  %v2902_v17 = vadd.f32 %v3988_v35, %v2690_v57  ;;  %v2688_v14 = vadd.f32 %v2611_v52, %v2460_v43  ;;  %v2836_v39 = vpop.f32.mrf.mxu0  ;;  %v5853_v34 = vld [vmem:[#allocation38_spill] sm:$0xff] }
 0x20d   : > { %v2979_v1 = vadd.f32 %v5435_v4, %v2940_v58  ;;  %v2938_v49 = vmul.f32 %v5425_v15, %v2899_v56  ;;  %v3957_v54 = vpop.f32.mrf.mxu1  ;;  %v2261_v37 = vadd.f32 %v5844_v9, %v5843_v29  ;;  %v2469_v61 = vadd.f32 %v5845_v28, %v2263_v51  ;;  %v5849_v56 = vld [vmem:[#allocation12_spill] sm:$0xff]  ;;  %v5856_v29 = vld [vmem:[#allocation22_spill] sm:$0xff] }
 0x20e   : > { %3169 = vst.msk [vmem:[%s5458_s23 + $0x3c] sm:$0xf] %vm3153_vm8, %v3525_v38  ;;  %v3523_v44 = vpack.c.bf16 %v3006_v53, %v3006_v53  ;;  %v2941_v19 = vmul.f32 %v5425_v15, %v2902_v17  ;;  %v2900_v36 = vadd.f32 %v2823_v26, %v2688_v14  ;;  %v2693_v42 = vadd.f32 %v3957_v54, %v2465_v23  ;;  %v3992_v20 = vpop.f32.mrf.mxu0  ;;  %v5857_v9 = vld [vmem:[#allocation42_spill] sm:$0xff] }
 0x20f   : > { %v3011_v27 = vmax.f32 %v2979_v1, 0.0  ;;  %v2977_v24 = vadd.f32 %v5435_v4, %v2938_v49  ;;  %v2624_v25 = vpop.f32.mrf.mxu1  ;;  %v2264_v62 = vadd.f32 %v5847_v5, %v5846_v16  ;;  %v2467_v58 = vadd.f32 %v5848_v6, %v2261_v37  ;;  %v5860_v16 = vld [vmem:[#allocation43_spill] sm:$0xff] }
 0x210   : > { %3167 = vst.msk [vmem:[%s5458_s23 + $0x34] sm:$0xf] %vm3153_vm8, %v3523_v44  ;;  %v2980_v35 = vadd.f32 %v5435_v4, %v2941_v19  ;;  %v2939_v31 = vmul.f32 %v5425_v15, %v2900_v36  ;;  %v2905_v12 = vadd.f32 %v3991_v59, %v2693_v42  ;;  %v2691_v13 = vadd.f32 %v2624_v25, %v2463_v2  ;;  %v2839_v41 = vpop.f32.mrf.mxu0 }
 0x211   : > { %v3528_v7 = vpack.c.bf16 %v3011_v27, %v3011_v27  ;;  %v3009_v60 = vmax.f32 %v2977_v24, 0.0  ;;  %v3958_v3 = vpop.f32.mrf.mxu1  ;;  %v2262_v52 = vadd.f32 %v5397_v18, %v5849_v56  ;;  %v2470_v10 = vadd.f32 %v5850_v40, %v2264_v62 }
 0x212   : > { %v3012_v26 = vmax.f32 %v2980_v35, 0.0  ;;  %v2978_v50 = vadd.f32 %v5435_v4, %v2939_v31  ;;  %v2944_v43 = vmul.f32 %v5425_v15, %v2905_v12  ;;  %v2903_v21 = vadd.f32 %v2836_v39, %v2691_v13  ;;  %v3995_v0 = vpop.f32.mrf.mxu0 }
 0x213   : > { %3172 = vst.msk [vmem:[%s5458_s23 + $0x48] sm:$0xf] %vm3153_vm8, %v3528_v7  ;;  %v3526_v30 = vpack.c.bf16 %v3009_v60, %v3009_v60  ;;  %v2694_v33 = vadd.f32 %v3958_v3, %v2466_v11  ;;  %v2627_v57 = vpop.f32.mrf.mxu1  ;;  %v5852_v11 = vld [vmem:[#allocation14_spill] sm:$0xff]  ;;  %v2268_v37 = vadd.f32 %v5857_v9, %v5856_v29 }
 0x214   : > { %v3529_v59 = vpack.c.bf16 %v3012_v26, %v3012_v26  ;;  %v3010_v45 = vmax.f32 %v2978_v50, 0.0  ;;  %v2983_v23 = vadd.f32 %v5435_v4, %v2944_v43  ;;  %v2942_v46 = vmul.f32 %v5425_v15, %v2903_v21  ;;  %v2852_v22 = vpop.f32.mrf.mxu0 }
 0x215   : > { %3170 = vst.msk [vmem:[%s5458_s23 + $0x40] sm:$0xf] %vm3153_vm8, %v3526_v30  ;;  %v2906_v38 = vadd.f32 %v3992_v20, %v2694_v33  ;;  %v2692_v53 = vadd.f32 %v2627_v57, %v2464_v55  ;;  %v3961_v17 = vpop.f32.mrf.mxu1  ;;  %v5851_v20 = vld [vmem:[#allocation34_spill] sm:$0xff]  ;;  %v2267_v48 = vadd.f32 %v5853_v34, %v5852_v11 }
 0x216   : > { %3173 = vst.msk [vmem:[%s5458_s23 + $0x4c] sm:$0xf] %vm3153_vm8, %v3529_v59  ;;  %v3527_v14 = vpack.c.bf16 %v3010_v45, %v3010_v45  ;;  %v3015_v39 = vmax.f32 %v2983_v23, 0.0  ;;  %v2981_v8 = vadd.f32 %v5435_v4, %v2942_v46  ;;  %v2697_v2 = vadd.f32 %v3961_v17, %v2469_v61  ;;  %v3996_v63 = vpop.f32.mrf.mxu0  ;;  %v5859_v61 = vld [vmem:[#allocation25_spill] sm:$0xff] }
 0x217   : > { %v2945_v1 = vmul.f32 %v5425_v15, %v2906_v38  ;;  %v2904_v49 = vadd.f32 %v2839_v41, %v2692_v53  ;;  %v2640_v18 = vpop.f32.mrf.mxu1  ;;  %v2468_v47 = vadd.f32 %v5851_v20, %v2262_v52  ;;  %v5854_v41 = vld [vmem:[#allocation17_spill] sm:$0xff]  ;;  %v2266_v5 = vadd.f32 %v5860_v16, %v5859_v61 }
 0x218   : > { %3171 = vst.msk [vmem:[%s5458_s23 + $0x44] sm:$0xf] %vm3153_vm8, %v3527_v14  ;;  %v3532_v54 = vpack.c.bf16 %v3015_v39, %v3015_v39  ;;  %v3013_v44 = vmax.f32 %v2981_v8, 0.0  ;;  %v2909_v19 = vadd.f32 %v3995_v0, %v2697_v2  ;;  %v2695_v36 = vadd.f32 %v2640_v18, %v2467_v58  ;;  %v2855_v42 = vpop.f32.mrf.mxu0  ;;  %v5858_v0 = vld [vmem:[#allocation36_spill] sm:$0xff]  ;;  %v5862_v58 = vld [vmem:[#allocation39_spill] sm:$0xff]  ;;  %v5863_v2 = vld [vmem:[#allocation41_spill] sm:$0xff] }
 0x219   : > { %v2984_v51 = vadd.f32 %v5435_v4, %v2945_v1  ;;  %v2943_v27 = vmul.f32 %v5425_v15, %v2904_v49  ;;  %v3962_v24 = vpop.f32.mrf.mxu1  ;;  %v2265_v55 = vadd.f32 %v5855_v32, %v5854_v41  ;;  %v2473_v28 = vadd.f32 %v5858_v0, %v2267_v48 }
 0x21a   : > { %3176 = vst.msk [vmem:[%s5458_s23 + $0x58] sm:$0xf] %vm3153_vm8, %v3532_v54  ;;  %v3530_v25 = vpack.c.bf16 %v3013_v44, %v3013_v44  ;;  %v2948_v35 = vmul.f32 %v5425_v15, %v2909_v19  ;;  %v2907_v31 = vadd.f32 %v2852_v22, %v2695_v36  ;;  %v2698_v12 = vadd.f32 %v3962_v24, %v2470_v10  ;;  %v3999_v13 = vpop.f32.mrf.mxu0  ;;  %v5861_v22 = vld [vmem:[#allocation37_spill] sm:$0xff] }
 0x21b   : > { %v3016_v7 = vmax.f32 %v2984_v51, 0.0  ;;  %v2982_v60 = vadd.f32 %v5435_v4, %v2943_v27  ;;  %v2643_v3 = vpop.f32.mrf.mxu1  ;;  %v2471_v6 = vadd.f32 %v5861_v22, %v2265_v55  ;;  %v2474_v56 = vadd.f32 %v5862_v58, %v2268_v37 }
 0x21c   : > { %3174 = vst.msk [vmem:[%s5458_s23 + $0x50] sm:$0xf] %vm3153_vm8, %v3530_v25  ;;  %v2987_v26 = vadd.f32 %v5435_v4, %v2948_v35  ;;  %v2946_v50 = vmul.f32 %v5425_v15, %v2907_v31  ;;  %v2910_v43 = vadd.f32 %v3996_v63, %v2698_v12  ;;  %v2696_v21 = vadd.f32 %v2643_v3, %v2468_v47  ;;  %v2868_v57 = vpop.f32.mrf.mxu0 }
 0x21d   : > { %v3533_v62 = vpack.c.bf16 %v3016_v7, %v3016_v7  ;;  %v3014_v30 = vmax.f32 %v2982_v60, 0.0  ;;  %v3965_v33 = vpop.f32.mrf.mxu1  ;;  %v2472_v63 = vadd.f32 %v5863_v2, %v2266_v5 }
 0x21e   : > { %v3019_v59 = vmax.f32 %v2987_v26, 0.0  ;;  %v2985_v45 = vadd.f32 %v5435_v4, %v2946_v50  ;;  %v2949_v23 = vmul.f32 %v5425_v15, %v2910_v43  ;;  %v2908_v46 = vadd.f32 %v2855_v42, %v2696_v21  ;;  %v4000_v49 = vpop.f32.mrf.mxu0 }
 0x21f   : > { %3177 = vst.msk [vmem:[%s5458_s23 + $0x5c] sm:$0xf] %vm3153_vm8, %v3533_v62  ;;  %v3531_v52 = vpack.c.bf16 %v3014_v30, %v3014_v30  ;;  %v2701_v38 = vadd.f32 %v3965_v33, %v2473_v28  ;;  %v2656_v53 = vpop.f32.mrf.mxu1 }
 0x220   : > { %v3536_v17 = vpack.c.bf16 %v3019_v59, %v3019_v59  ;;  %v3017_v14 = vmax.f32 %v2985_v45, 0.0  ;;  %v2988_v39 = vadd.f32 %v5435_v4, %v2949_v23  ;;  %v2947_v8 = vmul.f32 %v5425_v15, %v2908_v46  ;;  %v2871_v24 = vpop.f32.mrf.mxu0 }
 0x221   : > { %3175 = vst.msk [vmem:[%s5458_s23 + $0x54] sm:$0xf] %vm3153_vm8, %v3531_v52  ;;  %v2913_v40 = vadd.f32 %v3999_v13, %v2701_v38  ;;  %v2699_v10 = vadd.f32 %v2656_v53, %v2471_v6  ;;  %v3966_v1 = vpop.f32.mrf.mxu1 }
 0x222   : > { %3180 = vst.msk [vmem:[%s5458_s23 + $0x68] sm:$0xf] %vm3153_vm8, %v3536_v17  ;;  %v3534_v18 = vpack.c.bf16 %v3017_v14, %v3017_v14  ;;  %v3020_v54 = vmax.f32 %v2988_v39, 0.0  ;;  %v2986_v44 = vadd.f32 %v5435_v4, %v2947_v8  ;;  %v2702_v19 = vadd.f32 %v3966_v1, %v2474_v56 }
 0x223   : > { %v2952_v36 = vmul.f32 %v5425_v15, %v2913_v40  ;;  %v2911_v42 = vadd.f32 %v2868_v57, %v2699_v10  ;;  %v2659_v20 = vpop.f32.mrf.mxu1 }
 0x224   : > { %3178 = vst.msk [vmem:[%s5458_s23 + $0x60] sm:$0xf] %vm3153_vm8, %v3534_v18  ;;  %v3537_v47 = vpack.c.bf16 %v3020_v54, %v3020_v54  ;;  %v3018_v11 = vmax.f32 %v2986_v44, 0.0  ;;  %v2914_v34 = vadd.f32 %v4000_v49, %v2702_v19  ;;  %v2700_v48 = vadd.f32 %v2659_v20, %v2472_v63 }
 0x225   : > { %v2991_v51 = vadd.f32 %v5435_v4, %v2952_v36  ;;  %v2950_v27 = vmul.f32 %v5425_v15, %v2911_v42 }
 0x226   : > { %3181 = vst.msk [vmem:[%s5458_s23 + $0x6c] sm:$0xf] %vm3153_vm8, %v3537_v47  ;;  %v3535_v25 = vpack.c.bf16 %v3018_v11, %v3018_v11  ;;  %v2953_v35 = vmul.f32 %v5425_v15, %v2914_v34  ;;  %v2912_v31 = vadd.f32 %v2871_v24, %v2700_v48 }
 0x227   : > { %v3023_v12 = vmax.f32 %v2991_v51, 0.0  ;;  %v2989_v13 = vadd.f32 %v5435_v4, %v2950_v27 }
 0x228   : > { %3179 = vst.msk [vmem:[%s5458_s23 + $0x64] sm:$0xf] %vm3153_vm8, %v3535_v25  ;;  %v2992_v41 = vadd.f32 %v5435_v4, %v2953_v35  ;;  %v2951_v32 = vmul.f32 %v5425_v15, %v2912_v31 }
 0x229   : > { %v3540_v55 = vpack.c.bf16 %v3023_v12, %v3023_v12  ;;  %v3021_v29 = vmax.f32 %v2989_v13, 0.0 }
 0x22a   : > { %v3024_v9 = vmax.f32 %v2992_v41, 0.0  ;;  %v2990_v37 = vadd.f32 %v5435_v4, %v2951_v32 }
 0x22b   : > { %3184 = vst.msk [vmem:[%s5458_s23 + $0x78] sm:$0xf] %vm3153_vm8, %v3540_v55  ;;  %v3538_v7 = vpack.c.bf16 %v3021_v29, %v3021_v29 }
 0x22c   : > { %v3541_v60 = vpack.c.bf16 %v3024_v9, %v3024_v9  ;;  %v3022_v3 = vmax.f32 %v2990_v37, 0.0 }
 0x22d   : > { %3182 = vst.msk [vmem:[%s5458_s23 + $0x70] sm:$0xf] %vm3153_vm8, %v3538_v7 }
 0x22e   : > { %3185 = vst.msk [vmem:[%s5458_s23 + $0x7c] sm:$0xf] %vm3153_vm8, %v3541_v60  ;;  %v3539_v26 = vpack.c.bf16 %v3022_v3, %v3022_v3 }
 0x230   : > { %3183 = vst.msk [vmem:[%s5458_s23 + $0x74] sm:$0xf] %vm3153_vm8, %v3539_v26 }
 0x231 PF: > { %s14_s15 = sadd.s32 1, %s4046_s15  }
 0x232   : > { %p11_p5 = scmp.ge.s32.totalorder %s14_s15, 4  }
 0x234   :  { %13 = sbr.rel (!%p11_p5) target bundleno = 1 (0x1), region = 74 }

</bundles_post_ra>
